<compile_context>
chip_gen: v6e
topology: v6e:2x2x1
jax: 0.10.0
libtpu: 0.0.40
codegen_flags: <defaults>
</compile_context>

<pallas_src>
import math

import jax
import jax.numpy as jnp
from jax.experimental import pallas as pl
from jax.experimental.pallas import tpu as pltpu

# ----------------------------- configuration --------------------------------
SAMPLE_RATE = 16000
N_FFT = 400
HOP = 200                      # == N_FFT // 2 (torchaudio default)
N_FREQ = N_FFT // 2 + 1        # 201
F_PAD = 256                    # lane-padded frequency dim
N_MELS = 40
N_MFCC = 40
M_PAD = 128                    # lane-padded mel / mfcc dim
TOP_DB = 80.0
AMIN = 1e-10
BN_EPS = 1e-5
N_CLASSES = 10


# ------------------------------ Pallas kernels -------------------------------
def _mfcc_kernel(h0_ref, h1_ref, cossin_ref, fb_ref, dct_ref, o_ref):
    # h0/h1: (1, T, HOP) half-frames (hop == n_fft/2, so frame[t] = [h0[t]|h1[t]]).
    # cossin: (N_FFT, 2*F_PAD) = [win*cos | -win*sin], zero-padded lanes.
    # fb: (F_PAD, M_PAD) mel filterbank (zero-padded).  dct: (M_PAD, M_PAD).
    h0 = h0_ref[0]
    h1 = h1_ref[0]
    cs_top = cossin_ref[pl.ds(0, HOP), :]      # DFT rows hit by the first half
    cs_bot = cossin_ref[pl.ds(HOP, HOP), :]    # DFT rows hit by the second half
    spec = (jnp.dot(h0, cs_top, preferred_element_type=jnp.float32)
            + jnp.dot(h1, cs_bot, preferred_element_type=jnp.float32))  # (T, 512)
    re = spec[:, :F_PAD]
    im = spec[:, F_PAD:]
    power = re * re + im * im                                            # (T, 256)
    mel = jnp.dot(power, fb_ref[...], preferred_element_type=jnp.float32)  # (T, 128)
    db = 10.0 * jnp.log10(jnp.maximum(mel, AMIN))
    # Padded mel columns are exactly AMIN -> -100 dB, never above the valid max,
    # so the per-sample top_db reference is unaffected by padding.
    db = jnp.maximum(db, jnp.max(db) - TOP_DB)
    o_ref[0] = jnp.dot(db, dct_ref[...], preferred_element_type=jnp.float32)


def _conv_pool_kernel(p_ref, w_ref, scale_ref, shift_ref, o_ref):
    # p: (1, 4, K, P) quadrant-grouped im2col patches for one sample.
    # w: (Cout, K).  scale/shift: (Cout, 1) folded conv-bias + BN (eval).
    # o: (1, Cout, P) = MaxPool2d(2,2)(ReLU(BN(conv))), pooled spatial in lanes.
    w = w_ref[...]
    scale = scale_ref[...]
    shift = shift_ref[...]

    def quad(q):
        y = jnp.dot(w, p_ref[0, q], preferred_element_type=jnp.float32)
        return jnp.maximum(y * scale + shift, 0.0)

    o_ref[0] = jnp.maximum(jnp.maximum(quad(0), quad(1)),
                           jnp.maximum(quad(2), quad(3)))


def _conv_cls_kernel(p_ref, w3_ref, s3_ref, sh3_ref, wl_ref, bl_ref, o_ref):
    # Final conv layer (pooled to 1x1) fused with Flatten + Linear classifier.
    # p: (1, 4, 1, K3).  w3: (K3, C3).  s3/sh3: (1, C3).  wl: (C3, n_classes).
    w3 = w3_ref[...]
    s3 = s3_ref[...]
    sh3 = sh3_ref[...]

    def quad(q):
        y = jnp.dot(p_ref[0, q], w3, preferred_element_type=jnp.float32)   # (1, C3)
        return jnp.maximum(y * s3 + sh3, 0.0)

    feat = jnp.maximum(jnp.maximum(quad(0), quad(1)),
                       jnp.maximum(quad(2), quad(3)))                      # (1, C3)
    o_ref[0] = (jnp.dot(feat, wl_ref[...], preferred_element_type=jnp.float32)
                + bl_ref[...])


# ------------------------------ Pallas wrappers ------------------------------
def _parallel_b():
    return pltpu.CompilerParams(dimension_semantics=("parallel",))


def mfcc_pallas(h0, h1, cossin, fb, dct):
    B, T, hop = h0.shape
    return pl.pallas_call(
        _mfcc_kernel,
        out_shape=jax.ShapeDtypeStruct((B, T, M_PAD), jnp.float32),
        grid=(B,),
        in_specs=[
            pl.BlockSpec((1, T, hop), lambda b: (b, 0, 0)),
            pl.BlockSpec((1, T, hop), lambda b: (b, 0, 0)),
            pl.BlockSpec(cossin.shape, lambda b: (0, 0)),
            pl.BlockSpec(fb.shape, lambda b: (0, 0)),
            pl.BlockSpec(dct.shape, lambda b: (0, 0)),
        ],
        out_specs=pl.BlockSpec((1, T, M_PAD), lambda b: (b, 0, 0)),
        compiler_params=_parallel_b(),
    )(h0, h1, cossin, fb, dct)


def conv_pool_pallas(patches, w, scale, shift):
    B, Q, K, P = patches.shape
    Cout = w.shape[0]
    return pl.pallas_call(
        _conv_pool_kernel,
        out_shape=jax.ShapeDtypeStruct((B, Cout, P), jnp.float32),
        grid=(B,),
        in_specs=[
            pl.BlockSpec((1, Q, K, P), lambda b: (b, 0, 0, 0)),
            pl.BlockSpec((Cout, K), lambda b: (0, 0)),
            pl.BlockSpec((Cout, 1), lambda b: (0, 0)),
            pl.BlockSpec((Cout, 1), lambda b: (0, 0)),
        ],
        out_specs=pl.BlockSpec((1, Cout, P), lambda b: (b, 0, 0)),
        compiler_params=_parallel_b(),
    )(patches, w, scale, shift)


def conv_cls_pallas(patches, w3t, s3, sh3, wlt, bl):
    B, Q, _, K3 = patches.shape
    n_classes = wlt.shape[1]
    return pl.pallas_call(
        _conv_cls_kernel,
        out_shape=jax.ShapeDtypeStruct((B, 1, n_classes), jnp.float32),
        grid=(B,),
        in_specs=[
            pl.BlockSpec((1, Q, 1, K3), lambda b: (b, 0, 0, 0)),
            pl.BlockSpec(w3t.shape, lambda b: (0, 0)),
            pl.BlockSpec(s3.shape, lambda b: (0, 0)),
            pl.BlockSpec(sh3.shape, lambda b: (0, 0)),
            pl.BlockSpec(wlt.shape, lambda b: (0, 0)),
            pl.BlockSpec(bl.shape, lambda b: (0, 0)),
        ],
        out_specs=pl.BlockSpec((1, 1, n_classes), lambda b: (b, 0, 0)),
        compiler_params=_parallel_b(),
    )(patches, w3t, s3, sh3, wlt, bl)


# ------------------------------ JAX glue -------------------------------------
def prep_waveform(wav):
    # wav: (B, L); torch.stft center=True reflect padding.  Since hop == n_fft/2,
    # frames are pairs of consecutive length-HOP halves -> two cheap slices, no
    # overlapping gather.
    B, L = wav.shape
    assert L % HOP == 0, "this implementation assumes L divisible by hop (200)"
    pad = N_FFT // 2
    xp = jnp.pad(wav, ((0, 0), (pad, pad)), mode="reflect")       # (B, L + N_FFT)
    T = 1 + L // HOP
    halves = xp.reshape(B, T + 1, HOP)
    return halves[:, :T, :], halves[:, 1:, :]                     # h0, h1


def im2col_pooled(x, kh, kw, stride, pad):
    # NCHW -> quadrant-grouped patches (B, 4, C*kh*kw, Hp*Wp) where (Hp, Wp) is
    # the MaxPool2d(2,2) output grid and quadrant q covers conv position
    # (2i+a, 2j+b).  Lets the kernel fuse pooling as a 4-way max of matmuls.
    B, C, H, W = x.shape
    xp = jnp.pad(x, ((0, 0), (0, 0), (pad, pad), (pad, pad)))
    Ho = (H + 2 * pad - kh) // stride + 1
    Wo = (W + 2 * pad - kw) // stride + 1
    Hp, Wp = Ho // 2, Wo // 2
    a = jnp.arange(2)[:, None, None]
    i = jnp.arange(Hp)[None, :, None]
    dh = jnp.arange(kh)[None, None, :]
    rows = (2 * i + a) * stride + dh                              # (2, Hp, kh)
    b = jnp.arange(2)[:, None, None]
    j = jnp.arange(Wp)[None, :, None]
    dw = jnp.arange(kw)[None, None, :]
    cols = (2 * j + b) * stride + dw                              # (2, Wp, kw)
    r_idx = rows[:, None, :, None, :, None]                       # (2,1,Hp,1,kh,1)
    c_idx = cols[None, :, None, :, None, :]                       # (1,2,1,Wp,1,kw)
    patches = xp[:, :, r_idx, c_idx]                              # (B,C,2,2,Hp,Wp,kh,kw)
    patches = patches.transpose(0, 2, 3, 1, 6, 7, 4, 5)           # (B,2,2,C,kh,kw,Hp,Wp)
    return patches.reshape(B, 4, C * kh * kw, Hp * Wp), Hp, Wp


def fold_bn(bias, bn):
    # Conv bias + eval-mode BatchNorm folded into per-channel scale/shift.
    gamma, beta, mean, var = bn
    s = gamma / jnp.sqrt(var + BN_EPS)
    return s, (bias - mean) * s + beta


def make_consts():
    # Hann-windowed DFT as one lane-padded [cos | -sin] matrix (N = 512).
    n = jnp.arange(N_FFT, dtype=jnp.float32)
    window = 0.5 - 0.5 * jnp.cos(2.0 * math.pi * n / N_FFT)       # periodic Hann
    k = jnp.arange(N_FREQ, dtype=jnp.float32)
    ang = 2.0 * math.pi * n[:, None] * k[None, :] / N_FFT
    cossin = jnp.zeros((N_FFT, 2 * F_PAD), jnp.float32)
    cossin = cossin.at[:, :N_FREQ].set(window[:, None] * jnp.cos(ang))
    cossin = cossin.at[:, F_PAD:F_PAD + N_FREQ].set(window[:, None] * (-jnp.sin(ang)))

    # torchaudio melscale_fbanks (HTK, norm=None), zero-padded to (F_PAD, M_PAD).
    all_freqs = jnp.linspace(0.0, SAMPLE_RATE // 2, N_FREQ)
    m_max = 2595.0 * math.log10(1.0 + (SAMPLE_RATE / 2.0) / 700.0)
    m_pts = jnp.linspace(0.0, m_max, N_MELS + 2)
    f_pts = 700.0 * (10.0 ** (m_pts / 2595.0) - 1.0)
    f_diff = f_pts[1:] - f_pts[:-1]
    slopes = f_pts[None, :] - all_freqs[:, None]
    down = -slopes[:, :-2] / f_diff[:-1]
    up = slopes[:, 2:] / f_diff[1:]
    fb = jnp.maximum(0.0, jnp.minimum(down, up)).astype(jnp.float32)   # (201, 40)
    fb_pad = jnp.zeros((F_PAD, M_PAD), jnp.float32).at[:N_FREQ, :N_MELS].set(fb)

    # torchaudio create_dct, norm="ortho"; (n_mels, n_mfcc), zero-padded.
    nm = jnp.arange(N_MELS, dtype=jnp.float32)
    km = jnp.arange(N_MFCC, dtype=jnp.float32)[:, None]
    dct = jnp.cos(math.pi / N_MELS * (nm + 0.5) * km)             # (n_mfcc, n_mels)
    dct = dct.at[0].multiply(1.0 / math.sqrt(2.0))
    dct = (dct * math.sqrt(2.0 / N_MELS)).T.astype(jnp.float32)   # (n_mels, n_mfcc)
    dct_pad = jnp.zeros((M_PAD, M_PAD), jnp.float32).at[:N_MELS, :N_MFCC].set(dct)
    return cossin, fb_pad, dct_pad


def cnn_mfcc_forward(x, params, consts):
    # x: (B, 1, L) waveform
    cossin, fb_pad, dct_pad = consts
    wav = x[:, 0, :]
    h0, h1 = prep_waveform(wav)
    mfcc = mfcc_pallas(h0, h1, cossin, fb_pad, dct_pad)            # (B, T, 128)
    B, T, _ = mfcc.shape
    img = mfcc[:, :, :N_MFCC].transpose(0, 2, 1)[:, None]          # (B, 1, 40, T) NCHW

    # conv1 (8x8, s2, p1) + BN + ReLU + MaxPool(2,2), fused
    p1, Hp1, Wp1 = im2col_pooled(img, 8, 8, 2, 1)
    s1, sh1 = fold_bn(params["b1"], params["bn1"])
    a1 = conv_pool_pallas(p1, params["w1"].reshape(16, -1),
                          s1[:, None], sh1[:, None])               # (B, 16, Hp1*Wp1)
    a1 = a1.reshape(B, 16, Hp1, Wp1)                               # Dropout -> identity

    # conv2 (5x5, s2, p1) + BN + ReLU + MaxPool(2,2), fused
    p2, Hp2, Wp2 = im2col_pooled(a1, 5, 5, 2, 1)
    s2, sh2 = fold_bn(params["b2"], params["bn2"])
    a2 = conv_pool_pallas(p2, params["w2"].reshape(32, -1),
                          s2[:, None], sh2[:, None])               # (B, 32, Hp2*Wp2)
    a2 = a2.reshape(B, 32, Hp2, Wp2)                               # Dropout -> identity

    # conv3 (3x3, s1, p1) + BN + ReLU + MaxPool(2,2) + Flatten + Linear, fused
    p3, Hp3, Wp3 = im2col_pooled(a2, 3, 3, 1, 1)
    assert Hp3 * Wp3 == 1, "fused classifier assumes the final pooled map is 1x1"
    p3 = p3.transpose(0, 1, 3, 2)                                  # (B, 4, 1, K3)
    s3, sh3 = fold_bn(params["b3"], params["bn3"])
    w3t = params["w3"].reshape(32, -1).T                           # (K3, 32)
    logits = conv_cls_pallas(p3, w3t, s3[None, :], sh3[None, :],
                             params["wl"].T, params["bl"][None, :])  # (B, 1, n_cls)
    return logits.reshape(B, -1)


# ------------------------------ parameter init -------------------------------
def _conv_out(n, k, s, p):
    return (n + 2 * p - k) // s + 1


def compute_linear_in(t):
    h, w = N_MFCC, t
    h, w = _conv_out(h, 8, 2, 1), _conv_out(w, 8, 2, 1); h, w = h // 2, w // 2
    h, w = _conv_out(h, 5, 2, 1), _conv_out(w, 5, 2, 1); h, w = h // 2, w // 2
    h, w = _conv_out(h, 3, 1, 1), _conv_out(w, 3, 1, 1); h, w = h // 2, w // 2
    return 32 * h * w


def _uniform(key, shape, bound):
    return jax.random.uniform(key, shape, jnp.float32, -bound, bound)


def _bn_default(c):
    # PyTorch BatchNorm2d __init__: weight=1, bias=0, running_mean=0, running_var=1
    return (jnp.ones((c,), jnp.float32), jnp.zeros((c,), jnp.float32),
            jnp.zeros((c,), jnp.float32), jnp.ones((c,), jnp.float32))


def init_params(key, linear_in, n_classes):
    ks = jax.random.split(key, 8)
    p = {}
    fi = 1 * 8 * 8
    p["w1"] = _uniform(ks[0], (16, 1, 8, 8), 1.0 / math.sqrt(fi))
    p["b1"] = _uniform(ks[1], (16,), 1.0 / math.sqrt(fi))
    p["bn1"] = _bn_default(16)
    fi = 16 * 5 * 5
    p["w2"] = _uniform(ks[2], (32, 16, 5, 5), 1.0 / math.sqrt(fi))
    p["b2"] = _uniform(ks[3], (32,), 1.0 / math.sqrt(fi))
    p["bn2"] = _bn_default(32)
    fi = 32 * 3 * 3
    p["w3"] = _uniform(ks[4], (32, 32, 3, 3), 1.0 / math.sqrt(fi))
    p["b3"] = _uniform(ks[5], (32,), 1.0 / math.sqrt(fi))
    p["bn3"] = _bn_default(32)
    fi = linear_in
    p["wl"] = _uniform(ks[6], (n_classes, linear_in), 1.0 / math.sqrt(fi))
    p["bl"] = _uniform(ks[7], (n_classes,), 1.0 / math.sqrt(fi))
    return p


# ------------------------------ main -----------------------------------------
if __name__ == "__main__":
    B, L = 2, 8000          # 0.5 s of 16 kHz audio -> T = 41 frames
    key = jax.random.PRNGKey(0)
    k_x, k_p = jax.random.split(key)

    x = jax.random.normal(k_x, (B, 1, L), jnp.float32)

    T = 1 + L // HOP
    linear_in = compute_linear_in(T)
    params = init_params(k_p, linear_in, N_CLASSES)
    consts = make_consts()

    fwd = jax.jit(cnn_mfcc_forward)
    out = jax.block_until_ready(fwd(x, params, consts))

    assert out.shape == (B, N_CLASSES), out.shape
    assert bool(jnp.all(jnp.isfinite(out)))
    print("KERNEL_OK")
</pallas_src>

<mosaic_0001>
module attributes {stable_mosaic.version = 11 : i64} {
  func.func @_mfcc_kernel(%arg0: i32, %arg1: memref<1x41x200xf32, #tpu.memory_space<vmem>>, %arg2: memref<1x41x200xf32, #tpu.memory_space<vmem>>, %arg3: memref<400x512xf32, #tpu.memory_space<vmem>>, %arg4: memref<256x128xf32, #tpu.memory_space<vmem>>, %arg5: memref<128x128xf32, #tpu.memory_space<vmem>>, %arg6: memref<1x41x128xf32, #tpu.memory_space<vmem>>) attributes {dimension_semantics = [#tpu.dimension_semantics<parallel>], iteration_bounds = array<i64: 2>, scalar_prefetch = 0 : i64, scratch_operands = 0 : i64, tpu.core_type = #tpu.core_type<tc>, window_params = [{transform_indices = @transform_0, window_bounds = array<i64: 1, 41, 200>}, {transform_indices = @transform_1, window_bounds = array<i64: 1, 41, 200>}, {pipeline_mode = #tpu.pipeline_mode<synchronous>, transform_indices = @transform_2, window_bounds = array<i64: 400, 512>}, {pipeline_mode = #tpu.pipeline_mode<synchronous>, transform_indices = @transform_3, window_bounds = array<i64: 256, 128>}, {pipeline_mode = #tpu.pipeline_mode<synchronous>, transform_indices = @transform_4, window_bounds = array<i64: 128, 128>}, {transform_indices = @transform_5, window_bounds = array<i64: 1, 41, 128>}]} {
    %c0 = arith.constant 0 : index
    %c0_0 = arith.constant 0 : index
    %c0_1 = arith.constant 0 : index
    %0 = vector.load %arg1[%c0, %c0_0, %c0_1] : memref<1x41x200xf32, #tpu.memory_space<vmem>>, vector<1x41x200xf32>
    %1 = vector.shape_cast %0 : vector<1x41x200xf32> to vector<41x200xf32>
    %c0_2 = arith.constant 0 : index
    %c0_3 = arith.constant 0 : index
    %c0_4 = arith.constant 0 : index
    %2 = vector.load %arg2[%c0_2, %c0_3, %c0_4] : memref<1x41x200xf32, #tpu.memory_space<vmem>>, vector<1x41x200xf32>
    %3 = vector.shape_cast %2 : vector<1x41x200xf32> to vector<41x200xf32>
    %c0_5 = arith.constant 0 : index
    %c0_6 = arith.constant 0 : index
    %4 = vector.load %arg3[%c0_5, %c0_6] : memref<400x512xf32, #tpu.memory_space<vmem>>, vector<200x512xf32>
    %c200 = arith.constant 200 : index
    %c0_7 = arith.constant 0 : index
    %5 = vector.load %arg3[%c200, %c0_7] : memref<400x512xf32, #tpu.memory_space<vmem>>, vector<200x512xf32>
    %cst = arith.constant dense<0.000000e+00> : vector<41x512xf32>
    %6 = tpu.matmul %1, %4, %cst {dimension_numbers = #tpu.dot_dimension_numbers<[1], [0], [0], [1], [0, 0, 1, 1], [], []>} : vector<41x200xf32>, vector<200x512xf32>, vector<41x512xf32> -> vector<41x512xf32>
    %cst_8 = arith.constant dense<0.000000e+00> : vector<41x512xf32>
    %7 = tpu.matmul %3, %5, %cst_8 {dimension_numbers = #tpu.dot_dimension_numbers<[1], [0], [0], [1], [0, 0, 1, 1], [], []>} : vector<41x200xf32>, vector<200x512xf32>, vector<41x512xf32> -> vector<41x512xf32>
    %8 = arith.addf %6, %7 : vector<41x512xf32>
    %9 = vector.extract_strided_slice %8 {offsets = [0, 0], sizes = [41, 256], strides = [1, 1]} : vector<41x512xf32> to vector<41x256xf32>
    %10 = vector.extract_strided_slice %8 {offsets = [0, 256], sizes = [41, 256], strides = [1, 1]} : vector<41x512xf32> to vector<41x256xf32>
    %11 = arith.mulf %9, %9 : vector<41x256xf32>
    %12 = arith.mulf %10, %10 : vector<41x256xf32>
    %13 = arith.addf %11, %12 : vector<41x256xf32>
    %c0_9 = arith.constant 0 : index
    %c0_10 = arith.constant 0 : index
    %14 = vector.load %arg4[%c0_9, %c0_10] : memref<256x128xf32, #tpu.memory_space<vmem>>, vector<256x128xf32>
    %cst_11 = arith.constant dense<0.000000e+00> : vector<41x128xf32>
    %15 = tpu.matmul %13, %14, %cst_11 {dimension_numbers = #tpu.dot_dimension_numbers<[1], [0], [0], [1], [0, 0, 1, 1], [], []>} : vector<41x256xf32>, vector<256x128xf32>, vector<41x128xf32> -> vector<41x128xf32>
    %cst_12 = arith.constant 1.000000e-10 : f32
    %16 = vector.broadcast %cst_12 : f32 to vector<41x128xf32>
    %17 = arith.maximumf %15, %16 : vector<41x128xf32>
    %18 = math.log %17 : vector<41x128xf32>
    %cst_13 = arith.constant 0.434294492 : f32
    %19 = vector.broadcast %cst_13 : f32 to vector<41x128xf32>
    %20 = arith.mulf %18, %19 : vector<41x128xf32>
    %cst_14 = arith.constant 1.000000e+01 : f32
    %21 = vector.broadcast %cst_14 : f32 to vector<41x128xf32>
    %22 = arith.mulf %21, %20 : vector<41x128xf32>
    %23 = vector.shape_cast %22 : vector<41x128xf32> to vector<1x41x128xf32>
    %cst_15 = arith.constant dense<0xFF800000> : vector<1xf32>
    %24 = vector.multi_reduction <maximumf>, %23, %cst_15 [1, 2] : vector<1x41x128xf32> to vector<1xf32>
    %25 = vector.shape_cast %24 : vector<1xf32> to vector<1x1x1xf32>
    %26 = vector.extract %25[0, 0, 0] : f32 from vector<1x1x1xf32>
    %cst_16 = arith.constant 8.000000e+01 : f32
    %27 = arith.subf %26, %cst_16 : f32
    %28 = vector.broadcast %27 : f32 to vector<41x128xf32>
    %29 = arith.maximumf %22, %28 : vector<41x128xf32>
    %c0_17 = arith.constant 0 : index
    %c0_18 = arith.constant 0 : index
    %30 = vector.load %arg5[%c0_17, %c0_18] : memref<128x128xf32, #tpu.memory_space<vmem>>, vector<128x128xf32>
    %cst_19 = arith.constant dense<0.000000e+00> : vector<41x128xf32>
    %31 = tpu.matmul %29, %30, %cst_19 {dimension_numbers = #tpu.dot_dimension_numbers<[1], [0], [0], [1], [0, 0, 1, 1], [], []>} : vector<41x128xf32>, vector<128x128xf32>, vector<41x128xf32> -> vector<41x128xf32>
    %c0_20 = arith.constant 0 : index
    %c0_21 = arith.constant 0 : index
    %c0_22 = arith.constant 0 : index
    %32 = vector.load %arg6[%c0_20, %c0_21, %c0_22] : memref<1x41x128xf32, #tpu.memory_space<vmem>>, vector<1x41x128xf32>
    %33 = vector.shape_cast %32 : vector<1x41x128xf32> to vector<41x128xf32>
    %34 = vector.shape_cast %31 : vector<41x128xf32> to vector<1x41x128xf32>
    tpu.vector_store %arg6[%c0_20, %c0_21, %c0_22], %34 {strides = array<i32>} : memref<1x41x128xf32, #tpu.memory_space<vmem>>, vector<1x41x128xf32>,
    return
  }
  func.func @transform_0(%arg0: i32) -> (i32, i32, i32) {
    %c0_i32 = arith.constant 0 : i32
    %c0_i32_0 = arith.constant 0 : i32
    %c0_i32_1 = arith.constant 0 : i32
    return %arg0, %c0_i32, %c0_i32_0 : i32, i32, i32
  }
  func.func @transform_1(%arg0: i32) -> (i32, i32, i32) {
    %c0_i32 = arith.constant 0 : i32
    %c0_i32_0 = arith.constant 0 : i32
    %c0_i32_1 = arith.constant 0 : i32
    return %arg0, %c0_i32, %c0_i32_0 : i32, i32, i32
  }
  func.func @transform_2(%arg0: i32) -> (i32, i32) {
    %c0_i32 = arith.constant 0 : i32
    %c0_i32_0 = arith.constant 0 : i32
    %c0_i32_1 = arith.constant 0 : i32
    return %c0_i32, %c0_i32_0 : i32, i32
  }
  func.func @transform_3(%arg0: i32) -> (i32, i32) {
    %c0_i32 = arith.constant 0 : i32
    %c0_i32_0 = arith.constant 0 : i32
    %c0_i32_1 = arith.constant 0 : i32
    return %c0_i32, %c0_i32_0 : i32, i32
  }
  func.func @transform_4(%arg0: i32) -> (i32, i32) {
    %c0_i32 = arith.constant 0 : i32
    %c0_i32_0 = arith.constant 0 : i32
    %c0_i32_1 = arith.constant 0 : i32
    return %c0_i32, %c0_i32_0 : i32, i32
  }
  func.func @transform_5(%arg0: i32) -> (i32, i32, i32) {
    %c0_i32 = arith.constant 0 : i32
    %c0_i32_0 = arith.constant 0 : i32
    %c0_i32_1 = arith.constant 0 : i32
    return %arg0, %c0_i32, %c0_i32_0 : i32, i32, i32
  }
}

module attributes {stable_mosaic.version = 11 : i64} {
  func.func @_conv_pool_kernel(%arg0: i32, %arg1: memref<1x4x64x81xf32, #tpu.memory_space<vmem>>, %arg2: memref<16x64xf32, #tpu.memory_space<vmem>>, %arg3: memref<16x1xf32, #tpu.memory_space<vmem>>, %arg4: memref<16x1xf32, #tpu.memory_space<vmem>>, %arg5: memref<1x16x81xf32, #tpu.memory_space<vmem>>) attributes {dimension_semantics = [#tpu.dimension_semantics<parallel>], iteration_bounds = array<i64: 2>, scalar_prefetch = 0 : i64, scratch_operands = 0 : i64, tpu.core_type = #tpu.core_type<tc>, window_params = [{transform_indices = @transform_0, window_bounds = array<i64: 1, 4, 64, 81>}, {pipeline_mode = #tpu.pipeline_mode<synchronous>, transform_indices = @transform_1, window_bounds = array<i64: 16, 64>}, {pipeline_mode = #tpu.pipeline_mode<synchronous>, transform_indices = @transform_2, window_bounds = array<i64: 16, 1>}, {pipeline_mode = #tpu.pipeline_mode<synchronous>, transform_indices = @transform_3, window_bounds = array<i64: 16, 1>}, {transform_indices = @transform_4, window_bounds = array<i64: 1, 16, 81>}]} {
    %c0 = arith.constant 0 : index
    %c0_0 = arith.constant 0 : index
    %0 = vector.load %arg2[%c0, %c0_0] : memref<16x64xf32, #tpu.memory_space<vmem>>, vector<16x64xf32>
    %c0_1 = arith.constant 0 : index
    %c0_2 = arith.constant 0 : index
    %1 = vector.load %arg3[%c0_1, %c0_2] : memref<16x1xf32, #tpu.memory_space<vmem>>, vector<16x1xf32>
    %c0_3 = arith.constant 0 : index
    %c0_4 = arith.constant 0 : index
    %2 = vector.load %arg4[%c0_3, %c0_4] : memref<16x1xf32, #tpu.memory_space<vmem>>, vector<16x1xf32>
    %c0_5 = arith.constant 0 : index
    %c0_6 = arith.constant 0 : index
    %c0_7 = arith.constant 0 : index
    %c0_8 = arith.constant 0 : index
    %3 = vector.load %arg1[%c0_5, %c0_6, %c0_7, %c0_8] : memref<1x4x64x81xf32, #tpu.memory_space<vmem>>, vector<1x1x64x81xf32>
    %4 = vector.shape_cast %3 : vector<1x1x64x81xf32> to vector<64x81xf32>
    %cst = arith.constant dense<0.000000e+00> : vector<16x81xf32>
    %5 = tpu.matmul %0, %4, %cst {dimension_numbers = #tpu.dot_dimension_numbers<[1], [0], [0], [1], [0, 0, 1, 1], [], []>} : vector<16x64xf32>, vector<64x81xf32>, vector<16x81xf32> -> vector<16x81xf32>
    %6 = vector.broadcast %1 : vector<16x1xf32> to vector<16x81xf32>
    %7 = arith.mulf %5, %6 : vector<16x81xf32>
    %8 = vector.broadcast %2 : vector<16x1xf32> to vector<16x81xf32>
    %9 = arith.addf %7, %8 : vector<16x81xf32>
    %cst_9 = arith.constant 0.000000e+00 : f32
    %10 = vector.broadcast %cst_9 : f32 to vector<16x81xf32>
    %11 = arith.maximumf %9, %10 : vector<16x81xf32>
    %c0_10 = arith.constant 0 : index
    %c1 = arith.constant 1 : index
    %c0_11 = arith.constant 0 : index
    %c0_12 = arith.constant 0 : index
    %12 = vector.load %arg1[%c0_10, %c1, %c0_11, %c0_12] : memref<1x4x64x81xf32, #tpu.memory_space<vmem>>, vector<1x1x64x81xf32>
    %13 = vector.shape_cast %12 : vector<1x1x64x81xf32> to vector<64x81xf32>
    %cst_13 = arith.constant dense<0.000000e+00> : vector<16x81xf32>
    %14 = tpu.matmul %0, %13, %cst_13 {dimension_numbers = #tpu.dot_dimension_numbers<[1], [0], [0], [1], [0, 0, 1, 1], [], []>} : vector<16x64xf32>, vector<64x81xf32>, vector<16x81xf32> -> vector<16x81xf32>
    %15 = vector.broadcast %1 : vector<16x1xf32> to vector<16x81xf32>
    %16 = arith.mulf %14, %15 : vector<16x81xf32>
    %17 = vector.broadcast %2 : vector<16x1xf32> to vector<16x81xf32>
    %18 = arith.addf %16, %17 : vector<16x81xf32>
    %cst_14 = arith.constant 0.000000e+00 : f32
    %19 = vector.broadcast %cst_14 : f32 to vector<16x81xf32>
    %20 = arith.maximumf %18, %19 : vector<16x81xf32>
    %21 = arith.maximumf %11, %20 : vector<16x81xf32>
    %c0_15 = arith.constant 0 : index
    %c2 = arith.constant 2 : index
    %c0_16 = arith.constant 0 : index
    %c0_17 = arith.constant 0 : index
    %22 = vector.load %arg1[%c0_15, %c2, %c0_16, %c0_17] : memref<1x4x64x81xf32, #tpu.memory_space<vmem>>, vector<1x1x64x81xf32>
    %23 = vector.shape_cast %22 : vector<1x1x64x81xf32> to vector<64x81xf32>
    %cst_18 = arith.constant dense<0.000000e+00> : vector<16x81xf32>
    %24 = tpu.matmul %0, %23, %cst_18 {dimension_numbers = #tpu.dot_dimension_numbers<[1], [0], [0], [1], [0, 0, 1, 1], [], []>} : vector<16x64xf32>, vector<64x81xf32>, vector<16x81xf32> -> vector<16x81xf32>
    %25 = vector.broadcast %1 : vector<16x1xf32> to vector<16x81xf32>
    %26 = arith.mulf %24, %25 : vector<16x81xf32>
    %27 = vector.broadcast %2 : vector<16x1xf32> to vector<16x81xf32>
    %28 = arith.addf %26, %27 : vector<16x81xf32>
    %cst_19 = arith.constant 0.000000e+00 : f32
    %29 = vector.broadcast %cst_19 : f32 to vector<16x81xf32>
    %30 = arith.maximumf %28, %29 : vector<16x81xf32>
    %c0_20 = arith.constant 0 : index
    %c3 = arith.constant 3 : index
    %c0_21 = arith.constant 0 : index
    %c0_22 = arith.constant 0 : index
    %31 = vector.load %arg1[%c0_20, %c3, %c0_21, %c0_22] : memref<1x4x64x81xf32, #tpu.memory_space<vmem>>, vector<1x1x64x81xf32>
    %32 = vector.shape_cast %31 : vector<1x1x64x81xf32> to vector<64x81xf32>
    %cst_23 = arith.constant dense<0.000000e+00> : vector<16x81xf32>
    %33 = tpu.matmul %0, %32, %cst_23 {dimension_numbers = #tpu.dot_dimension_numbers<[1], [0], [0], [1], [0, 0, 1, 1], [], []>} : vector<16x64xf32>, vector<64x81xf32>, vector<16x81xf32> -> vector<16x81xf32>
    %34 = vector.broadcast %1 : vector<16x1xf32> to vector<16x81xf32>
    %35 = arith.mulf %33, %34 : vector<16x81xf32>
    %36 = vector.broadcast %2 : vector<16x1xf32> to vector<16x81xf32>
    %37 = arith.addf %35, %36 : vector<16x81xf32>
    %cst_24 = arith.constant 0.000000e+00 : f32
    %38 = vector.broadcast %cst_24 : f32 to vector<16x81xf32>
    %39 = arith.maximumf %37, %38 : vector<16x81xf32>
    %40 = arith.maximumf %30, %39 : vector<16x81xf32>
    %41 = arith.maximumf %21, %40 : vector<16x81xf32>
    %c0_25 = arith.constant 0 : index
    %c0_26 = arith.constant 0 : index
    %c0_27 = arith.constant 0 : index
    %42 = vector.load %arg5[%c0_25, %c0_26, %c0_27] : memref<1x16x81xf32, #tpu.memory_space<vmem>>, vector<1x16x81xf32>
    %43 = vector.shape_cast %42 : vector<1x16x81xf32> to vector<16x81xf32>
    %44 = vector.shape_cast %41 : vector<16x81xf32> to vector<1x16x81xf32>
    tpu.vector_store %arg5[%c0_25, %c0_26, %c0_27], %44 {strides = array<i32>} : memref<1x16x81xf32, #tpu.memory_space<vmem>>, vector<1x16x81xf32>,
    return
  }
  func.func @transform_0(%arg0: i32) -> (i32, i32, i32, i32) {
    %c0_i32 = arith.constant 0 : i32
    %c0_i32_0 = arith.constant 0 : i32
    %c0_i32_1 = arith.constant 0 : i32
    %c0_i32_2 = arith.constant 0 : i32
    return %arg0, %c0_i32, %c0_i32_0, %c0_i32_1 : i32, i32, i32, i32
  }
  func.func @transform_1(%arg0: i32) -> (i32, i32) {
    %c0_i32 = arith.constant 0 : i32
    %c0_i32_0 = arith.constant 0 : i32
    %c0_i32_1 = arith.constant 0 : i32
    return %c0_i32, %c0_i32_0 : i32, i32
  }
  func.func @transform_2(%arg0: i32) -> (i32, i32) {
    %c0_i32 = arith.constant 0 : i32
    %c0_i32_0 = arith.constant 0 : i32
    %c0_i32_1 = arith.constant 0 : i32
    return %c0_i32, %c0_i32_0 : i32, i32
  }
  func.func @transform_3(%arg0: i32) -> (i32, i32) {
    %c0_i32 = arith.constant 0 : i32
    %c0_i32_0 = arith.constant 0 : i32
    %c0_i32_1 = arith.constant 0 : i32
    return %c0_i32, %c0_i32_0 : i32, i32
  }
  func.func @transform_4(%arg0: i32) -> (i32, i32, i32) {
    %c0_i32 = arith.constant 0 : i32
    %c0_i32_0 = arith.constant 0 : i32
    %c0_i32_1 = arith.constant 0 : i32
    return %arg0, %c0_i32, %c0_i32_0 : i32, i32, i32
  }
}

module attributes {stable_mosaic.version = 11 : i64} {
  func.func @_conv_pool_kernel(%arg0: i32, %arg1: memref<1x4x400x4xf32, #tpu.memory_space<vmem>>, %arg2: memref<32x400xf32, #tpu.memory_space<vmem>>, %arg3: memref<32x1xf32, #tpu.memory_space<vmem>>, %arg4: memref<32x1xf32, #tpu.memory_space<vmem>>, %arg5: memref<1x32x4xf32, #tpu.memory_space<vmem>>) attributes {dimension_semantics = [#tpu.dimension_semantics<parallel>], iteration_bounds = array<i64: 2>, scalar_prefetch = 0 : i64, scratch_operands = 0 : i64, tpu.core_type = #tpu.core_type<tc>, window_params = [{transform_indices = @transform_0, window_bounds = array<i64: 1, 4, 400, 4>}, {pipeline_mode = #tpu.pipeline_mode<synchronous>, transform_indices = @transform_1, window_bounds = array<i64: 32, 400>}, {pipeline_mode = #tpu.pipeline_mode<synchronous>, transform_indices = @transform_2, window_bounds = array<i64: 32, 1>}, {pipeline_mode = #tpu.pipeline_mode<synchronous>, transform_indices = @transform_3, window_bounds = array<i64: 32, 1>}, {transform_indices = @transform_4, window_bounds = array<i64: 1, 32, 4>}]} {
    %c0 = arith.constant 0 : index
    %c0_0 = arith.constant 0 : index
    %0 = vector.load %arg2[%c0, %c0_0] : memref<32x400xf32, #tpu.memory_space<vmem>>, vector<32x400xf32>
    %c0_1 = arith.constant 0 : index
    %c0_2 = arith.constant 0 : index
    %1 = vector.load %arg3[%c0_1, %c0_2] : memref<32x1xf32, #tpu.memory_space<vmem>>, vector<32x1xf32>
    %c0_3 = arith.constant 0 : index
    %c0_4 = arith.constant 0 : index
    %2 = vector.load %arg4[%c0_3, %c0_4] : memref<32x1xf32, #tpu.memory_space<vmem>>, vector<32x1xf32>
    %c0_5 = arith.constant 0 : index
    %c0_6 = arith.constant 0 : index
    %c0_7 = arith.constant 0 : index
    %c0_8 = arith.constant 0 : index
    %3 = vector.load %arg1[%c0_5, %c0_6, %c0_7, %c0_8] : memref<1x4x400x4xf32, #tpu.memory_space<vmem>>, vector<1x1x400x4xf32>
    %4 = vector.shape_cast %3 : vector<1x1x400x4xf32> to vector<400x4xf32>
    %cst = arith.constant dense<0.000000e+00> : vector<32x4xf32>
    %5 = tpu.matmul %0, %4, %cst {dimension_numbers = #tpu.dot_dimension_numbers<[1], [0], [0], [1], [0, 0, 1, 1], [], []>} : vector<32x400xf32>, vector<400x4xf32>, vector<32x4xf32> -> vector<32x4xf32>
    %6 = vector.broadcast %1 : vector<32x1xf32> to vector<32x4xf32>
    %7 = arith.mulf %5, %6 : vector<32x4xf32>
    %8 = vector.broadcast %2 : vector<32x1xf32> to vector<32x4xf32>
    %9 = arith.addf %7, %8 : vector<32x4xf32>
    %cst_9 = arith.constant 0.000000e+00 : f32
    %10 = vector.broadcast %cst_9 : f32 to vector<32x4xf32>
    %11 = arith.maximumf %9, %10 : vector<32x4xf32>
    %c0_10 = arith.constant 0 : index
    %c1 = arith.constant 1 : index
    %c0_11 = arith.constant 0 : index
    %c0_12 = arith.constant 0 : index
    %12 = vector.load %arg1[%c0_10, %c1, %c0_11, %c0_12] : memref<1x4x400x4xf32, #tpu.memory_space<vmem>>, vector<1x1x400x4xf32>
    %13 = vector.shape_cast %12 : vector<1x1x400x4xf32> to vector<400x4xf32>
    %cst_13 = arith.constant dense<0.000000e+00> : vector<32x4xf32>
    %14 = tpu.matmul %0, %13, %cst_13 {dimension_numbers = #tpu.dot_dimension_numbers<[1], [0], [0], [1], [0, 0, 1, 1], [], []>} : vector<32x400xf32>, vector<400x4xf32>, vector<32x4xf32> -> vector<32x4xf32>
    %15 = vector.broadcast %1 : vector<32x1xf32> to vector<32x4xf32>
    %16 = arith.mulf %14, %15 : vector<32x4xf32>
    %17 = vector.broadcast %2 : vector<32x1xf32> to vector<32x4xf32>
    %18 = arith.addf %16, %17 : vector<32x4xf32>
    %cst_14 = arith.constant 0.000000e+00 : f32
    %19 = vector.broadcast %cst_14 : f32 to vector<32x4xf32>
    %20 = arith.maximumf %18, %19 : vector<32x4xf32>
    %21 = arith.maximumf %11, %20 : vector<32x4xf32>
    %c0_15 = arith.constant 0 : index
    %c2 = arith.constant 2 : index
    %c0_16 = arith.constant 0 : index
    %c0_17 = arith.constant 0 : index
    %22 = vector.load %arg1[%c0_15, %c2, %c0_16, %c0_17] : memref<1x4x400x4xf32, #tpu.memory_space<vmem>>, vector<1x1x400x4xf32>
    %23 = vector.shape_cast %22 : vector<1x1x400x4xf32> to vector<400x4xf32>
    %cst_18 = arith.constant dense<0.000000e+00> : vector<32x4xf32>
    %24 = tpu.matmul %0, %23, %cst_18 {dimension_numbers = #tpu.dot_dimension_numbers<[1], [0], [0], [1], [0, 0, 1, 1], [], []>} : vector<32x400xf32>, vector<400x4xf32>, vector<32x4xf32> -> vector<32x4xf32>
    %25 = vector.broadcast %1 : vector<32x1xf32> to vector<32x4xf32>
    %26 = arith.mulf %24, %25 : vector<32x4xf32>
    %27 = vector.broadcast %2 : vector<32x1xf32> to vector<32x4xf32>
    %28 = arith.addf %26, %27 : vector<32x4xf32>
    %cst_19 = arith.constant 0.000000e+00 : f32
    %29 = vector.broadcast %cst_19 : f32 to vector<32x4xf32>
    %30 = arith.maximumf %28, %29 : vector<32x4xf32>
    %c0_20 = arith.constant 0 : index
    %c3 = arith.constant 3 : index
    %c0_21 = arith.constant 0 : index
    %c0_22 = arith.constant 0 : index
    %31 = vector.load %arg1[%c0_20, %c3, %c0_21, %c0_22] : memref<1x4x400x4xf32, #tpu.memory_space<vmem>>, vector<1x1x400x4xf32>
    %32 = vector.shape_cast %31 : vector<1x1x400x4xf32> to vector<400x4xf32>
    %cst_23 = arith.constant dense<0.000000e+00> : vector<32x4xf32>
    %33 = tpu.matmul %0, %32, %cst_23 {dimension_numbers = #tpu.dot_dimension_numbers<[1], [0], [0], [1], [0, 0, 1, 1], [], []>} : vector<32x400xf32>, vector<400x4xf32>, vector<32x4xf32> -> vector<32x4xf32>
    %34 = vector.broadcast %1 : vector<32x1xf32> to vector<32x4xf32>
    %35 = arith.mulf %33, %34 : vector<32x4xf32>
    %36 = vector.broadcast %2 : vector<32x1xf32> to vector<32x4xf32>
    %37 = arith.addf %35, %36 : vector<32x4xf32>
    %cst_24 = arith.constant 0.000000e+00 : f32
    %38 = vector.broadcast %cst_24 : f32 to vector<32x4xf32>
    %39 = arith.maximumf %37, %38 : vector<32x4xf32>
    %40 = arith.maximumf %30, %39 : vector<32x4xf32>
    %41 = arith.maximumf %21, %40 : vector<32x4xf32>
    %c0_25 = arith.constant 0 : index
    %c0_26 = arith.constant 0 : index
    %c0_27 = arith.constant 0 : index
    %42 = vector.load %arg5[%c0_25, %c0_26, %c0_27] : memref<1x32x4xf32, #tpu.memory_space<vmem>>, vector<1x32x4xf32>
    %43 = vector.shape_cast %42 : vector<1x32x4xf32> to vector<32x4xf32>
    %44 = vector.shape_cast %41 : vector<32x4xf32> to vector<1x32x4xf32>
    tpu.vector_store %arg5[%c0_25, %c0_26, %c0_27], %44 {strides = array<i32>} : memref<1x32x4xf32, #tpu.memory_space<vmem>>, vector<1x32x4xf32>,
    return
  }
  func.func @transform_0(%arg0: i32) -> (i32, i32, i32, i32) {
    %c0_i32 = arith.constant 0 : i32
    %c0_i32_0 = arith.constant 0 : i32
    %c0_i32_1 = arith.constant 0 : i32
    %c0_i32_2 = arith.constant 0 : i32
    return %arg0, %c0_i32, %c0_i32_0, %c0_i32_1 : i32, i32, i32, i32
  }
  func.func @transform_1(%arg0: i32) -> (i32, i32) {
    %c0_i32 = arith.constant 0 : i32
    %c0_i32_0 = arith.constant 0 : i32
    %c0_i32_1 = arith.constant 0 : i32
    return %c0_i32, %c0_i32_0 : i32, i32
  }
  func.func @transform_2(%arg0: i32) -> (i32, i32) {
    %c0_i32 = arith.constant 0 : i32
    %c0_i32_0 = arith.constant 0 : i32
    %c0_i32_1 = arith.constant 0 : i32
    return %c0_i32, %c0_i32_0 : i32, i32
  }
  func.func @transform_3(%arg0: i32) -> (i32, i32) {
    %c0_i32 = arith.constant 0 : i32
    %c0_i32_0 = arith.constant 0 : i32
    %c0_i32_1 = arith.constant 0 : i32
    return %c0_i32, %c0_i32_0 : i32, i32
  }
  func.func @transform_4(%arg0: i32) -> (i32, i32, i32) {
    %c0_i32 = arith.constant 0 : i32
    %c0_i32_0 = arith.constant 0 : i32
    %c0_i32_1 = arith.constant 0 : i32
    return %arg0, %c0_i32, %c0_i32_0 : i32, i32, i32
  }
}

module attributes {stable_mosaic.version = 11 : i64} {
  func.func @_conv_cls_kernel(%arg0: i32, %arg1: memref<1x4x1x288xf32, #tpu.memory_space<vmem>>, %arg2: memref<288x32xf32, #tpu.memory_space<vmem>>, %arg3: memref<1x32xf32, #tpu.memory_space<vmem>>, %arg4: memref<1x32xf32, #tpu.memory_space<vmem>>, %arg5: memref<32x10xf32, #tpu.memory_space<vmem>>, %arg6: memref<1x10xf32, #tpu.memory_space<vmem>>, %arg7: memref<1x1x10xf32, #tpu.memory_space<vmem>>) attributes {dimension_semantics = [#tpu.dimension_semantics<parallel>], iteration_bounds = array<i64: 2>, scalar_prefetch = 0 : i64, scratch_operands = 0 : i64, tpu.core_type = #tpu.core_type<tc>, window_params = [{transform_indices = @transform_0, window_bounds = array<i64: 1, 4, 1, 288>}, {pipeline_mode = #tpu.pipeline_mode<synchronous>, transform_indices = @transform_1, window_bounds = array<i64: 288, 32>}, {pipeline_mode = #tpu.pipeline_mode<synchronous>, transform_indices = @transform_2, window_bounds = array<i64: 1, 32>}, {pipeline_mode = #tpu.pipeline_mode<synchronous>, transform_indices = @transform_3, window_bounds = array<i64: 1, 32>}, {pipeline_mode = #tpu.pipeline_mode<synchronous>, transform_indices = @transform_4, window_bounds = array<i64: 32, 10>}, {pipeline_mode = #tpu.pipeline_mode<synchronous>, transform_indices = @transform_5, window_bounds = array<i64: 1, 10>}, {transform_indices = @transform_6, window_bounds = array<i64: 1, 1, 10>}]} {
    %c0 = arith.constant 0 : index
    %c0_0 = arith.constant 0 : index
    %0 = vector.load %arg2[%c0, %c0_0] : memref<288x32xf32, #tpu.memory_space<vmem>>, vector<288x32xf32>
    %c0_1 = arith.constant 0 : index
    %c0_2 = arith.constant 0 : index
    %1 = vector.load %arg3[%c0_1, %c0_2] : memref<1x32xf32, #tpu.memory_space<vmem>>, vector<1x32xf32>
    %c0_3 = arith.constant 0 : index
    %c0_4 = arith.constant 0 : index
    %2 = vector.load %arg4[%c0_3, %c0_4] : memref<1x32xf32, #tpu.memory_space<vmem>>, vector<1x32xf32>
    %c0_5 = arith.constant 0 : index
    %c0_6 = arith.constant 0 : index
    %c0_7 = arith.constant 0 : index
    %c0_8 = arith.constant 0 : index
    %3 = vector.load %arg1[%c0_5, %c0_6, %c0_7, %c0_8] : memref<1x4x1x288xf32, #tpu.memory_space<vmem>>, vector<1x1x1x288xf32>
    %4 = vector.shape_cast %3 : vector<1x1x1x288xf32> to vector<1x288xf32>
    %cst = arith.constant dense<0.000000e+00> : vector<1x32xf32>
    %5 = tpu.matmul %4, %0, %cst {dimension_numbers = #tpu.dot_dimension_numbers<[1], [0], [0], [1], [0, 0, 1, 1], [], []>} : vector<1x288xf32>, vector<288x32xf32>, vector<1x32xf32> -> vector<1x32xf32>
    %6 = arith.mulf %5, %1 : vector<1x32xf32>
    %7 = arith.addf %6, %2 : vector<1x32xf32>
    %cst_9 = arith.constant 0.000000e+00 : f32
    %8 = vector.broadcast %cst_9 : f32 to vector<1x32xf32>
    %9 = arith.maximumf %7, %8 : vector<1x32xf32>
    %c0_10 = arith.constant 0 : index
    %c1 = arith.constant 1 : index
    %c0_11 = arith.constant 0 : index
    %c0_12 = arith.constant 0 : index
    %10 = vector.load %arg1[%c0_10, %c1, %c0_11, %c0_12] : memref<1x4x1x288xf32, #tpu.memory_space<vmem>>, vector<1x1x1x288xf32>
    %11 = vector.shape_cast %10 : vector<1x1x1x288xf32> to vector<1x288xf32>
    %cst_13 = arith.constant dense<0.000000e+00> : vector<1x32xf32>
    %12 = tpu.matmul %11, %0, %cst_13 {dimension_numbers = #tpu.dot_dimension_numbers<[1], [0], [0], [1], [0, 0, 1, 1], [], []>} : vector<1x288xf32>, vector<288x32xf32>, vector<1x32xf32> -> vector<1x32xf32>
    %13 = arith.mulf %12, %1 : vector<1x32xf32>
    %14 = arith.addf %13, %2 : vector<1x32xf32>
    %cst_14 = arith.constant 0.000000e+00 : f32
    %15 = vector.broadcast %cst_14 : f32 to vector<1x32xf32>
    %16 = arith.maximumf %14, %15 : vector<1x32xf32>
    %17 = arith.maximumf %9, %16 : vector<1x32xf32>
    %c0_15 = arith.constant 0 : index
    %c2 = arith.constant 2 : index
    %c0_16 = arith.constant 0 : index
    %c0_17 = arith.constant 0 : index
    %18 = vector.load %arg1[%c0_15, %c2, %c0_16, %c0_17] : memref<1x4x1x288xf32, #tpu.memory_space<vmem>>, vector<1x1x1x288xf32>
    %19 = vector.shape_cast %18 : vector<1x1x1x288xf32> to vector<1x288xf32>
    %cst_18 = arith.constant dense<0.000000e+00> : vector<1x32xf32>
    %20 = tpu.matmul %19, %0, %cst_18 {dimension_numbers = #tpu.dot_dimension_numbers<[1], [0], [0], [1], [0, 0, 1, 1], [], []>} : vector<1x288xf32>, vector<288x32xf32>, vector<1x32xf32> -> vector<1x32xf32>
    %21 = arith.mulf %20, %1 : vector<1x32xf32>
    %22 = arith.addf %21, %2 : vector<1x32xf32>
    %cst_19 = arith.constant 0.000000e+00 : f32
    %23 = vector.broadcast %cst_19 : f32 to vector<1x32xf32>
    %24 = arith.maximumf %22, %23 : vector<1x32xf32>
    %c0_20 = arith.constant 0 : index
    %c3 = arith.constant 3 : index
    %c0_21 = arith.constant 0 : index
    %c0_22 = arith.constant 0 : index
    %25 = vector.load %arg1[%c0_20, %c3, %c0_21, %c0_22] : memref<1x4x1x288xf32, #tpu.memory_space<vmem>>, vector<1x1x1x288xf32>
    %26 = vector.shape_cast %25 : vector<1x1x1x288xf32> to vector<1x288xf32>
    %cst_23 = arith.constant dense<0.000000e+00> : vector<1x32xf32>
    %27 = tpu.matmul %26, %0, %cst_23 {dimension_numbers = #tpu.dot_dimension_numbers<[1], [0], [0], [1], [0, 0, 1, 1], [], []>} : vector<1x288xf32>, vector<288x32xf32>, vector<1x32xf32> -> vector<1x32xf32>
    %28 = arith.mulf %27, %1 : vector<1x32xf32>
    %29 = arith.addf %28, %2 : vector<1x32xf32>
    %cst_24 = arith.constant 0.000000e+00 : f32
    %30 = vector.broadcast %cst_24 : f32 to vector<1x32xf32>
    %31 = arith.maximumf %29, %30 : vector<1x32xf32>
    %32 = arith.maximumf %24, %31 : vector<1x32xf32>
    %33 = arith.maximumf %17, %32 : vector<1x32xf32>
    %c0_25 = arith.constant 0 : index
    %c0_26 = arith.constant 0 : index
    %34 = vector.load %arg5[%c0_25, %c0_26] : memref<32x10xf32, #tpu.memory_space<vmem>>, vector<32x10xf32>
    %cst_27 = arith.constant dense<0.000000e+00> : vector<1x10xf32>
    %35 = tpu.matmul %33, %34, %cst_27 {dimension_numbers = #tpu.dot_dimension_numbers<[1], [0], [0], [1], [0, 0, 1, 1], [], []>} : vector<1x32xf32>, vector<32x10xf32>, vector<1x10xf32> -> vector<1x10xf32>
    %c0_28 = arith.constant 0 : index
    %c0_29 = arith.constant 0 : index
    %36 = vector.load %arg6[%c0_28, %c0_29] : memref<1x10xf32, #tpu.memory_space<vmem>>, vector<1x10xf32>
    %37 = arith.addf %35, %36 : vector<1x10xf32>
    %c0_30 = arith.constant 0 : index
    %c0_31 = arith.constant 0 : index
    %c0_32 = arith.constant 0 : index
    %38 = vector.load %arg7[%c0_30, %c0_31, %c0_32] : memref<1x1x10xf32, #tpu.memory_space<vmem>>, vector<1x1x10xf32>
    %39 = vector.shape_cast %38 : vector<1x1x10xf32> to vector<1x10xf32>
    %40 = vector.shape_cast %37 : vector<1x10xf32> to vector<1x1x10xf32>
    tpu.vector_store %arg7[%c0_30, %c0_31, %c0_32], %40 {strides = array<i32>} : memref<1x1x10xf32, #tpu.memory_space<vmem>>, vector<1x1x10xf32>,
    return
  }
  func.func @transform_0(%arg0: i32) -> (i32, i32, i32, i32) {
    %c0_i32 = arith.constant 0 : i32
    %c0_i32_0 = arith.constant 0 : i32
    %c0_i32_1 = arith.constant 0 : i32
    %c0_i32_2 = arith.constant 0 : i32
    return %arg0, %c0_i32, %c0_i32_0, %c0_i32_1 : i32, i32, i32, i32
  }
  func.func @transform_1(%arg0: i32) -> (i32, i32) {
    %c0_i32 = arith.constant 0 : i32
    %c0_i32_0 = arith.constant 0 : i32
    %c0_i32_1 = arith.constant 0 : i32
    return %c0_i32, %c0_i32_0 : i32, i32
  }
  func.func @transform_2(%arg0: i32) -> (i32, i32) {
    %c0_i32 = arith.constant 0 : i32
    %c0_i32_0 = arith.constant 0 : i32
    %c0_i32_1 = arith.constant 0 : i32
    return %c0_i32, %c0_i32_0 : i32, i32
  }
  func.func @transform_3(%arg0: i32) -> (i32, i32) {
    %c0_i32 = arith.constant 0 : i32
    %c0_i32_0 = arith.constant 0 : i32
    %c0_i32_1 = arith.constant 0 : i32
    return %c0_i32, %c0_i32_0 : i32, i32
  }
  func.func @transform_4(%arg0: i32) -> (i32, i32) {
    %c0_i32 = arith.constant 0 : i32
    %c0_i32_0 = arith.constant 0 : i32
    %c0_i32_1 = arith.constant 0 : i32
    return %c0_i32, %c0_i32_0 : i32, i32
  }
  func.func @transform_5(%arg0: i32) -> (i32, i32) {
    %c0_i32 = arith.constant 0 : i32
    %c0_i32_0 = arith.constant 0 : i32
    %c0_i32_1 = arith.constant 0 : i32
    return %c0_i32, %c0_i32_0 : i32, i32
  }
  func.func @transform_6(%arg0: i32) -> (i32, i32, i32) {
    %c0_i32 = arith.constant 0 : i32
    %c0_i32_0 = arith.constant 0 : i32
    %c0_i32_1 = arith.constant 0 : i32
    return %arg0, %c0_i32, %c0_i32_0 : i32, i32, i32
  }
}

</mosaic_0001>

<bundles_post_ra>
// kernel: reverse
= control target key start
LH: loop header
LB: loop body
LE: loop exit
PB: predicated region body
PF: predicated region fallthrough
CT: control target
= control target key end

     0   :  { %v2_v0 = vlaneseq  ;;  %s318_s0 = inlined_call_operand.vmem [shape: f32[2,256], index: 0, kind: input, shape index: {}]   ;;  %s319_s1 = inlined_call_operand.vmem [shape: f32[2,256], index: 1, kind: output, shape index: {}]  }
   0x2   :  { %v3_v1 = vsub.s32 127, %v2_v0 }
   0x4   :  { %4 = vset.pattern.permute.xlu0 %v3_v1 }
   0x5   :  { %s278_s6 = smov 0   ;;  %s280_s7 = smov 0  }
   0x6   :  { %s282_s8 = smov 0  }
   0x7 LB: > { %s208_s9 = sadd.s32 4294967295, %s266_s8   ;;  %s19_s10 = sadd.s32 1, %s262_s7  ;;  %s266_s8 = sphi %s282_s8, %s10_s8   ;;  %s262_s7 = sphi %s280_s7, %s321_s7   ;;  %s258_s6 = sphi %s278_s6, %s320_s6  }
   0x8   : > { %p20_p0 = scmp.ge.s32.totalorder %s19_s10, 2  ;;  %p210_p1 = scmp.ge.s32.totalorder %s266_s8, 2 }
   0x9   : > { %s38_s11 = sand.u32 (!%p210_p1), 1, %s266_s8   ;;  %s41_s12 = ssub.s32 (!%p210_p1), 1, %s262_s7 }
   0xa   : > { %s323_s10 = smov (%p20_p0, %s19_s10), 0  ;;  %36 = sbr.rel (%p210_p1) target bundleno = 17 (0x11), region = 16 }
   0xb   : > { %s211_s13 = sshll.u32 (!%p210_p1), %s38_s11, 1  ;;  %s212_s14 = sshll.u32 (!%p210_p1), %s41_s12, 1 }
   0xc   : > { %s45_s17 = scalar_lea.vmem (!%p210_p1), %s318_s0, %s212_s14  ;;  %s40_s18 = scalar_lea.vmem (!%p210_p1), [#allocation1], %s211_s13 }
   0xf   : > { %v62_v2 = vld [vmem:[%s45_s17] sm:$0x3] }
  0x10   : > { %63 = vst [vmem:[%s40_s18] sm:$0x3] %v62_v2 }
  0x11 PF: > { %p213_p2 = scmp.ge.s32.totalorder %s266_s8, 1  ;;  %p80_p3 = scmp.lt.s32.totalorder %s266_s8, 3 }
  0x13   : > { %p81_p4 = pnand %p213_p2, %p80_p3 }
  0x14   : > { %s91_s19 = sand.u32 (!%p81_p4), 1, %s208_s9   ;;  %s217_s23 = sshll.u32 (!%p81_p4), %s258_s6, 1 }
  0x15   : > { %84 = sbr.rel (%p81_p4) target bundleno = 176 (0xb0), region = 50  ;;  %s214_s20 = sshll.u32 (!%p81_p4), %s91_s19, 1 }
  0x16   : > { %s93_s21 = scalar_lea.vmem (!%p81_p4), [#allocation1], %s214_s20  ;;  %s97_s22 = scalar_lea.vmem (!%p81_p4), [#allocation3], %s214_s20 }
  0x17   : > { %s123_s26 = scalar_lea.vmem (!%p81_p4), %s319_s1, %s217_s23 }
  0x1a   : > { %v101_v3 = vld [vmem:[%s93_s21] sm:$0x3] }
  0x1b   : > { %102 = vst [vmem:[#allocation0] sm:$0x3] %v101_v3 }
  0x22   : > { %v104_v4 = vld [vmem:[#allocation0] sm:$0xff] }
  0x23   : > { %105 = vperm.xlu0 %4, %v104_v4  }
  0x9e   : > { %v106_v5 = vpop.permute.xlu0 %105 }
  0x9f   : > { %107 = vst [vmem:[#allocation2] sm:$0xff] %v106_v5 }
  0xa6   : > { %v112_v6 = vld [vmem:[#allocation2] sm:$0x3] }
  0xa7   : > { %115 = vst [vmem:[%s97_s22] sm:$0x3] %v112_v6 }
  0xae   : > { %v140_v7 = vld [vmem:[%s97_s22] sm:$0x3] }
  0xaf   : > { %141 = vst [vmem:[%s123_s26] sm:$0x3] %v140_v7 }
  0xb0 PF: > { %s10_s8 = sadd.s32 1, %s266_s8   ;;  %s320_s6 = smov %s262_s7 }
  0xb1   : > { %p7_p5 = scmp.ge.s32.totalorder %s10_s8, 4   ;;  %s321_s7 = smov %s323_s10 }
  0xb3   :  { %9 = sbr.rel (!%p7_p5) target bundleno = 7 (0x7), region = 110 }

// kernel: cnn_mfcc_forward.4
= control target key start
LH: loop header
LB: loop body
LE: loop exit
PB: predicated region body
PF: predicated region fallthrough
CT: control target
= control target key end

     0   :  { %10 = vsyncpa [#allocation3], 0  ;;  %s1923_s0 = inlined_call_operand.vmem [shape: f32[2,41,200], index: 0, kind: input, shape index: {}]   ;;  %s1924_s1 = inlined_call_operand.vmem [shape: f32[2,41,200], index: 1, kind: input, shape index: {}]   ;;  %s1925_s2 = inlined_call_operand.hbm [shape: f32[400,512], index: 2, kind: input, shape index: {}]   ;;  %s1926_s3 = inlined_call_operand.hbm [shape: f32[256,128], index: 3, kind: input, shape index: {}]   ;;  %s1927_s4 = inlined_call_operand.hbm [shape: f32[128,128], index: 4, kind: input, shape index: {}]   ;;  %s1928_s5 = inlined_call_operand.vmem [shape: f32[2,41,128], index: 5, kind: output, shape index: {}]  }
   0x1   :  { %11 = vsyncpa [#allocation5], 0  ;;  %s1730_s18 = smov 0  }
   0x2 LB: > { %s1693_s19 = smov [#allocation4]   ;;  %s1736_s21 = sadd.s32 4294967295, %s1691_s18   ;;  %s1691_s18 = sphi %s1730_s18, %s17_s18  }
   0x3   : > { %s188_s20 = sshll.u32 %s1693_s19, 4  ;;  %p1388_p0 = scmp.ge.s32.totalorder %s1691_s18, 1  ;;  %s189_s20 = int_to_ptr.vmem [resolvable:$true] %s188_s20 }
   0x4   : > { %p163_p1 = scmp.lt.s32.totalorder %s1691_s18, 3  ;;  %p1566_p2 = scmp.eq.s32.totalorder %s1736_s21, 0 }
   0x5   : > { %s1694_s23 = smov [#allocation2]   ;;  %s1695_s26 = smov [#allocation6]  }
   0x6   : > { %p1741_p3 = pnand %p1388_p0, %p163_p1  ;;  %s175_s24 = sshll.u32 %s1694_s23, 4  ;;  %s1747_s24 = int_to_ptr.vmem [resolvable:$true] %s175_s24 }
   0x7   : > { %s1755_s27 = sshll.u32 %s1695_s26, 4  ;;  %s1610_s28 = scalar_lea.vmem %s189_s20, 4096  ;;  %s202_s27 = int_to_ptr.vmem [resolvable:$true] %s1755_s27 }
   0x8   : > { %p1556_p4 = pneg %p1741_p3  ;;  %p1611_p7 = scmp.ne.s32.totalorder %s189_s20, %s1610_s28 }
   0x9   : > { %p1618_p10 = scmp.lt.s32.totalorder %s189_s20, %s189_s20  ;;  %p1619_p11 = scmp.lt.s32.totalorder %s1610_s28, %s1610_s28 }
   0xa   : > { %p1751_p5 = pnand %p1566_p2, %p1556_p4 }
   0xb   : > { %p1620_p12 = por %p1619_p11, %p1618_p10 }
   0xc   : > { %p1601_p6 = pneg %p1751_p5 }
   0xe   : > { %p1613_p8 = pnand %p1611_p7, %p1601_p6 }
  0x10   : > { %p1614_p9 = pneg %p1613_p8 }
  0x12   : > { %p1621_p13 = pnand %p1620_p12, %p1614_p9 }
  0x14   : > { %1624 = shalt.err (!%p1621_p13)
}
  0x15   : > { %s1696_s29 = smov 128   ;;  %s1697_s30 = smov 8  }
  0x16   : > { %1562 = dma.hbm_to_vmem [thread:$0]  (!%p1751_p5), %s1926_s3, 4096, %s189_s20, [#allocation5], %s1696_s29, %s1696_s29, %s1697_s30  }
  0x17   : > { %s1636_s8 = scalar_lea.vmem %s1747_s24, 25600  ;;  %p1644_p7 = scmp.lt.s32.totalorder %s1747_s24, %s1747_s24 }
  0x18   : > { %p1637_p0 = scmp.ne.s32.totalorder %s1747_s24, %s1636_s8  ;;  %p1645_p8 = scmp.lt.s32.totalorder %s1636_s8, %s1636_s8 }
  0x1a   : > { %p1639_p1 = pnand %p1637_p0, %p1601_p6  ;;  %p1646_p9 = por %p1645_p8, %p1644_p7 }
  0x1c   : > { %p1640_p4 = pneg %p1639_p1 }
  0x1e   : > { %p1647_p10 = pnand %p1646_p9, %p1640_p4 }
  0x20   : > { %1650 = shalt.err (!%p1647_p10)
}
  0x21   : > { %s1698_s9 = smov 512   ;;  %s1699_s10 = smov 32  }
  0x22   : > { %1559 = dma.hbm_to_vmem [thread:$0]  (!%p1751_p5), %s1925_s2, 25600, %s1747_s24, [#allocation3], %s1698_s9, %s1698_s9, %s1699_s10  }
  0x23   : > { %s1662_s13 = scalar_lea.vmem %s202_s27, 2048  ;;  %p1670_p0 = scmp.lt.s32.totalorder %s202_s27, %s202_s27 }
  0x24   : > { %p1663_p11 = scmp.ne.s32.totalorder %s202_s27, %s1662_s13  ;;  %p1671_p1 = scmp.lt.s32.totalorder %s1662_s13, %s1662_s13 }
  0x26   : > { %p1665_p12 = pnand %p1663_p11, %p1601_p6  ;;  %p1672_p4 = por %p1671_p1, %p1670_p0 }
  0x28   : > { %p1666_p13 = pneg %p1665_p12 }
  0x2a   : > { %p1673_p7 = pnand %p1672_p4, %p1666_p13 }
  0x2c   : > { %1676 = shalt.err (!%p1673_p7)
}
  0x2d   : > { %1565 = dma.hbm_to_vmem [thread:$0]  (!%p1751_p5), %s1927_s4, 2048, %s202_s27, [#allocation5], %s1696_s29, %s1696_s29, %s1697_s30  }
  0x2e   : > { %233 = sbr.rel (%p1741_p3) target bundleno = 1026 (0x402), region = 40 }
  0x33   : > { %1682 = dma.done.wait (%p1566_p2), [#allocation3], 25600  }
  0x34   : > { %1684 = vsyncadd (%p1566_p2), [#allocation3], 4294941696 }
  0x35   : > { %1686 = dma.done.wait (%p1566_p2), [#allocation5], 6144  }
  0x36   : > { %1688 = vsyncadd (%p1566_p2), [#allocation5], 4294961152  ;;  %v474_v0 = vld [vmem:[#allocation2 + $0x508] sm:$0xff]  ;;  %v476_v1 = vld [vmem:[#allocation2 + $0x518] sm:$0xff]  ;;  %p274_p2 = scmp.lt.s32.totalorder %s1736_s21, 1  ;;  %vm513_vm0 = vcmask 588800  }
  0x37   : > { %v473_v2 = vld [vmem:[#allocation2 + $0x500] sm:$0xff]  ;;  %532 = vmatprep.subr.mxu0 %v474_v0  ;;  %633 = vmatprep.subr.mxu1 %v476_v1  ;;  %v475_v3 = vld [vmem:[#allocation2 + $0x510] sm:$0xff]  ;;  %v470_v4 = vld [vmem:[#allocation2 + $0x4e8] sm:$0xff]  ;;  %vm1148_vm1 = vcmask 1040384  }
  0x38   : > { %v472_v5 = vld [vmem:[#allocation2 + $0x4f8] sm:$0xff]  ;;  %533 = vmatpush1.msra.mxu0 %v473_v2  ;;  %634 = vmatpush1.msra.mxu1 %v475_v3  ;;  %v469_v6 = vld [vmem:[#allocation2 + $0x4e0] sm:$0xff]  ;;  %v471_v7 = vld [vmem:[#allocation2 + $0x4f0] sm:$0xff]  ;;  %s1932_s21 = smov (!%p274_p2, %s1736_s21), 1 }
  0x39   : > { %v466_v8 = vld [vmem:[#allocation2 + $0x4c8] sm:$0xff]  ;;  %534 = vmatprep.subr.mxu0 %v470_v4  ;;  %635 = vmatprep.subr.mxu1 %v472_v5  ;;  %v468_v9 = vld [vmem:[#allocation2 + $0x4d8] sm:$0xff]  ;;  %v465_v10 = vld [vmem:[#allocation2 + $0x4c0] sm:$0xff]  ;;  %s1540_s16 = smul.u32 96, %s1932_s21 }
  0x3a   : > { %v467_v11 = vld [vmem:[#allocation2 + $0x4d0] sm:$0xff]  ;;  %535 = vmatpush1.msra.mxu0 %v469_v6  ;;  %636 = vmatpush1.msra.mxu1 %v471_v7  ;;  %v462_v12 = vld [vmem:[#allocation2 + $0x4a8] sm:$0xff]  ;;  %v464_v13 = vld [vmem:[#allocation2 + $0x4b8] sm:$0xff]  ;;  %s1541_s27 = smul.u32 48, %s1932_s21 }
  0x3b   : > { %536 = vmatprep.subr.mxu0 %v466_v8  ;;  %637 = vmatprep.subr.mxu1 %v468_v9  ;;  %v461_v14 = vld [vmem:[#allocation2 + $0x4a0] sm:$0xff]  ;;  %v463_v15 = vld [vmem:[#allocation2 + $0x4b0] sm:$0xff]  ;;  %v458_v16 = vld [vmem:[#allocation2 + $0x488] sm:$0xff]  ;;  %s1811_s20 = scalar_lea.vmem %s1924_s1, %s1540_s16  ;;  %s1842_s24 = scalar_lea.vmem %s1923_s0, %s1540_s16 }
  0x3c   : > { %537 = vmatpush1.msra.mxu0 %v465_v10  ;;  %638 = vmatpush1.msra.mxu1 %v467_v11  ;;  %v460_v17 = vld [vmem:[#allocation2 + $0x498] sm:$0xff]  ;;  %v457_v18 = vld [vmem:[#allocation2 + $0x480] sm:$0xff]  ;;  %v459_v19 = vld [vmem:[#allocation2 + $0x490] sm:$0xff]  ;;  %s288_s30 = scalar_lea.vmem %s1928_s5, %s1541_s27 }
  0x3d   : > { %538 = vmatprep.subr.mxu0 %v462_v12  ;;  %639 = vmatprep.subr.mxu1 %v464_v13  ;;  %v454_v20 = vld [vmem:[#allocation2 + $0x468] sm:$0xff]  ;;  %v456_v21 = vld [vmem:[#allocation2 + $0x478] sm:$0xff]  ;;  %v453_v22 = vld [vmem:[#allocation2 + $0x460] sm:$0xff] }
  0x3e   : > { %539 = vmatpush1.msra.mxu0 %v461_v14  ;;  %640 = vmatpush1.msra.mxu1 %v463_v15  ;;  %v455_v23 = vld [vmem:[#allocation2 + $0x470] sm:$0xff]  ;;  %v450_v24 = vld [vmem:[#allocation2 + $0x448] sm:$0xff]  ;;  %v452_v25 = vld [vmem:[#allocation2 + $0x458] sm:$0xff] }
  0x3f   : > { %540 = vmatprep.subr.mxu0 %v458_v16  ;;  %641 = vmatprep.subr.mxu1 %v460_v17  ;;  %v449_v26 = vld [vmem:[#allocation2 + $0x440] sm:$0xff]  ;;  %v451_v27 = vld [vmem:[#allocation2 + $0x450] sm:$0xff]  ;;  %v446_v28 = vld [vmem:[#allocation2 + $0x428] sm:$0xff] }
  0x40   : > { %541 = vmatpush1.msra.mxu0 %v457_v18  ;;  %642 = vmatpush1.msra.mxu1 %v459_v19  ;;  %v448_v29 = vld [vmem:[#allocation2 + $0x438] sm:$0xff]  ;;  %v445_v30 = vld [vmem:[#allocation2 + $0x420] sm:$0xff]  ;;  %v447_v31 = vld [vmem:[#allocation2 + $0x430] sm:$0xff] }
  0x41   : > { %542 = vmatprep.subr.mxu0 %v454_v20  ;;  %643 = vmatprep.subr.mxu1 %v456_v21  ;;  %v442_v32 = vld [vmem:[#allocation2 + $0x408] sm:$0xff]  ;;  %v444_v33 = vld [vmem:[#allocation2 + $0x418] sm:$0xff]  ;;  %v441_v34 = vld [vmem:[#allocation2 + $0x400] sm:$0xff] }
  0x42   : > { %543 = vmatpush1.msra.mxu0 %v453_v22  ;;  %644 = vmatpush1.msra.mxu1 %v455_v23  ;;  %v443_v35 = vld [vmem:[#allocation2 + $0x410] sm:$0xff]  ;;  %v438_v36 = vld [vmem:[#allocation2 + $0x3e8] sm:$0xff]  ;;  %v440_v37 = vld [vmem:[#allocation2 + $0x3f8] sm:$0xff] }
  0x43   : > { %544 = vmatprep.subr.mxu0 %v450_v24  ;;  %645 = vmatprep.subr.mxu1 %v452_v25  ;;  %v437_v38 = vld [vmem:[#allocation2 + $0x3e0] sm:$0xff]  ;;  %v439_v39 = vld [vmem:[#allocation2 + $0x3f0] sm:$0xff]  ;;  %v434_v40 = vld [vmem:[#allocation2 + $0x3c8] sm:$0xff] }
  0x44   : > { %545 = vmatpush1.msra.mxu0 %v449_v26  ;;  %646 = vmatpush1.msra.mxu1 %v451_v27  ;;  %v436_v41 = vld [vmem:[#allocation2 + $0x3d8] sm:$0xff]  ;;  %v433_v42 = vld [vmem:[#allocation2 + $0x3c0] sm:$0xff]  ;;  %v435_v43 = vld [vmem:[#allocation2 + $0x3d0] sm:$0xff] }
  0x45   : > { %546 = vmatprep.subr.mxu0 %v446_v28  ;;  %647 = vmatprep.subr.mxu1 %v448_v29  ;;  %v430_v44 = vld [vmem:[#allocation2 + $0x3a8] sm:$0xff]  ;;  %v432_v45 = vld [vmem:[#allocation2 + $0x3b8] sm:$0xff]  ;;  %v429_v46 = vld [vmem:[#allocation2 + $0x3a0] sm:$0xff] }
  0x46   : > { %547 = vmatpush1.msra.mxu0 %v445_v30  ;;  %648 = vmatpush1.msra.mxu1 %v447_v31  ;;  %v431_v47 = vld [vmem:[#allocation2 + $0x3b0] sm:$0xff]  ;;  %v426_v48 = vld [vmem:[#allocation2 + $0x388] sm:$0xff]  ;;  %v428_v49 = vld [vmem:[#allocation2 + $0x398] sm:$0xff] }
  0x47   : > { %548 = vmatprep.subr.mxu0 %v442_v32  ;;  %649 = vmatprep.subr.mxu1 %v444_v33  ;;  %v425_v50 = vld [vmem:[#allocation2 + $0x380] sm:$0xff]  ;;  %v427_v51 = vld [vmem:[#allocation2 + $0x390] sm:$0xff]  ;;  %v422_v52 = vld [vmem:[#allocation2 + $0x368] sm:$0xff] }
  0x48   : > { %549 = vmatpush1.msra.mxu0 %v441_v34  ;;  %650 = vmatpush1.msra.mxu1 %v443_v35  ;;  %v424_v53 = vld [vmem:[#allocation2 + $0x378] sm:$0xff]  ;;  %v421_v54 = vld [vmem:[#allocation2 + $0x360] sm:$0xff]  ;;  %v423_v55 = vld [vmem:[#allocation2 + $0x370] sm:$0xff] }
  0x49   : > { %550 = vmatprep.subr.mxu0 %v438_v36  ;;  %651 = vmatprep.subr.mxu1 %v440_v37  ;;  %v418_v56 = vld [vmem:[#allocation2 + $0x348] sm:$0xff]  ;;  %v420_v57 = vld [vmem:[#allocation2 + $0x358] sm:$0xff]  ;;  %v417_v58 = vld [vmem:[#allocation2 + $0x340] sm:$0xff] }
  0x4a   : > { %551 = vmatpush1.msra.mxu0 %v437_v38  ;;  %652 = vmatpush1.msra.mxu1 %v439_v39  ;;  %v419_v59 = vld [vmem:[#allocation2 + $0x350] sm:$0xff]  ;;  %v414_v60 = vld [vmem:[#allocation2 + $0x328] sm:$0xff]  ;;  %v416_v61 = vld [vmem:[#allocation2 + $0x338] sm:$0xff] }
  0x4b   : > { %552 = vmatprep.subr.mxu0 %v434_v40  ;;  %653 = vmatprep.subr.mxu1 %v436_v41  ;;  %v413_v62 = vld [vmem:[#allocation2 + $0x320] sm:$0xff]  ;;  %v415_v63 = vld [vmem:[#allocation2 + $0x330] sm:$0xff]  ;;  %v510_v0 = vld [vmem:[#allocation2 + $0x628] sm:$0xff] }
  0x4c   : > { %553 = vmatpush1.msra.mxu0 %v433_v42  ;;  %654 = vmatpush1.msra.mxu1 %v435_v43  ;;  %v512_v1 = vld [vmem:[#allocation2 + $0x638] sm:$0xff]  ;;  %v509_v2 = vld [vmem:[#allocation2 + $0x620] sm:$0xff]  ;;  %v511_v3 = vld [vmem:[#allocation2 + $0x630] sm:$0xff] }
  0x4d   : > { %554 = vmatprep.subr.mxu0 %v430_v44  ;;  %655 = vmatprep.subr.mxu1 %v432_v45  ;;  %v506_v4 = vld [vmem:[#allocation2 + $0x608] sm:$0xff]  ;;  %v508_v5 = vld [vmem:[#allocation2 + $0x618] sm:$0xff]  ;;  %v505_v6 = vld [vmem:[#allocation2 + $0x600] sm:$0xff] }
  0x4e   : > { %555 = vmatpush1.msra.mxu0 %v429_v46  ;;  %656 = vmatpush1.msra.mxu1 %v431_v47  ;;  %v507_v7 = vld [vmem:[#allocation2 + $0x610] sm:$0xff]  ;;  %v502_v8 = vld [vmem:[#allocation2 + $0x5e8] sm:$0xff]  ;;  %v504_v9 = vld [vmem:[#allocation2 + $0x5f8] sm:$0xff] }
  0x4f   : > { %556 = vmatprep.subr.mxu0 %v426_v48  ;;  %657 = vmatprep.subr.mxu1 %v428_v49  ;;  %v501_v10 = vld [vmem:[#allocation2 + $0x5e0] sm:$0xff]  ;;  %v503_v11 = vld [vmem:[#allocation2 + $0x5f0] sm:$0xff]  ;;  %v498_v12 = vld [vmem:[#allocation2 + $0x5c8] sm:$0xff] }
  0x50   : > { %557 = vmatpush1.msra.mxu0 %v425_v50  ;;  %658 = vmatpush1.msra.mxu1 %v427_v51  ;;  %v500_v13 = vld [vmem:[#allocation2 + $0x5d8] sm:$0xff]  ;;  %v497_v14 = vld [vmem:[#allocation2 + $0x5c0] sm:$0xff]  ;;  %v499_v15 = vld [vmem:[#allocation2 + $0x5d0] sm:$0xff] }
  0x51   : > { %558 = vmatprep.subr.mxu0 %v422_v52  ;;  %659 = vmatprep.subr.mxu1 %v424_v53  ;;  %v494_v16 = vld [vmem:[#allocation2 + $0x5a8] sm:$0xff]  ;;  %v496_v17 = vld [vmem:[#allocation2 + $0x5b8] sm:$0xff]  ;;  %v493_v18 = vld [vmem:[#allocation2 + $0x5a0] sm:$0xff] }
  0x52   : > { %559 = vmatpush1.msra.mxu0 %v421_v54  ;;  %660 = vmatpush1.msra.mxu1 %v423_v55  ;;  %v495_v19 = vld [vmem:[#allocation2 + $0x5b0] sm:$0xff]  ;;  %v490_v20 = vld [vmem:[#allocation2 + $0x588] sm:$0xff]  ;;  %v492_v21 = vld [vmem:[#allocation2 + $0x598] sm:$0xff] }
  0x53   : > { %560 = vmatprep.subr.mxu0 %v418_v56  ;;  %661 = vmatprep.subr.mxu1 %v420_v57  ;;  %v489_v22 = vld [vmem:[#allocation2 + $0x580] sm:$0xff]  ;;  %v491_v23 = vld [vmem:[#allocation2 + $0x590] sm:$0xff]  ;;  %v486_v24 = vld [vmem:[#allocation2 + $0x568] sm:$0xff] }
  0x54   : > { %561 = vmatpush1.msra.mxu0 %v417_v58  ;;  %662 = vmatpush1.msra.mxu1 %v419_v59  ;;  %v488_v25 = vld [vmem:[#allocation2 + $0x578] sm:$0xff]  ;;  %v485_v26 = vld [vmem:[#allocation2 + $0x560] sm:$0xff]  ;;  %v487_v27 = vld [vmem:[#allocation2 + $0x570] sm:$0xff] }
  0x55   : > { %562 = vmatprep.subr.mxu0 %v414_v60  ;;  %663 = vmatprep.subr.mxu1 %v416_v61  ;;  %v482_v28 = vld [vmem:[#allocation2 + $0x548] sm:$0xff]  ;;  %v484_v29 = vld [vmem:[#allocation2 + $0x558] sm:$0xff]  ;;  %v481_v30 = vld [vmem:[#allocation2 + $0x540] sm:$0xff] }
  0x56   : > { %563 = vmatpush1.msra.mxu0 %v413_v62  ;;  %664 = vmatpush1.msra.mxu1 %v415_v63  ;;  %v483_v31 = vld [vmem:[#allocation2 + $0x550] sm:$0xff]  ;;  %v478_v32 = vld [vmem:[#allocation2 + $0x528] sm:$0xff]  ;;  %v480_v33 = vld [vmem:[#allocation2 + $0x538] sm:$0xff] }
  0x57   : > { %578 = vmatprep.subr.mxu0 %v510_v0  ;;  %679 = vmatprep.subr.mxu1 %v512_v1  ;;  %v477_v34 = vld [vmem:[#allocation2 + $0x520] sm:$0xff]  ;;  %v302_v35 = vld [vmem:[%s1811_s20 + $0x8] sm:$0xff]  ;;  %v479_v36 = vld [vmem:[#allocation2 + $0x530] sm:$0xff] }
  0x58   : > { %579 = vmatpush2.msra.mxu0 %v509_v2  ;;  %680 = vmatpush2.msra.mxu1 %v511_v3  ;;  %v301_v37 = vld [vmem:[%s1811_s20] sm:$0xff]  ;;  %v374_v38 = vld [vmem:[#allocation2 + $0x1e8] sm:$0xff]  ;;  %v376_v39 = vld [vmem:[#allocation2 + $0x1f8] sm:$0xff] }
  0x59   : > { %580 = vmatprep.subr.mxu0 %v506_v4  ;;  %681 = vmatprep.subr.mxu1 %v508_v5  ;;  %v373_v40 = vld [vmem:[#allocation2 + $0x1e0] sm:$0xff]  ;;  %v375_v41 = vld [vmem:[#allocation2 + $0x1f0] sm:$0xff]  ;;  %v370_v42 = vld [vmem:[#allocation2 + $0x1c8] sm:$0xff] }
  0x5a   : > { %581 = vmatpush2.msra.mxu0 %v505_v6  ;;  %682 = vmatpush2.msra.mxu1 %v507_v7  ;;  %v372_v43 = vld [vmem:[#allocation2 + $0x1d8] sm:$0xff]  ;;  %v369_v44 = vld [vmem:[#allocation2 + $0x1c0] sm:$0xff]  ;;  %v371_v45 = vld [vmem:[#allocation2 + $0x1d0] sm:$0xff] }
  0x5b   : > { %582 = vmatprep.subr.mxu0 %v502_v8  ;;  %683 = vmatprep.subr.mxu1 %v504_v9  ;;  %v366_v46 = vld [vmem:[#allocation2 + $0x1a8] sm:$0xff]  ;;  %v368_v47 = vld [vmem:[#allocation2 + $0x1b8] sm:$0xff]  ;;  %v365_v48 = vld [vmem:[#allocation2 + $0x1a0] sm:$0xff] }
  0x5c   : > { %583 = vmatpush2.msra.mxu0 %v501_v10  ;;  %684 = vmatpush2.msra.mxu1 %v503_v11  ;;  %v367_v49 = vld [vmem:[#allocation2 + $0x1b0] sm:$0xff]  ;;  %v362_v50 = vld [vmem:[#allocation2 + $0x188] sm:$0xff]  ;;  %v364_v51 = vld [vmem:[#allocation2 + $0x198] sm:$0xff] }
  0x5d   : > { %584 = vmatprep.subr.mxu0 %v498_v12  ;;  %685 = vmatprep.subr.mxu1 %v500_v13  ;;  %v361_v52 = vld [vmem:[#allocation2 + $0x180] sm:$0xff]  ;;  %v363_v53 = vld [vmem:[#allocation2 + $0x190] sm:$0xff]  ;;  %v358_v54 = vld [vmem:[#allocation2 + $0x168] sm:$0xff] }
  0x5e   : > { %585 = vmatpush2.msra.mxu0 %v497_v14  ;;  %686 = vmatpush2.msra.mxu1 %v499_v15  ;;  %v360_v55 = vld [vmem:[#allocation2 + $0x178] sm:$0xff]  ;;  %v357_v56 = vld [vmem:[#allocation2 + $0x160] sm:$0xff]  ;;  %v359_v57 = vld [vmem:[#allocation2 + $0x170] sm:$0xff] }
  0x5f   : > { %586 = vmatprep.subr.mxu0 %v494_v16  ;;  %687 = vmatprep.subr.mxu1 %v496_v17  ;;  %v354_v58 = vld [vmem:[#allocation2 + $0x148] sm:$0xff]  ;;  %v356_v59 = vld [vmem:[#allocation2 + $0x158] sm:$0xff]  ;;  %v353_v60 = vld [vmem:[#allocation2 + $0x140] sm:$0xff] }
  0x60   : > { %587 = vmatpush2.msra.mxu0 %v493_v18  ;;  %688 = vmatpush2.msra.mxu1 %v495_v19  ;;  %v355_v61 = vld [vmem:[#allocation2 + $0x150] sm:$0xff]  ;;  %v350_v62 = vld [vmem:[#allocation2 + $0x128] sm:$0xff]  ;;  %v352_v63 = vld [vmem:[#allocation2 + $0x138] sm:$0xff] }
  0x61   : > { %588 = vmatprep.subr.mxu0 %v490_v20  ;;  %689 = vmatprep.subr.mxu1 %v492_v21  ;;  %v349_v0 = vld [vmem:[#allocation2 + $0x120] sm:$0xff]  ;;  %v351_v1 = vld [vmem:[#allocation2 + $0x130] sm:$0xff]  ;;  %v346_v2 = vld [vmem:[#allocation2 + $0x108] sm:$0xff] }
  0x62   : > { %589 = vmatpush2.msra.mxu0 %v489_v22  ;;  %690 = vmatpush2.msra.mxu1 %v491_v23  ;;  %v348_v3 = vld [vmem:[#allocation2 + $0x118] sm:$0xff]  ;;  %v345_v4 = vld [vmem:[#allocation2 + $0x100] sm:$0xff]  ;;  %v347_v5 = vld [vmem:[#allocation2 + $0x110] sm:$0xff] }
  0x63   : > { %590 = vmatprep.subr.mxu0 %v486_v24  ;;  %691 = vmatprep.subr.mxu1 %v488_v25  ;;  %v342_v6 = vld [vmem:[#allocation2 + $0xe8] sm:$0xff]  ;;  %v344_v7 = vld [vmem:[#allocation2 + $0xf8] sm:$0xff]  ;;  %v341_v8 = vld [vmem:[#allocation2 + $0xe0] sm:$0xff] }
  0x64   : > { %591 = vmatpush2.msra.mxu0 %v485_v26  ;;  %692 = vmatpush2.msra.mxu1 %v487_v27  ;;  %v343_v9 = vld [vmem:[#allocation2 + $0xf0] sm:$0xff]  ;;  %v338_v10 = vld [vmem:[#allocation2 + $0xc8] sm:$0xff]  ;;  %v340_v11 = vld [vmem:[#allocation2 + $0xd8] sm:$0xff] }
  0x65   : > { %592 = vmatprep.subr.mxu0 %v482_v28  ;;  %693 = vmatprep.subr.mxu1 %v484_v29  ;;  %v337_v12 = vld [vmem:[#allocation2 + $0xc0] sm:$0xff]  ;;  %v339_v13 = vld [vmem:[#allocation2 + $0xd0] sm:$0xff]  ;;  %v334_v14 = vld [vmem:[#allocation2 + $0xa8] sm:$0xff] }
  0x66   : > { %593 = vmatpush2.msra.mxu0 %v481_v30  ;;  %694 = vmatpush2.msra.mxu1 %v483_v31  ;;  %v336_v15 = vld [vmem:[#allocation2 + $0xb8] sm:$0xff]  ;;  %v333_v16 = vld [vmem:[#allocation2 + $0xa0] sm:$0xff]  ;;  %v335_v17 = vld [vmem:[#allocation2 + $0xb0] sm:$0xff] }
  0x67   : > { %594 = vmatprep.subr.mxu0 %v478_v32  ;;  %695 = vmatprep.subr.mxu1 %v480_v33  ;;  %v330_v18 = vld [vmem:[#allocation2 + $0x88] sm:$0xff]  ;;  %v332_v19 = vld [vmem:[#allocation2 + $0x98] sm:$0xff]  ;;  %v329_v20 = vld [vmem:[#allocation2 + $0x80] sm:$0xff] }
  0x68   : > { %595 = vmatpush2.msra.mxu0 %v477_v34  ;;  %1400 = vmatprep.mubr.msk.f32.mxu0 %vm513_vm0, %v302_v35  ;;  %v331_v21 = vld [vmem:[#allocation2 + $0x90] sm:$0xff]  ;;  %v326_v22 = vld [vmem:[#allocation2 + $0x68] sm:$0xff]  ;;  %v328_v23 = vld [vmem:[#allocation2 + $0x78] sm:$0xff] }
  0x69   : > { %696 = vmatpush2.msra.mxu1 %v479_v36  ;;  %1406 = vmatprep.mubr.msk.f32.mxu1 %vm513_vm0, %v302_v35  ;;  %v325_v24 = vld [vmem:[#allocation2 + $0x60] sm:$0xff]  ;;  %v327_v25 = vld [vmem:[#allocation2 + $0x70] sm:$0xff]  ;;  %v322_v26 = vld [vmem:[#allocation2 + $0x48] sm:$0xff] }
  0x6a   : > { %597 = vmatmul.mubr.f32.vlgmr.msra.gmra.mxu0 %v301_v37  ;;  %698 = vmatmul.mubr.f32.vlgmr.msra.gmra.mxu1 %v301_v37  ;;  %v324_v27 = vld [vmem:[#allocation2 + $0x58] sm:$0xff]  ;;  %v321_v29 = vld [vmem:[#allocation2 + $0x40] sm:$0xff]  ;;  %v323_v30 = vld [vmem:[#allocation2 + $0x50] sm:$0xff] }
  0x6b   : > { %752 = vmatprep.subr.mxu0 %v374_v38  ;;  %853 = vmatprep.subr.mxu1 %v376_v39  ;;  %v304_v28 = vld [vmem:[%s1811_s20 + $0x18] sm:$0xff]  ;;  %v303_v31 = vld [vmem:[%s1811_s20 + $0x10] sm:$0xff]  ;;  %v318_v32 = vld [vmem:[#allocation2 + $0x28] sm:$0xff] }
  0x6c   : > { %753 = vmatpush1.msra.mxu0 %v373_v40  ;;  %854 = vmatpush1.msra.mxu1 %v375_v41  ;;  %v320_v33 = vld [vmem:[#allocation2 + $0x38] sm:$0xff]  ;;  %v317_v34 = vld [vmem:[#allocation2 + $0x20] sm:$0xff]  ;;  %v319_v35 = vld [vmem:[#allocation2 + $0x30] sm:$0xff] }
  0x6d   : > { %754 = vmatprep.subr.mxu0 %v370_v42  ;;  %855 = vmatprep.subr.mxu1 %v372_v43  ;;  %v314_v36 = vld [vmem:[#allocation2 + $0x8] sm:$0xff]  ;;  %v316_v37 = vld [vmem:[#allocation2 + $0x18] sm:$0xff]  ;;  %v313_v39 = vld [vmem:[#allocation2] sm:$0xff] }
  0x6e   : > { %755 = vmatpush1.msra.mxu0 %v369_v44  ;;  %856 = vmatpush1.msra.mxu1 %v371_v45  ;;  %v306_v38 = vld [vmem:[%s1811_s20 + $0x28] sm:$0xff]  ;;  %v315_v40 = vld [vmem:[#allocation2 + $0x10] sm:$0xff]  ;;  %v305_v41 = vld [vmem:[%s1811_s20 + $0x20] sm:$0xff] }
  0x6f   : > { %756 = vmatprep.subr.mxu0 %v366_v46  ;;  %857 = vmatprep.subr.mxu1 %v368_v47  ;;  %v410_v42 = vld [vmem:[#allocation2 + $0x308] sm:$0xff]  ;;  %v412_v43 = vld [vmem:[#allocation2 + $0x318] sm:$0xff]  ;;  %v409_v44 = vld [vmem:[#allocation2 + $0x300] sm:$0xff] }
  0x70   : > { %757 = vmatpush1.msra.mxu0 %v365_v48  ;;  %858 = vmatpush1.msra.mxu1 %v367_v49  ;;  %v411_v45 = vld [vmem:[#allocation2 + $0x310] sm:$0xff]  ;;  %v406_v46 = vld [vmem:[#allocation2 + $0x2e8] sm:$0xff]  ;;  %v408_v47 = vld [vmem:[#allocation2 + $0x2f8] sm:$0xff] }
  0x71   : > { %758 = vmatprep.subr.mxu0 %v362_v50  ;;  %859 = vmatprep.subr.mxu1 %v364_v51  ;;  %v308_v48 = vld [vmem:[%s1811_s20 + $0x38] sm:$0xff]  ;;  %v405_v49 = vld [vmem:[#allocation2 + $0x2e0] sm:$0xff]  ;;  %v407_v50 = vld [vmem:[#allocation2 + $0x2f0] sm:$0xff] }
  0x72   : > { %759 = vmatpush1.msra.mxu0 %v361_v52  ;;  %860 = vmatpush1.msra.mxu1 %v363_v53  ;;  %v307_v51 = vld [vmem:[%s1811_s20 + $0x30] sm:$0xff]  ;;  %v402_v52 = vld [vmem:[#allocation2 + $0x2c8] sm:$0xff]  ;;  %v404_v53 = vld [vmem:[#allocation2 + $0x2d8] sm:$0xff] }
  0x73   : > { %760 = vmatprep.subr.mxu0 %v358_v54  ;;  %861 = vmatprep.subr.mxu1 %v360_v55  ;;  %v401_v54 = vld [vmem:[#allocation2 + $0x2c0] sm:$0xff]  ;;  %v403_v55 = vld [vmem:[#allocation2 + $0x2d0] sm:$0xff] }
  0x74   : > { %761 = vmatpush1.msra.mxu0 %v357_v56  ;;  %862 = vmatpush1.msra.mxu1 %v359_v57  ;;  %v398_v56 = vld [vmem:[#allocation2 + $0x2a8] sm:$0xff]  ;;  %v400_v57 = vld [vmem:[#allocation2 + $0x2b8] sm:$0xff] }
  0x75   : > { %762 = vmatprep.subr.mxu0 %v354_v58  ;;  %863 = vmatprep.subr.mxu1 %v356_v59  ;;  %v310_v58 = vld [vmem:[%s1811_s20 + $0x48] sm:$0xff]  ;;  %v397_v59 = vld [vmem:[#allocation2 + $0x2a0] sm:$0xff] }
  0x76   : > { %763 = vmatpush1.msra.mxu0 %v353_v60  ;;  %864 = vmatpush1.msra.mxu1 %v355_v61  ;;  %v399_v60 = vld [vmem:[#allocation2 + $0x2b0] sm:$0xff]  ;;  %v309_v61 = vld [vmem:[%s1811_s20 + $0x40] sm:$0xff] }
  0x77   : > { %764 = vmatprep.subr.mxu0 %v350_v62  ;;  %865 = vmatprep.subr.mxu1 %v352_v63  ;;  %v394_v62 = vld [vmem:[#allocation2 + $0x288] sm:$0xff]  ;;  %v396_v63 = vld [vmem:[#allocation2 + $0x298] sm:$0xff] }
  0x78   : > { %765 = vmatpush1.msra.mxu0 %v349_v0  ;;  %866 = vmatpush1.msra.mxu1 %v351_v1  ;;  %v393_v0 = vld [vmem:[#allocation2 + $0x280] sm:$0xff]  ;;  %v395_v1 = vld [vmem:[#allocation2 + $0x290] sm:$0xff] }
  0x79   : > { %766 = vmatprep.subr.mxu0 %v346_v2  ;;  %867 = vmatprep.subr.mxu1 %v348_v3  ;;  %v390_v2 = vld [vmem:[#allocation2 + $0x268] sm:$0xff]  ;;  %v392_v3 = vld [vmem:[#allocation2 + $0x278] sm:$0xff] }
  0x7a   : > { %767 = vmatpush1.msra.mxu0 %v345_v4  ;;  %868 = vmatpush1.msra.mxu1 %v347_v5  ;;  %v312_v4 = vld [vmem:[%s1811_s20 + $0x58] sm:$0x1]  ;;  %v389_v5 = vld [vmem:[#allocation2 + $0x260] sm:$0xff] }
  0x7b   : > { %768 = vmatprep.subr.mxu0 %v342_v6  ;;  %869 = vmatprep.subr.mxu1 %v344_v7  ;;  %v391_v6 = vld [vmem:[#allocation2 + $0x270] sm:$0xff] }
  0x7c   : > { %769 = vmatpush1.msra.mxu0 %v341_v8  ;;  %870 = vmatpush1.msra.mxu1 %v343_v9  ;;  %v311_v7 = vld [vmem:[%s1811_s20 + $0x50] sm:$0x1]  ;;  %v386_v8 = vld [vmem:[#allocation2 + $0x248] sm:$0xff]  ;;  %v388_v9 = vld [vmem:[#allocation2 + $0x258] sm:$0xff] }
  0x7d   : > { %770 = vmatprep.subr.mxu0 %v338_v10  ;;  %871 = vmatprep.subr.mxu1 %v340_v11  ;;  %v385_v10 = vld [vmem:[#allocation2 + $0x240] sm:$0xff]  ;;  %v387_v11 = vld [vmem:[#allocation2 + $0x250] sm:$0xff] }
  0x7e   : > { %771 = vmatpush1.msra.mxu0 %v337_v12  ;;  %872 = vmatpush1.msra.mxu1 %v339_v13  ;;  %v382_v12 = vld [vmem:[#allocation2 + $0x228] sm:$0xff]  ;;  %v384_v13 = vld [vmem:[#allocation2 + $0x238] sm:$0xff] }
  0x7f   : > { %772 = vmatprep.subr.mxu0 %v334_v14  ;;  %873 = vmatprep.subr.mxu1 %v336_v15  ;;  %v381_v14 = vld [vmem:[#allocation2 + $0x220] sm:$0xff]  ;;  %v383_v15 = vld [vmem:[#allocation2 + $0x230] sm:$0xff] }
  0x80   : > { %773 = vmatpush1.msra.mxu0 %v333_v16  ;;  %874 = vmatpush1.msra.mxu1 %v335_v17  ;;  %v378_v16 = vld [vmem:[#allocation2 + $0x208] sm:$0xff]  ;;  %v380_v17 = vld [vmem:[#allocation2 + $0x218] sm:$0xff] }
  0x81   : > { %774 = vmatprep.subr.mxu0 %v330_v18  ;;  %875 = vmatprep.subr.mxu1 %v332_v19  ;;  %v377_v18 = vld [vmem:[#allocation2 + $0x200] sm:$0xff]  ;;  %v290_v19 = vld [vmem:[%s1842_s24 + $0x8] sm:$0xff] }
  0x82   : > { %775 = vmatpush1.msra.mxu0 %v329_v20  ;;  %876 = vmatpush1.msra.mxu1 %v331_v21  ;;  %v379_v20 = vld [vmem:[#allocation2 + $0x210] sm:$0xff]  ;;  %v289_v21 = vld [vmem:[%s1842_s24] sm:$0xff] }
  0x83   : > { %776 = vmatprep.subr.mxu0 %v326_v22  ;;  %877 = vmatprep.subr.mxu1 %v328_v23  ;;  %v292_v22 = vld [vmem:[%s1842_s24 + $0x18] sm:$0xff]  ;;  %v291_v23 = vld [vmem:[%s1842_s24 + $0x10] sm:$0xff] }
  0x84   : > { %777 = vmatpush1.msra.mxu0 %v325_v24  ;;  %878 = vmatpush1.msra.mxu1 %v327_v25  ;;  %v294_v24 = vld [vmem:[%s1842_s24 + $0x28] sm:$0xff]  ;;  %v293_v25 = vld [vmem:[%s1842_s24 + $0x20] sm:$0xff] }
  0x85   : > { %778 = vmatprep.subr.mxu0 %v322_v26  ;;  %879 = vmatprep.subr.mxu1 %v324_v27  ;;  %v296_v26 = vld [vmem:[%s1842_s24 + $0x38] sm:$0xff]  ;;  %v295_v27 = vld [vmem:[%s1842_s24 + $0x30] sm:$0xff] }
  0x86   : > { %1401 = vmatprep.mubr.msk.f32.mxu0 %vm513_vm0, %v304_v28  ;;  %1407 = vmatprep.mubr.msk.f32.mxu1 %vm513_vm0, %v304_v28  ;;  %v298_v28 = vld [vmem:[%s1842_s24 + $0x48] sm:$0xff] }
  0x87   : > { %779 = vmatpush1.msra.mxu0 %v321_v29  ;;  %880 = vmatpush1.msra.mxu1 %v323_v30  ;;  %v297_v29 = vld [vmem:[%s1842_s24 + $0x40] sm:$0xff]  ;;  %v300_v30 = vld [vmem:[%s1842_s24 + $0x58] sm:$0x1] }
  0x88   : > { %603 = vmatmul.mubr.f32.gmra.mxu0 %v303_v31  ;;  %704 = vmatmul.mubr.f32.gmra.mxu1 %v303_v31  ;;  %v299_v31 = vld [vmem:[%s1842_s24 + $0x50] sm:$0x1] }
  0x89   : > { %780 = vmatprep.subr.mxu0 %v318_v32  ;;  %881 = vmatprep.subr.mxu1 %v320_v33  ;;  %v1021_v32 = vld [vmem:[#allocation4 + $0xf8] sm:$0xff] }
  0x8a   : > { %781 = vmatpush1.msra.mxu0 %v317_v34  ;;  %882 = vmatpush1.msra.mxu1 %v319_v35  ;;  %v1005_v33 = vld [vmem:[#allocation4 + $0x78] sm:$0xff]  ;;  %v1020_v34 = vld [vmem:[#allocation4 + $0xf0] sm:$0xff] }
  0x8b   : > { %782 = vmatprep.subr.mxu0 %v314_v36  ;;  %883 = vmatprep.subr.mxu1 %v316_v37  ;;  %v1004_v35 = vld [vmem:[#allocation4 + $0x70] sm:$0xff]  ;;  %v1019_v36 = vld [vmem:[#allocation4 + $0xe8] sm:$0xff] }
  0x8c   : > { %1402 = vmatprep.mubr.msk.f32.mxu0 %vm513_vm0, %v306_v38  ;;  %1408 = vmatprep.mubr.msk.f32.mxu1 %vm513_vm0, %v306_v38  ;;  %v1003_v37 = vld [vmem:[#allocation4 + $0x68] sm:$0xff]  ;;  %v1018_v38 = vld [vmem:[#allocation4 + $0xe0] sm:$0xff] }
  0x8d   : > { %783 = vmatpush1.msra.mxu0 %v313_v39  ;;  %884 = vmatpush1.msra.mxu1 %v315_v40  ;;  %v1002_v39 = vld [vmem:[#allocation4 + $0x60] sm:$0xff]  ;;  %v1017_v40 = vld [vmem:[#allocation4 + $0xd8] sm:$0xff] }
  0x8e   : > { %609 = vmatmul.mubr.f32.gmra.mxu0 %v305_v41  ;;  %710 = vmatmul.mubr.f32.gmra.mxu1 %v305_v41  ;;  %v1001_v41 = vld [vmem:[#allocation4 + $0x58] sm:$0xff] }
  0x8f   : > { %798 = vmatprep.subr.mxu0 %v410_v42  ;;  %899 = vmatprep.subr.mxu1 %v412_v43  ;;  %v1016_v42 = vld [vmem:[#allocation4 + $0xd0] sm:$0xff] }
  0x90   : > { %799 = vmatpush2.msra.mxu0 %v409_v44  ;;  %900 = vmatpush2.msra.mxu1 %v411_v45  ;;  %v1000_v43 = vld [vmem:[#allocation4 + $0x50] sm:$0xff]  ;;  %v1015_v44 = vld [vmem:[#allocation4 + $0xc8] sm:$0xff] }
  0x91   : > { %800 = vmatprep.subr.mxu0 %v406_v46  ;;  %901 = vmatprep.subr.mxu1 %v408_v47  ;;  %v999_v45 = vld [vmem:[#allocation4 + $0x48] sm:$0xff]  ;;  %v1014_v46 = vld [vmem:[#allocation4 + $0xc0] sm:$0xff] }
  0x92   : > { %1403 = vmatprep.mubr.msk.f32.mxu0 %vm513_vm0, %v308_v48  ;;  %1409 = vmatprep.mubr.msk.f32.mxu1 %vm513_vm0, %v308_v48  ;;  %v998_v47 = vld [vmem:[#allocation4 + $0x40] sm:$0xff]  ;;  %v1013_v48 = vld [vmem:[#allocation4 + $0xb8] sm:$0xff] }
  0x93   : > { %801 = vmatpush2.msra.mxu0 %v405_v49  ;;  %902 = vmatpush2.msra.mxu1 %v407_v50  ;;  %v997_v49 = vld [vmem:[#allocation4 + $0x38] sm:$0xff]  ;;  %v1012_v50 = vld [vmem:[#allocation4 + $0xb0] sm:$0xff] }
  0x94   : > { %615 = vmatmul.mubr.f32.gmra.mxu0 %v307_v51  ;;  %716 = vmatmul.mubr.f32.gmra.mxu1 %v307_v51  ;;  %v996_v51 = vld [vmem:[#allocation4 + $0x30] sm:$0xff] }
  0x95   : > { %802 = vmatprep.subr.mxu0 %v402_v52  ;;  %903 = vmatprep.subr.mxu1 %v404_v53  ;;  %v1011_v52 = vld [vmem:[#allocation4 + $0xa8] sm:$0xff] }
  0x96   : > { %803 = vmatpush2.msra.mxu0 %v401_v54  ;;  %904 = vmatpush2.msra.mxu1 %v403_v55  ;;  %v995_v53 = vld [vmem:[#allocation4 + $0x28] sm:$0xff]  ;;  %v1010_v54 = vld [vmem:[#allocation4 + $0xa0] sm:$0xff] }
  0x97   : > { %804 = vmatprep.subr.mxu0 %v398_v56  ;;  %905 = vmatprep.subr.mxu1 %v400_v57  ;;  %v994_v55 = vld [vmem:[#allocation4 + $0x20] sm:$0xff]  ;;  %v1009_v56 = vld [vmem:[#allocation4 + $0x98] sm:$0xff] }
  0x98   : > { %1404 = vmatprep.mubr.msk.f32.mxu0 %vm513_vm0, %v310_v58  ;;  %1410 = vmatprep.mubr.msk.f32.mxu1 %vm513_vm0, %v310_v58  ;;  %v993_v57 = vld [vmem:[#allocation4 + $0x18] sm:$0xff]  ;;  %v1008_v58 = vld [vmem:[#allocation4 + $0x90] sm:$0xff] }
  0x99   : > { %805 = vmatpush2.msra.mxu0 %v397_v59  ;;  %906 = vmatpush2.msra.mxu1 %v399_v60  ;;  %v992_v59 = vld [vmem:[#allocation4 + $0x10] sm:$0xff]  ;;  %v1007_v60 = vld [vmem:[#allocation4 + $0x88] sm:$0xff] }
  0x9a   : > { %621 = vmatmul.mubr.f32.gmra.mxu0 %v309_v61  ;;  %722 = vmatmul.mubr.f32.gmra.mxu1 %v309_v61  ;;  %v991_v61 = vld [vmem:[#allocation4 + $0x8] sm:$0xff] }
  0x9b   : > { %806 = vmatprep.subr.mxu0 %v394_v62  ;;  %907 = vmatprep.subr.mxu1 %v396_v63  ;;  %v1006_v62 = vld [vmem:[#allocation4 + $0x80] sm:$0xff] }
  0x9c   : > { %807 = vmatpush2.msra.mxu0 %v393_v0  ;;  %908 = vmatpush2.msra.mxu1 %v395_v1  ;;  %v990_v63 = vld [vmem:[#allocation4] sm:$0xff] }
  0x9d   : > { %808 = vmatprep.subr.mxu0 %v390_v2  ;;  %909 = vmatprep.subr.mxu1 %v392_v3 }
  0x9e   : > { %1405 = vmatprep.mubr.msk.f32.mxu0 %vm513_vm0, %v312_v4  ;;  %1411 = vmatprep.mubr.msk.f32.mxu1 %vm513_vm0, %v312_v4 }
  0x9f   : > { %809 = vmatpush2.msra.mxu0 %v389_v5  ;;  %910 = vmatpush2.msra.mxu1 %v391_v6 }
  0xa0   : > { %627 = vmatmul.mubr.f32.gmra.mxu0 %v311_v7  ;;  %728 = vmatmul.mubr.f32.gmra.mxu1 %v311_v7 }
  0xa1   : > { %810 = vmatprep.subr.mxu0 %v386_v8  ;;  %911 = vmatprep.subr.mxu1 %v388_v9 }
  0xa2   : > { %811 = vmatpush2.msra.mxu0 %v385_v10  ;;  %912 = vmatpush2.msra.mxu1 %v387_v11 }
  0xa3   : > { %812 = vmatprep.subr.mxu0 %v382_v12  ;;  %913 = vmatprep.subr.mxu1 %v384_v13 }
  0xa4   : > { %813 = vmatpush2.msra.mxu0 %v381_v14  ;;  %914 = vmatpush2.msra.mxu1 %v383_v15 }
  0xa5   : > { %814 = vmatprep.subr.mxu0 %v378_v16  ;;  %915 = vmatprep.subr.mxu1 %v380_v17 }
  0xa6   : > { %815 = vmatpush2.msra.mxu0 %v377_v18  ;;  %1412 = vmatprep.mubr.msk.f32.mxu0 %vm513_vm0, %v290_v19 }
  0xa7   : > { %916 = vmatpush2.msra.mxu1 %v379_v20  ;;  %1418 = vmatprep.mubr.msk.f32.mxu1 %vm513_vm0, %v290_v19 }
  0xa8   : > { %817 = vmatmul.mubr.f32.vlgmr.msra.gmra.mxu0 %v289_v21  ;;  %918 = vmatmul.mubr.f32.vlgmr.msra.gmra.mxu1 %v289_v21 }
  0xa9   : > { %1413 = vmatprep.mubr.msk.f32.mxu0 %vm513_vm0, %v292_v22  ;;  %1419 = vmatprep.mubr.msk.f32.mxu1 %vm513_vm0, %v292_v22 }
  0xaa   : > { %1427 = vmatprep.subr.mxu0 %v1021_v32 }
  0xab   : > { %1428 = vmatpush3.msra.mxu0 %v1005_v33 }
  0xac   : > { %823 = vmatmul.mubr.f32.gmra.mxu0 %v291_v23  ;;  %924 = vmatmul.mubr.f32.gmra.mxu1 %v291_v23 }
  0xad   : > { %1414 = vmatprep.mubr.msk.f32.mxu0 %vm513_vm0, %v294_v24  ;;  %1420 = vmatprep.mubr.msk.f32.mxu1 %vm513_vm0, %v294_v24 }
  0xae   : > { %1429 = vmatprep.subr.mxu0 %v1020_v34 }
  0xaf   : > { %1430 = vmatpush3.msra.mxu0 %v1004_v35 }
  0xb0   : > { %829 = vmatmul.mubr.f32.gmra.mxu0 %v293_v25  ;;  %930 = vmatmul.mubr.f32.gmra.mxu1 %v293_v25 }
  0xb1   : > { %1415 = vmatprep.mubr.msk.f32.mxu0 %vm513_vm0, %v296_v26  ;;  %1421 = vmatprep.mubr.msk.f32.mxu1 %vm513_vm0, %v296_v26 }
  0xb2   : > { %1431 = vmatprep.subr.mxu0 %v1019_v36 }
  0xb3   : > { %1432 = vmatpush3.msra.mxu0 %v1003_v37 }
  0xb4   : > { %835 = vmatmul.mubr.f32.gmra.mxu0 %v295_v27  ;;  %936 = vmatmul.mubr.f32.gmra.mxu1 %v295_v27 }
  0xb5   : > { %1416 = vmatprep.mubr.msk.f32.mxu0 %vm513_vm0, %v298_v28  ;;  %1422 = vmatprep.mubr.msk.f32.mxu1 %vm513_vm0, %v298_v28 }
  0xb6   : > { %1433 = vmatprep.subr.mxu0 %v1018_v38 }
  0xb7   : > { %1434 = vmatpush3.msra.mxu0 %v1002_v39 }
  0xb8   : > { %841 = vmatmul.mubr.f32.gmra.mxu0 %v297_v29  ;;  %942 = vmatmul.mubr.f32.gmra.mxu1 %v297_v29 }
  0xb9   : > { %1417 = vmatprep.mubr.msk.f32.mxu0 %vm513_vm0, %v300_v30  ;;  %1423 = vmatprep.mubr.msk.f32.mxu1 %vm513_vm0, %v300_v30 }
  0xba   : > { %1435 = vmatprep.subr.mxu0 %v1017_v40 }
  0xbb   : > { %1436 = vmatpush3.msra.mxu0 %v1001_v41 }
  0xbc   : > { %847 = vmatmul.mubr.f32.gmra.mxu0 %v299_v31  ;;  %948 = vmatmul.mubr.f32.gmra.mxu1 %v299_v31 }
  0xbd   : > { %1437 = vmatprep.subr.mxu0 %v1016_v42 }
  0xbe   : > { %1438 = vmatpush3.msra.mxu0 %v1000_v43 }
  0xbf   : > { %1439 = vmatprep.subr.mxu0 %v1015_v44 }
  0xc0   : > { %1440 = vmatpush3.msra.mxu0 %v999_v45 }
  0xc1   : > { %1441 = vmatprep.subr.mxu0 %v1014_v46 }
  0xc2   : > { %1442 = vmatpush3.msra.mxu0 %v998_v47 }
  0xc3   : > { %1443 = vmatprep.subr.mxu0 %v1013_v48 }
  0xc4   : > { %1444 = vmatpush3.msra.mxu0 %v997_v49 }
  0xc5   : > { %1445 = vmatprep.subr.mxu0 %v1012_v50 }
  0xc6   : > { %1446 = vmatpush3.msra.mxu0 %v996_v51 }
  0xc7   : > { %1447 = vmatprep.subr.mxu0 %v1011_v52 }
  0xc8   : > { %1448 = vmatpush3.msra.mxu0 %v995_v53 }
  0xc9   : > { %1449 = vmatprep.subr.mxu0 %v1010_v54 }
  0xca   : > { %1450 = vmatpush3.msra.mxu0 %v994_v55 }
  0xcb   : > { %1451 = vmatprep.subr.mxu0 %v1009_v56 }
  0xcc   : > { %1452 = vmatpush3.msra.mxu0 %v993_v57 }
  0xcd   : > { %1453 = vmatprep.subr.mxu0 %v1008_v58 }
  0xce   : > { %1454 = vmatpush3.msra.mxu0 %v992_v59 }
  0xcf   : > { %1455 = vmatprep.subr.mxu0 %v1007_v60 }
  0xd0   : > { %1456 = vmatpush3.msra.mxu0 %v991_v61 }
  0xd1   : > { %1457 = vmatprep.subr.mxu0 %v1006_v62 }
  0xd2   : > { %1458 = vmatpush3.msra.mxu0 %v990_v63 }
 0x12a   : > { %v598_v0 = vpop.f32.mrf.mxu0  ;;  %v699_v1 = vpop.f32.mrf.mxu1 }
 0x12c   : > { %v600_v2 = vpop.f32.mrf.mxu0  ;;  %v701_v3 = vpop.f32.mrf.mxu1 }
 0x148   : > { %v604_v4 = vpop.f32.mrf.mxu0  ;;  %v705_v5 = vpop.f32.mrf.mxu1 }
 0x14a   : > { %v606_v6 = vpop.f32.mrf.mxu0  ;;  %v707_v7 = vpop.f32.mrf.mxu1 }
 0x14e   : > { %v610_v8 = vpop.f32.mrf.mxu0  ;;  %v711_v9 = vpop.f32.mrf.mxu1 }
 0x150   : > { %v612_v10 = vpop.f32.mrf.mxu0  ;;  %v713_v11 = vpop.f32.mrf.mxu1 }
 0x154   : > { %v616_v12 = vpop.f32.mrf.mxu0  ;;  %v717_v13 = vpop.f32.mrf.mxu1 }
 0x156   : > { %v618_v14 = vpop.f32.mrf.mxu0  ;;  %v719_v15 = vpop.f32.mrf.mxu1 }
 0x15a   : > { %v1868_v16 = vpop.f32.mrf.mxu0  ;;  %v1870_v17 = vpop.f32.mrf.mxu1 }
 0x15c   : > { %v1872_v18 = vpop.f32.mrf.mxu0  ;;  %v1874_v19 = vpop.f32.mrf.mxu1 }
 0x160   : > { %v1876_v20 = vpop.f32.mrf.mxu0  ;;  %v1878_v21 = vpop.f32.mrf.mxu1 }
 0x162   : > { %v1880_v22 = vpop.f32.mrf.mxu0  ;;  %v1882_v23 = vpop.f32.mrf.mxu1 }
 0x168   : > { %v818_v24 = vpop.f32.mrf.mxu0  ;;  %v919_v25 = vpop.f32.mrf.mxu1 }
 0x169   : > { %v819_v26 = vadd.f32 %v818_v24, %v598_v0  ;;  %v920_v27 = vadd.f32 %v919_v25, %v699_v1 }
 0x16a   : > { %v820_v28 = vpop.f32.mrf.mxu0  ;;  %v921_v29 = vpop.f32.mrf.mxu1 }
 0x16b   : > { %v821_v30 = vadd.f32 %v820_v28, %v600_v2  ;;  %v922_v31 = vadd.f32 %v921_v29, %v701_v3  ;;  %v954_v32 = vmul.f32 %v819_v26, %v819_v26  ;;  %v966_v33 = vmul.f32 %v920_v27, %v920_v27 }
 0x16c   : > { %v824_v34 = vpop.f32.mrf.mxu0  ;;  %v925_v35 = vpop.f32.mrf.mxu1 }
 0x16d   : > { %v955_v36 = vmul.f32 %v821_v30, %v821_v30  ;;  %v967_v37 = vmul.f32 %v922_v31, %v922_v31  ;;  %v825_v38 = vadd.f32 %v824_v34, %v604_v4  ;;  %v926_v39 = vadd.f32 %v925_v35, %v705_v5 }
 0x16e   : > { %v826_v40 = vpop.f32.mrf.mxu0  ;;  %v927_v41 = vpop.f32.mrf.mxu1  ;;  %v978_v45 = vadd.f32 %v966_v33, %v954_v32 }
 0x16f   : > { %v979_v42 = vadd.f32 %v967_v37, %v955_v36  ;;  %v827_v43 = vadd.f32 %v826_v40, %v606_v6  ;;  %v928_v44 = vadd.f32 %v927_v41, %v707_v7  ;;  %v956_v46 = vmul.f32 %v825_v38, %v825_v38 }
 0x170   : > { %v968_v47 = vmul.f32 %v926_v39, %v926_v39  ;;  %v830_v48 = vpop.f32.mrf.mxu0  ;;  %v931_v49 = vpop.f32.mrf.mxu1 }
 0x171   : > { %v957_v50 = vmul.f32 %v827_v43, %v827_v43  ;;  %v969_v51 = vmul.f32 %v928_v44, %v928_v44  ;;  %v831_v52 = vadd.f32 %v830_v48, %v610_v8  ;;  %v932_v53 = vadd.f32 %v931_v49, %v711_v9  ;;  %1086 = vmatprep.mubr.f32.mxu0 %v979_v42 }
 0x172   : > { %v832_v54 = vpop.f32.mrf.mxu0  ;;  %v933_v55 = vpop.f32.mrf.mxu1  ;;  %1087 = vmatmul.mubr.f32.vlgmr.msra.gmra.mxu0 %v978_v45  ;;  %v980_v58 = vadd.f32 %v968_v47, %v956_v46 }
 0x173   : > { %v981_v56 = vadd.f32 %v969_v51, %v957_v50  ;;  %v833_v57 = vadd.f32 %v832_v54, %v612_v10  ;;  %v958_v59 = vmul.f32 %v831_v52, %v831_v52  ;;  %v934_v60 = vadd.f32 %v933_v55, %v713_v11 }
 0x174   : > { %v836_v61 = vpop.f32.mrf.mxu0  ;;  %v937_v62 = vpop.f32.mrf.mxu1  ;;  %v970_v63 = vmul.f32 %v932_v53, %v932_v53 }
 0x175   : > { %v959_v0 = vmul.f32 %v833_v57, %v833_v57  ;;  %v837_v1 = vadd.f32 %v836_v61, %v616_v12  ;;  %v938_v2 = vadd.f32 %v937_v62, %v717_v13  ;;  %1091 = vmatprep.mubr.f32.mxu0 %v981_v56  ;;  %v971_v3 = vmul.f32 %v934_v60, %v934_v60 }
 0x176   : > { %v838_v4 = vpop.f32.mrf.mxu0  ;;  %v939_v5 = vpop.f32.mrf.mxu1  ;;  %1092 = vmatmul.mubr.f32.gmra.mxu0 %v980_v58  ;;  %v982_v26 = vadd.f32 %v970_v63, %v958_v59 }
 0x177   : > { %v839_v6 = vadd.f32 %v838_v4, %v618_v14  ;;  %v940_v7 = vadd.f32 %v939_v5, %v719_v15  ;;  %v983_v8 = vadd.f32 %v971_v3, %v959_v0  ;;  %v960_v9 = vmul.f32 %v837_v1, %v837_v1 }
 0x178   : > { %v972_v24 = vmul.f32 %v938_v2, %v938_v2  ;;  %v842_v10 = vpop.f32.mrf.mxu0  ;;  %v943_v25 = vpop.f32.mrf.mxu1 }
 0x179   : > { %v961_v11 = vmul.f32 %v839_v6, %v839_v6  ;;  %v973_v27 = vmul.f32 %v940_v7, %v940_v7  ;;  %v843_v28 = vadd.f32 %v842_v10, %v1868_v16  ;;  %v944_v12 = vadd.f32 %v943_v25, %v1870_v17  ;;  %1096 = vmatprep.mubr.f32.mxu0 %v983_v8 }
 0x17a   : > { %v844_v13 = vpop.f32.mrf.mxu0  ;;  %v945_v29 = vpop.f32.mrf.mxu1  ;;  %1097 = vmatmul.mubr.f32.gmra.mxu0 %v982_v26  ;;  %v984_v15 = vadd.f32 %v972_v24, %v960_v9 }
 0x17b   : > { %v985_v30 = vadd.f32 %v973_v27, %v961_v11  ;;  %v845_v31 = vadd.f32 %v844_v13, %v1872_v18  ;;  %v946_v14 = vadd.f32 %v945_v29, %v1874_v19  ;;  %v962_v32 = vmul.f32 %v843_v28, %v843_v28 }
 0x17c   : > { %v974_v33 = vmul.f32 %v944_v12, %v944_v12  ;;  %v848_v34 = vpop.f32.mrf.mxu0  ;;  %v949_v35 = vpop.f32.mrf.mxu1 }
 0x17d   : > { %v963_v36 = vmul.f32 %v845_v31, %v845_v31  ;;  %v975_v37 = vmul.f32 %v946_v14, %v946_v14  ;;  %v849_v16 = vadd.f32 %v848_v34, %v1876_v20  ;;  %v950_v17 = vadd.f32 %v949_v35, %v1878_v21  ;;  %1101 = vmatprep.mubr.f32.mxu0 %v985_v30 }
 0x17e   : > { %v850_v38 = vpop.f32.mrf.mxu0  ;;  %v951_v39 = vpop.f32.mrf.mxu1  ;;  %1102 = vmatmul.mubr.f32.gmra.mxu0 %v984_v15  ;;  %v986_v41 = vadd.f32 %v974_v33, %v962_v32 }
 0x17f   : > { %v987_v40 = vadd.f32 %v975_v37, %v963_v36  ;;  %v851_v18 = vadd.f32 %v850_v38, %v1880_v22  ;;  %v952_v19 = vadd.f32 %v951_v39, %v1882_v23  ;;  %v964_v42 = vmul.f32 %v849_v16, %v849_v16 }
 0x180   : > { %v976_v43 = vmul.f32 %v950_v17, %v950_v17 }
 0x181   : > { %v965_v44 = vmul.f32 %v851_v18, %v851_v18  ;;  %1106 = vmatprep.mubr.f32.mxu0 %v987_v40  ;;  %v977_v45 = vmul.f32 %v952_v19, %v952_v19  ;;  %v1186_v40 = vld [vmem:[#allocation6 + $0x78] sm:$0xff]  ;;  %v1185_v18 = vld [vmem:[#allocation6 + $0x70] sm:$0xff]  ;;  %v1184_v19 = vld [vmem:[#allocation6 + $0x68] sm:$0xff] }
 0x182   : > { %1107 = vmatmul.mubr.f32.gmra.mxu0 %v986_v41  ;;  %v988_v20 = vadd.f32 %v976_v43, %v964_v42  ;;  %1499 = vmatprep.subr.mxu1 %v1186_v40  ;;  %v1183_v41 = vld [vmem:[#allocation6 + $0x60] sm:$0xff]  ;;  %v1182_v42 = vld [vmem:[#allocation6 + $0x58] sm:$0xff]  ;;  %v1181_v43 = vld [vmem:[#allocation6 + $0x50] sm:$0xff] }
 0x183   : > { %v989_v46 = vadd.f32 %v977_v45, %v965_v44  ;;  %1500 = vmatpush3.msra.mxu1 %v1186_v40  ;;  %v1180_v44 = vld [vmem:[#allocation6 + $0x48] sm:$0xff]  ;;  %v1179_v45 = vld [vmem:[#allocation6 + $0x40] sm:$0xff] }
 0x184   : > { %1501 = vmatprep.subr.mxu1 %v1185_v18 }
 0x185   : > { %1111 = vmatprep.mubr.f32.mxu0 %v989_v46  ;;  %1502 = vmatpush3.msra.mxu1 %v1185_v18  ;;  %v1178_v46 = vld [vmem:[#allocation6 + $0x38] sm:$0xff] }
 0x186   : > { %1112 = vmatmul.mubr.f32.gmra.mxu0 %v988_v20  ;;  %1503 = vmatprep.subr.mxu1 %v1184_v19  ;;  %v1177_v20 = vld [vmem:[#allocation6 + $0x30] sm:$0xff] }
 0x187   : > { %1504 = vmatpush3.msra.mxu1 %v1184_v19 }
 0x188   : > { %1505 = vmatprep.subr.mxu1 %v1183_v41 }
 0x189   : > { %1506 = vmatpush3.msra.mxu1 %v1183_v41 }
 0x18a   : > { %1507 = vmatprep.subr.mxu1 %v1182_v42 }
 0x18b   : > { %1508 = vmatpush3.msra.mxu1 %v1182_v42 }
 0x18c   : > { %1509 = vmatprep.subr.mxu1 %v1181_v43 }
 0x18d   : > { %1510 = vmatpush3.msra.mxu1 %v1181_v43 }
 0x18e   : > { %1511 = vmatprep.subr.mxu1 %v1180_v44 }
 0x18f   : > { %1512 = vmatpush3.msra.mxu1 %v1180_v44 }
 0x190   : > { %1513 = vmatprep.subr.mxu1 %v1179_v45 }
 0x191   : > { %1514 = vmatpush3.msra.mxu1 %v1179_v45 }
 0x192   : > { %1515 = vmatprep.subr.mxu1 %v1178_v46 }
 0x193   : > { %1516 = vmatpush3.msra.mxu1 %v1178_v46 }
 0x194   : > { %1517 = vmatprep.subr.mxu1 %v1177_v20 }
 0x195   : > { %1518 = vmatpush3.msra.mxu1 %v1177_v20 }
 0x232   : > { %v1459_v21 = vpop.f32.mrf.mxu0 }
 0x234   : > { %v1460_v47 = vpop.f32.mrf.mxu0 }
 0x235   : > { %v1461_v51 = vadd.f32 %v1460_v47, %v1459_v21  ;;  %v1176_v21 = vld [vmem:[#allocation6 + $0x28] sm:$0xff]  ;;  %v1175_v47 = vld [vmem:[#allocation6 + $0x20] sm:$0xff] }
 0x236   : > { %v1462_v48 = vpop.f32.mrf.mxu0  ;;  %1519 = vmatprep.subr.mxu1 %v1176_v21 }
 0x237   : > { %v1117_v55 = vmax.f32 %v1461_v51, 1e-10  ;;  %1520 = vmatpush3.msra.mxu1 %v1176_v21 }
 0x238   : > { %v1463_v49 = vpop.f32.mrf.mxu0  ;;  %1521 = vmatprep.subr.mxu1 %v1175_v47 }
 0x239   : > { %v1464_v23 = vadd.f32 %v1463_v49, %v1462_v48  ;;  %1587 = vlog2.f32 %v1117_v55  ;;  %v1174_v48 = vld [vmem:[#allocation6 + $0x18] sm:$0xff]  ;;  %1522 = vmatpush3.msra.mxu1 %v1175_v47  ;;  %v1173_v49 = vld [vmem:[#allocation6 + $0x10] sm:$0xff] }
 0x23a   : > { %v1465_v50 = vpop.f32.mrf.mxu0  ;;  %1523 = vmatprep.subr.mxu1 %v1174_v48 }
 0x23b   : > { %v1118_v58 = vmax.f32 %v1464_v23, 1e-10  ;;  %1524 = vmatpush3.msra.mxu1 %v1174_v48 }
 0x23c   : > { %v1466_v22 = vpop.f32.mrf.mxu0  ;;  %1525 = vmatprep.subr.mxu1 %v1173_v49 }
 0x23d   : > { %v1467_v56 = vadd.f32 %v1466_v22, %v1465_v50  ;;  %1589 = vlog2.f32 %v1118_v58  ;;  %1526 = vmatpush3.msra.mxu1 %v1173_v49  ;;  %v1172_v50 = vld [vmem:[#allocation6 + $0x8] sm:$0xff]  ;;  %v1171_v22 = vld [vmem:[#allocation6] sm:$0xff] }
 0x23e   : > { %v1468_v52 = vpop.f32.mrf.mxu0  ;;  %1527 = vmatprep.subr.mxu1 %v1172_v50 }
 0x23f   : > { %v1119_v62 = vmax.f32 %v1467_v56, 1e-10  ;;  %1528 = vmatpush3.msra.mxu1 %v1172_v50 }
 0x240   : > { %v1469_v53 = vpop.f32.mrf.mxu0  ;;  %1529 = vmatprep.subr.mxu1 %v1171_v22 }
 0x241   : > { %v1470_v54 = vadd.f32 %v1469_v53, %v1468_v52  ;;  %1530 = vmatpush3.msra.mxu1 %v1171_v22 }
 0x242   : > { %v1471_v57 = vpop.f32.mrf.mxu0 }
 0x243   : > { %v1120_v59 = vmax.f32 %v1470_v54, 1e-10 }
 0x244   : > { %v1472_v60 = vpop.f32.mrf.mxu0 }
 0x245   : > { %v1473_v61 = vadd.f32 %v1472_v60, %v1471_v57  ;;  %1591 = vlog2.f32 %v1120_v59 }
 0x246   : > { %v1474_v63 = vpop.f32.mrf.mxu0  ;;  %v1588_v4 = vpop.eup %1587 }
 0x247   : > { %v1121_v0 = vmax.f32 %v1473_v61, 1e-10  ;;  %v1124_v24 = vmul.f32 0.6931472, %v1588_v4 }
 0x248   : > { %v1475_v1 = vpop.f32.mrf.mxu0 }
 0x249   : > { %1593 = vlog2.f32 %v1121_v0  ;;  %v1476_v2 = vadd.f32 %v1475_v1, %v1474_v63  ;;  %v1135_v12 = vmul.f32 0.4342945, %v1124_v24 }
 0x24a   : > { %1595 = vlog2.f32 %v1119_v62  ;;  %v1590_v5 = vpop.eup %1589 }
 0x24b   : > { %v1122_v3 = vmax.f32 %v1476_v2, 1e-10  ;;  %v1126_v10 = vmul.f32 0.6931472, %v1590_v5  ;;  %v1896_v32 = vmul.f32 10.0, %v1135_v12 }
 0x24d   : > { %1597 = vlog2.f32 %v1122_v3  ;;  %v1136_v13 = vmul.f32 0.4342945, %v1126_v10 }
 0x24f   : > { %v1898_v33 = vmul.f32 10.0, %v1136_v13 }
 0x252   : > { %v1592_v6 = vpop.eup %1591 }
 0x253   : > { %v1130_v25 = vmul.f32 0.6931472, %v1592_v6 }
 0x255   : > { %v1138_v29 = vmul.f32 0.4342945, %v1130_v25 }
 0x256   : > { %v1594_v7 = vpop.eup %1593 }
 0x257   : > { %v1596_v8 = vpop.eup %1595  ;;  %v1132_v9 = vmul.f32 0.6931472, %v1594_v7  ;;  %v1900_v34 = vmul.f32 10.0, %v1138_v29 }
 0x258   : > { %v1128_v27 = vmul.f32 0.6931472, %v1596_v8 }
 0x259   : > { %v1139_v11 = vmul.f32 0.4342945, %v1132_v9 }
 0x25a   : > { %v1598_v26 = vpop.eup %1597  ;;  %v1137_v31 = vmul.f32 0.4342945, %v1128_v27 }
 0x25b   : > { %v1134_v28 = vmul.f32 0.6931472, %v1598_v26  ;;  %v1892_v14 = vmul.f32 10.0, %v1139_v11 }
 0x25c   : > { %v1903_v36 = vmul.f32 10.0, %v1137_v31 }
 0x25d   : > { %v1140_v30 = vmul.f32 0.4342945, %v1134_v28  ;;  %v1147_v37 = vmax.f32 %v1896_v32, %v1892_v14 }
 0x25e   : > { %v1152_v38 = vmax.f32 %v1903_v36, %v1900_v34 }
 0x25f   : > { %v1894_v15 = vmul.f32 10.0, %v1140_v30 }
 0x261   : > { %v1149_v35 = vsel %vm1148_vm1, %v1894_v15, -inf }
 0x262   : > { %v1150_v16 = vmax.f32 %v1898_v33, %v1149_v35 }
 0x264   : > { %v1151_v17 = vmax.f32 %v1147_v37, %v1150_v16 }
 0x266   : > { %v1153_v39 = vmax.f32 %v1151_v17, %v1152_v38 }
 0x268   : > { %1154 = vmax.xlane.f32.xlu0 %v1153_v39 }
 0x2f1   : > { %v1155_v51 = vpop.xlane.xlu0 %1154 }
 0x2f2   : > { %v1156_v52 = vrot.slane %v1155_v51, 4 }
 0x2f4   : > { %v1157_v23 = vmax.f32 %v1155_v51, %v1156_v52 }
 0x2f6   : > { %v1158_v53 = vrot.slane %v1157_v23, 2 }
 0x2f8   : > { %v1159_v54 = vmax.f32 %v1157_v23, %v1158_v53 }
 0x2fa   : > { %v1160_v55 = vrot.slane %v1159_v54, 1 }
 0x2fc   : > { %v1161_v56 = vmax.f32 %v1159_v54, %v1160_v55 }
 0x2fe   : > { %1542 = vpush %v1161_v56 }
 0x32f   : > { %s1543_s25 = spop %1542 }
 0x330   : > { %s1424_s26 = sadd.f32 -80.0, %s1543_s25 }
 0x332   : > { %v1164_v57 = vstv %s1424_s26 }
 0x333   : > { %v1166_v58 = vmax.f32 %v1898_v33, %v1164_v57  ;;  %v1165_v59 = vmax.f32 %v1896_v32, %v1164_v57  ;;  %v1167_v60 = vmax.f32 %v1903_v36, %v1164_v57  ;;  %v1168_v61 = vmax.f32 %v1900_v34, %v1164_v57 }
 0x334   : > { %v1169_v62 = vmax.f32 %v1892_v14, %v1164_v57  ;;  %v1170_v63 = vmax.f32 %v1894_v15, %v1164_v57 }
 0x335   : > { %1531 = vmatprep.mubr.f32.mxu1 %v1165_v59 }
 0x336   : > { %1532 = vmatmul.mubr.f32.vlgmr.msra.gmra.mxu1 %v1166_v58 }
 0x337   : > { %1534 = vmatprep.mubr.f32.mxu1 %v1167_v60 }
 0x33a   : > { %1535 = vmatmul.mubr.f32.gmra.mxu1 %v1168_v61 }
 0x33b   : > { %1537 = vmatprep.mubr.f32.mxu1 %v1169_v62 }
 0x33e   : > { %1538 = vmatmul.mubr.f32.gmra.mxu1 %v1170_v63 }
 0x3f6   : > { %v1533_v0 = vpop.f32.mrf.mxu1 }
 0x3f7   : > { %1283 = vst [vmem:[%s288_s30 + $0x8] sm:$0xff] %v1533_v0 }
 0x3f8   : > { %v1253_v1 = vpop.f32.mrf.mxu1 }
 0x3f9   : > { %1282 = vst [vmem:[%s288_s30] sm:$0xff] %v1253_v1 }
 0x3fa   : > { %v1536_v2 = vpop.f32.mrf.mxu1 }
 0x3fb   : > { %1285 = vst [vmem:[%s288_s30 + $0x18] sm:$0xff] %v1536_v2 }
 0x3fc   : > { %v1263_v3 = vpop.f32.mrf.mxu1 }
 0x3fd   : > { %1284 = vst [vmem:[%s288_s30 + $0x10] sm:$0xff] %v1263_v3 }
 0x3fe   : > { %v1539_v4 = vpop.f32.mrf.mxu1 }
 0x3ff   : > { %1287 = vst [vmem:[%s288_s30 + $0x28] sm:$0x1] %v1539_v4 }
 0x400   : > { %v1273_v5 = vpop.f32.mrf.mxu1 }
 0x401   : > { %1286 = vst [vmem:[%s288_s30 + $0x20] sm:$0xff] %v1273_v5 }
 0x402 PF: > { %s17_s18 = sadd.s32 1, %s1691_s18  }
 0x403   : > { %p14_p3 = scmp.ge.s32.totalorder %s17_s18, 4  }
 0x405   :  { %16 = sbr.rel (!%p14_p3) target bundleno = 2 (0x2), region = 86 }
 0x40a   :  { %1309 = vsyncpa [#allocation3], 1 }
 0x40b   :  { %1311 = vsyncpa [#allocation3 + $0x1], 1 }
 0x40c   :  { %1312 = vsyncpa [#allocation5], 1 }

// kernel: cnn_mfcc_forward.5
= control target key start
LH: loop header
LB: loop body
LE: loop exit
PB: predicated region body
PF: predicated region fallthrough
CT: control target
= control target key end

     0   :  { %s860_s15 = smov 0   ;;  %s947_s0 = inlined_call_operand.vmem [shape: f32[2,4,64,81], index: 0, kind: input, shape index: {}]   ;;  %s948_s1 = inlined_call_operand.vmem [shape: f32[16,64], index: 1, kind: input, shape index: {}]   ;;  %s949_s2 = inlined_call_operand.vmem [shape: f32[16,1], index: 2, kind: input, shape index: {}]   ;;  %s950_s3 = inlined_call_operand.vmem [shape: f32[16,1], index: 3, kind: input, shape index: {}]   ;;  %s951_s4 = inlined_call_operand.vmem [shape: f32[2,16,81], index: 4, kind: output, shape index: {}]  }
   0x1 LB: > { %s654_s16 = sadd.s32 4294967295, %s832_s15   ;;  %p658_p0 = scmp.ge.s32.totalorder %s832_s15, 1  ;;  %s832_s15 = sphi %s860_s15, %s14_s15  }
   0x2   : > { %p162_p1 = scmp.lt.s32.totalorder %s832_s15, 3 }
   0x4   : > { %p163_p2 = pnand %p658_p0, %p162_p1 }
   0x5   : > { %p188_p3 = scmp.lt.s32.totalorder (!%p163_p2), %s654_s16, 1 }
   0x6   : > { %166 = sbr.rel (%p163_p2) target bundleno = 256 (0x100), region = 36 }
   0xb   : > { %v871_v0 = vld [vmem:[%s948_s1] sm:$0xff]  ;;  %vm212_vm0 = vcmask 523264   ;;  %s953_s16 = smov (!%p188_p3, %s654_s16), 1  ;;  %v834_v3 = vmov 0   ;;  %v199_v20 = vld [vmem:[%s948_s1 + $0x8] sm:$0xff]  ;;  %vm596_vm1 = vcmask 662528  }
   0xc   : > { %v200_v1 = vld [vmem:[%s949_s2] sm:$0xff]  ;;  %755 = vmatprep.mubr.msk.f32.mxu0 %vm212_vm0, %v871_v0  ;;  %774 = vmatprep.mubr.msk.f32.mxu1 %vm212_vm0, %v871_v0  ;;  %s697_s23 = sshll.u32 %s953_s16, 8  ;;  %v201_v37 = vld [vmem:[%s949_s2 + $0x8] sm:$0xff]  ;;  %s698_s7 = sshll.u32 %s953_s16, 4 }
   0xd   : > { %v202_v2 = vld [vmem:[%s950_s3] sm:$0xff]  ;;  %824 = vset.pattern.permute.xlu0 %v834_v3  ;;  %825 = vset.pattern.permute.xlu1 %v834_v3  ;;  %s889_s26 = scalar_lea.vmem %s947_s0, %s697_s23  ;;  %v203_v38 = vld [vmem:[%s950_s3 + $0x8] sm:$0xff]  ;;  %s197_s10 = scalar_lea.vmem %s951_s4, %s698_s7 }
   0xe   : > { %296 = vperm.xlu0 %824, %v200_v1   ;;  %308 = vperm.xlu1 %825, %v202_v2   ;;  %v211_v4 = vld [vmem:[%s889_s26 + $0x38] sm:$0xff]  ;;  %v210_v6 = vld [vmem:[%s889_s26 + $0x30] sm:$0xff]  ;;  %v209_v8 = vld [vmem:[%s889_s26 + $0x28] sm:$0xff] }
   0xf   : > { %v672_v5 = vld [vmem:[%s889_s26 + $0x78] sm:$0xff]  ;;  %739 = vmatprep.subr.mxu0 %v211_v4  ;;  %v671_v7 = vld [vmem:[%s889_s26 + $0x70] sm:$0xff]  ;;  %v670_v9 = vld [vmem:[%s889_s26 + $0x68] sm:$0xff] }
  0x10   : > { %758 = vmatprep.subr.mxu1 %v672_v5  ;;  %740 = vmatpush3.msra.mxu0 %v211_v4  ;;  %v208_v10 = vld [vmem:[%s889_s26 + $0x20] sm:$0xff]  ;;  %v207_v12 = vld [vmem:[%s889_s26 + $0x18] sm:$0xff]  ;;  %v206_v14 = vld [vmem:[%s889_s26 + $0x10] sm:$0xff] }
  0x11   : > { %759 = vmatpush3.msra.mxu1 %v672_v5  ;;  %741 = vmatprep.subr.mxu0 %v210_v6  ;;  %v669_v11 = vld [vmem:[%s889_s26 + $0x60] sm:$0xff]  ;;  %v668_v13 = vld [vmem:[%s889_s26 + $0x58] sm:$0xff]  ;;  %v667_v15 = vld [vmem:[%s889_s26 + $0x50] sm:$0xff] }
  0x12   : > { %760 = vmatprep.subr.mxu1 %v671_v7  ;;  %742 = vmatpush3.msra.mxu0 %v210_v6  ;;  %v205_v16 = vld [vmem:[%s889_s26 + $0x8] sm:$0xff]  ;;  %v204_v18 = vld [vmem:[%s889_s26] sm:$0xff]  ;;  %v682_v21 = vld [vmem:[%s889_s26 + $0xb8] sm:$0xff] }
  0x13   : > { %761 = vmatpush3.msra.mxu1 %v671_v7  ;;  %743 = vmatprep.subr.mxu0 %v209_v8  ;;  %v666_v17 = vld [vmem:[%s889_s26 + $0x48] sm:$0xff]  ;;  %v665_v19 = vld [vmem:[%s889_s26 + $0x40] sm:$0xff]  ;;  %v692_v22 = vld [vmem:[%s889_s26 + $0xf8] sm:$0xff] }
  0x14   : > { %762 = vmatprep.subr.mxu1 %v670_v9  ;;  %744 = vmatpush3.msra.mxu0 %v209_v8  ;;  %v681_v23 = vld [vmem:[%s889_s26 + $0xb0] sm:$0xff]  ;;  %v680_v25 = vld [vmem:[%s889_s26 + $0xa8] sm:$0xff]  ;;  %v679_v27 = vld [vmem:[%s889_s26 + $0xa0] sm:$0xff] }
  0x15   : > { %763 = vmatpush3.msra.mxu1 %v670_v9  ;;  %745 = vmatprep.subr.mxu0 %v208_v10  ;;  %v691_v24 = vld [vmem:[%s889_s26 + $0xf0] sm:$0xff]  ;;  %v690_v26 = vld [vmem:[%s889_s26 + $0xe8] sm:$0xff]  ;;  %v689_v28 = vld [vmem:[%s889_s26 + $0xe0] sm:$0xff] }
  0x16   : > { %764 = vmatprep.subr.mxu1 %v669_v11  ;;  %746 = vmatpush3.msra.mxu0 %v208_v10  ;;  %v678_v29 = vld [vmem:[%s889_s26 + $0x98] sm:$0xff]  ;;  %v677_v31 = vld [vmem:[%s889_s26 + $0x90] sm:$0xff]  ;;  %v676_v33 = vld [vmem:[%s889_s26 + $0x88] sm:$0xff] }
  0x17   : > { %765 = vmatpush3.msra.mxu1 %v669_v11  ;;  %747 = vmatprep.subr.mxu0 %v207_v12  ;;  %v688_v30 = vld [vmem:[%s889_s26 + $0xd8] sm:$0xff]  ;;  %v687_v32 = vld [vmem:[%s889_s26 + $0xd0] sm:$0xff]  ;;  %v686_v34 = vld [vmem:[%s889_s26 + $0xc8] sm:$0xff] }
  0x18   : > { %766 = vmatprep.subr.mxu1 %v668_v13  ;;  %748 = vmatpush3.msra.mxu0 %v207_v12  ;;  %v675_v35 = vld [vmem:[%s889_s26 + $0x80] sm:$0xff] }
  0x19   : > { %767 = vmatpush3.msra.mxu1 %v668_v13  ;;  %749 = vmatprep.subr.mxu0 %v206_v14  ;;  %v685_v36 = vld [vmem:[%s889_s26 + $0xc0] sm:$0xff] }
  0x1a   : > { %768 = vmatprep.subr.mxu1 %v667_v15  ;;  %750 = vmatpush3.msra.mxu0 %v206_v14 }
  0x1b   : > { %769 = vmatpush3.msra.mxu1 %v667_v15  ;;  %751 = vmatprep.subr.mxu0 %v205_v16 }
  0x1c   : > { %770 = vmatprep.subr.mxu1 %v666_v17  ;;  %752 = vmatpush3.msra.mxu0 %v205_v16 }
  0x1d   : > { %771 = vmatpush3.msra.mxu1 %v666_v17  ;;  %753 = vmatprep.subr.mxu0 %v204_v18 }
  0x1e   : > { %772 = vmatprep.subr.mxu1 %v665_v19  ;;  %754 = vmatpush3.msra.mxu0 %v204_v18 }
  0x1f   : > { %773 = vmatpush3.msra.mxu1 %v665_v19  ;;  %756 = vmatmul.mubr.msk.f32.vlgmr.msra.gmra.mxu0 %vm212_vm0, %v199_v20 }
  0x20   : > { %775 = vmatmul.mubr.msk.f32.vlgmr.msra.gmra.mxu1 %vm212_vm0, %v199_v20  ;;  %777 = vmatprep.subr.mxu0 %v682_v21 }
  0x21   : > { %796 = vmatprep.subr.mxu1 %v692_v22  ;;  %778 = vmatpush3.msra.mxu0 %v682_v21 }
  0x22   : > { %797 = vmatpush3.msra.mxu1 %v692_v22  ;;  %779 = vmatprep.subr.mxu0 %v681_v23 }
  0x23   : > { %798 = vmatprep.subr.mxu1 %v691_v24  ;;  %780 = vmatpush3.msra.mxu0 %v681_v23 }
  0x24   : > { %799 = vmatpush3.msra.mxu1 %v691_v24  ;;  %781 = vmatprep.subr.mxu0 %v680_v25 }
  0x25   : > { %800 = vmatprep.subr.mxu1 %v690_v26  ;;  %782 = vmatpush3.msra.mxu0 %v680_v25 }
  0x26   : > { %801 = vmatpush3.msra.mxu1 %v690_v26  ;;  %783 = vmatprep.subr.mxu0 %v679_v27 }
  0x27   : > { %802 = vmatprep.subr.mxu1 %v689_v28  ;;  %784 = vmatpush3.msra.mxu0 %v679_v27 }
  0x28   : > { %803 = vmatpush3.msra.mxu1 %v689_v28  ;;  %785 = vmatprep.subr.mxu0 %v678_v29 }
  0x29   : > { %804 = vmatprep.subr.mxu1 %v688_v30  ;;  %786 = vmatpush3.msra.mxu0 %v678_v29 }
  0x2a   : > { %805 = vmatpush3.msra.mxu1 %v688_v30  ;;  %787 = vmatprep.subr.mxu0 %v677_v31 }
  0x2b   : > { %806 = vmatprep.subr.mxu1 %v687_v32  ;;  %788 = vmatpush3.msra.mxu0 %v677_v31 }
  0x2c   : > { %807 = vmatpush3.msra.mxu1 %v687_v32  ;;  %789 = vmatprep.subr.mxu0 %v676_v33 }
  0x2d   : > { %808 = vmatprep.subr.mxu1 %v686_v34  ;;  %790 = vmatpush3.msra.mxu0 %v676_v33 }
  0x2e   : > { %809 = vmatpush3.msra.mxu1 %v686_v34  ;;  %791 = vmatprep.subr.mxu0 %v675_v35 }
  0x2f   : > { %810 = vmatprep.subr.mxu1 %v685_v36  ;;  %792 = vmatpush3.msra.mxu0 %v675_v35 }
  0x30   : > { %793 = vmatprep.mubr.msk.f32.mxu0 %vm212_vm0, %v871_v0  ;;  %811 = vmatpush3.msra.mxu1 %v685_v36 }
  0x31   : > { %812 = vmatprep.mubr.msk.f32.mxu1 %vm212_vm0, %v871_v0  ;;  %794 = vmatmul.mubr.msk.f32.vlgmr.msra.gmra.mxu0 %vm212_vm0, %v199_v20 }
  0x32   : > { %813 = vmatmul.mubr.msk.f32.vlgmr.msra.gmra.mxu1 %vm212_vm0, %v199_v20  ;;  %301 = vperm.xlu0 %824, %v201_v37  }
  0x33   : > { %313 = vperm.xlu1 %825, %v203_v38  }
  0x89   : > { %v297_v39 = vpop.permute.xlu0 %296  ;;  %v309_v40 = vpop.permute.xlu1 %308 }
  0xad   : > { %v302_v43 = vpop.permute.xlu0 %301 }
  0xae   : > { %v314_v48 = vpop.permute.xlu1 %313 }
  0xdf   : > { %v757_v41 = vpop.f32.mrf.mxu0 }
  0xe0   : > { %v776_v42 = vpop.f32.mrf.mxu1  ;;  %v305_v46 = vmul.f32 %v757_v41, %v302_v43 }
  0xe1   : > { %v285_v44 = vpop.f32.mrf.mxu0  ;;  %v405_v47 = vmul.f32 %v776_v42, %v302_v43 }
  0xe2   : > { %v395_v45 = vpop.f32.mrf.mxu1  ;;  %v304_v49 = vmul.f32 %v297_v39, %v285_v44  ;;  %v317_v51 = vadd.f32 %v314_v48, %v305_v46 }
  0xe3   : > { %v404_v50 = vmul.f32 %v395_v45, %v297_v39  ;;  %v407_v52 = vadd.f32 %v405_v47, %v314_v48 }
  0xe4   : > { %v316_v53 = vadd.f32 %v309_v40, %v304_v49  ;;  %v319_v59 = vmax.f32 %v317_v51, 0.0 }
  0xe5   : > { %v406_v54 = vadd.f32 %v404_v50, %v309_v40  ;;  %v409_v60 = vmax.f32 %v407_v52, 0.0 }
  0xe6   : > { %v318_v3 = vmax.f32 %v316_v53, 0.0 }
  0xe7   : > { %v408_v4 = vmax.f32 %v406_v54, 0.0  ;;  %v411_v9 = vmax.f32 %v319_v59, %v409_v60 }
  0xe9   : > { %v410_v13 = vmax.f32 %v318_v3, %v408_v4 }
  0xf1   : > { %v795_v55 = vpop.f32.mrf.mxu0 }
  0xf2   : > { %v814_v56 = vpop.f32.mrf.mxu1  ;;  %v497_v57 = vmul.f32 %v795_v55, %v302_v43 }
  0xf3   : > { %v587_v58 = vmul.f32 %v814_v56, %v302_v43  ;;  %v487_v61 = vpop.f32.mrf.mxu0 }
  0xf4   : > { %v577_v62 = vpop.f32.mrf.mxu1  ;;  %v499_v63 = vadd.f32 %v497_v57, %v314_v48  ;;  %v496_v1 = vmul.f32 %v487_v61, %v297_v39 }
  0xf5   : > { %v589_v0 = vadd.f32 %v587_v58, %v314_v48  ;;  %v586_v2 = vmul.f32 %v577_v62, %v297_v39 }
  0xf6   : > { %v501_v5 = vmax.f32 %v499_v63, 0.0  ;;  %v498_v7 = vadd.f32 %v496_v1, %v309_v40 }
  0xf7   : > { %v591_v6 = vmax.f32 %v589_v0, 0.0  ;;  %v588_v8 = vadd.f32 %v586_v2, %v309_v40 }
  0xf8   : > { %v500_v11 = vmax.f32 %v498_v7, 0.0 }
  0xf9   : > { %v593_v10 = vmax.f32 %v501_v5, %v591_v6  ;;  %v590_v12 = vmax.f32 %v588_v8, 0.0 }
  0xfb   : > { %v595_v14 = vmax.f32 %v411_v9, %v593_v10  ;;  %v592_v15 = vmax.f32 %v500_v11, %v590_v12 }
  0xfd   : > { %598 = vst.msk [vmem:[%s197_s10 + $0x8] sm:$0xff] %vm596_vm1, %v595_v14  ;;  %v594_v16 = vmax.f32 %v410_v13, %v592_v15 }
  0xff   : > { %597 = vst.msk [vmem:[%s197_s10] sm:$0xff] %vm596_vm1, %v594_v16 }
 0x100 PF: > { %s14_s15 = sadd.s32 1, %s832_s15  }
 0x101   : > { %p11_p4 = scmp.ge.s32.totalorder %s14_s15, 4  }
 0x103   :  { %13 = sbr.rel (!%p11_p4) target bundleno = 1 (0x1), region = 69 }

// kernel: cnn_mfcc_forward.6
= control target key start
LH: loop header
LB: loop body
LE: loop exit
PB: predicated region body
PF: predicated region fallthrough
CT: control target
= control target key end

     0   :  { %s1681_s15 = smov 0   ;;  %s2228_s0 = inlined_call_operand.vmem [shape: f32[2,4,400,4], index: 0, kind: input, shape index: {}]   ;;  %s2229_s1 = inlined_call_operand.vmem [shape: f32[32,400], index: 1, kind: input, shape index: {}]   ;;  %s2230_s2 = inlined_call_operand.vmem [shape: f32[32,1], index: 2, kind: input, shape index: {}]   ;;  %s2231_s3 = inlined_call_operand.vmem [shape: f32[32,1], index: 3, kind: input, shape index: {}]   ;;  %s2232_s4 = inlined_call_operand.vmem [shape: f32[2,32,4], index: 4, kind: output, shape index: {}]  }
   0x1 LB: > { %s1278_s16 = sadd.s32 4294967295, %s1652_s15   ;;  %p1282_p0 = scmp.ge.s32.totalorder %s1652_s15, 1  ;;  %s1652_s15 = sphi %s1681_s15, %s14_s15  }
   0x2   : > { %p162_p1 = scmp.lt.s32.totalorder %s1652_s15, 3 }
   0x4   : > { %p163_p2 = pnand %p1282_p0, %p162_p1 }
   0x5   : > { %p188_p3 = scmp.lt.s32.totalorder (!%p163_p2), %s1278_s16, 1 }
   0x6   : > { %166 = sbr.rel (%p163_p2) target bundleno = 400 (0x190), region = 36 }
   0xb   : > { %v1692_v0 = vld [vmem:[%s2229_s1 + $0x8] sm:$0xff]  ;;  %v1697_v1 = vld [vmem:[%s2229_s1 + $0x18] sm:$0xff]  ;;  %vm272_vm0 = vcmask 130048   ;;  %v1654_v2 = vmov 0.0   ;;  %s2234_s16 = smov (!%p188_p3, %s1278_s16), 1  ;;  %v1655_v3 = vmov 0  }
   0xc   : > { %370 = vmatprep.subr.mxu1 %v1654_v2  ;;  %349 = vmatprep.mubr.f32.mxu0 %v1692_v0  ;;  %s1631_s21 = smul.u32 1600, %s2234_s16  ;;  %v214_v4 = vld [vmem:[%s2230_s2] sm:$0xff]  ;;  %v1791_v58 = vld [vmem:[%s2229_s1 + $0x10] sm:$0xff]  ;;  %vm1218_vm1 = vcmask 31744  }
   0xd   : > { %1286 = vmatprep.mubr.msk.f32.mxu1 %vm272_vm0, %v1697_v1  ;;  %1642 = vset.pattern.permute.xlu0 %v1655_v3  ;;  %v1780_v53 = vld [vmem:[%s2229_s1] sm:$0xff] }
   0xe   : > { %1643 = vset.pattern.permute.xlu1 %v1655_v3  ;;  %s1712_s26 = scalar_lea.vmem %s2228_s0, %s1631_s21  ;;  %457 = vperm.xlu0 %1642, %v214_v4  }
   0xf   : > { %v253_v5 = vld [vmem:[%s1712_s26 + $0xf8] sm:$0xff]  ;;  %v252_v8 = vld [vmem:[%s1712_s26 + $0xf0] sm:$0xff]  ;;  %v251_v11 = vld [vmem:[%s1712_s26 + $0xe8] sm:$0xff] }
  0x10   : > { %v269_v6 = vld [vmem:[%s1712_s26 + $0x178] sm:$0xff]  ;;  %1455 = vmatprep.subr.mxu0 %v253_v5  ;;  %v268_v9 = vld [vmem:[%s1712_s26 + $0x170] sm:$0xff]  ;;  %v267_v12 = vld [vmem:[%s1712_s26 + $0x168] sm:$0xff] }
  0x11   : > { %v237_v7 = vld [vmem:[%s1712_s26 + $0x78] sm:$0xff]  ;;  %371 = vmatpush1.msra.mxu1 %v269_v6  ;;  %v236_v10 = vld [vmem:[%s1712_s26 + $0x70] sm:$0xff]  ;;  %v235_v13 = vld [vmem:[%s1712_s26 + $0x68] sm:$0xff] }
  0x12   : > { %1456 = vmatpush3.msra.mxu0 %v237_v7  ;;  %372 = vmatprep.subr.mxu1 %v1654_v2  ;;  %v250_v14 = vld [vmem:[%s1712_s26 + $0xe0] sm:$0xff]  ;;  %v249_v17 = vld [vmem:[%s1712_s26 + $0xd8] sm:$0xff]  ;;  %v248_v20 = vld [vmem:[%s1712_s26 + $0xd0] sm:$0xff] }
  0x13   : > { %1457 = vmatprep.subr.mxu0 %v252_v8  ;;  %373 = vmatpush1.msra.mxu1 %v268_v9  ;;  %v266_v15 = vld [vmem:[%s1712_s26 + $0x160] sm:$0xff]  ;;  %v265_v18 = vld [vmem:[%s1712_s26 + $0x158] sm:$0xff]  ;;  %v264_v21 = vld [vmem:[%s1712_s26 + $0x150] sm:$0xff] }
  0x14   : > { %1458 = vmatpush3.msra.mxu0 %v236_v10  ;;  %374 = vmatprep.subr.mxu1 %v1654_v2  ;;  %v234_v16 = vld [vmem:[%s1712_s26 + $0x60] sm:$0xff]  ;;  %v233_v19 = vld [vmem:[%s1712_s26 + $0x58] sm:$0xff]  ;;  %v232_v22 = vld [vmem:[%s1712_s26 + $0x50] sm:$0xff] }
  0x15   : > { %1459 = vmatprep.subr.mxu0 %v251_v11  ;;  %375 = vmatpush1.msra.mxu1 %v267_v12  ;;  %v247_v23 = vld [vmem:[%s1712_s26 + $0xc8] sm:$0xff]  ;;  %v246_v26 = vld [vmem:[%s1712_s26 + $0xc0] sm:$0xff]  ;;  %v245_v29 = vld [vmem:[%s1712_s26 + $0xb8] sm:$0xff] }
  0x16   : > { %1460 = vmatpush3.msra.mxu0 %v235_v13  ;;  %376 = vmatprep.subr.mxu1 %v1654_v2  ;;  %v263_v24 = vld [vmem:[%s1712_s26 + $0x148] sm:$0xff]  ;;  %v262_v27 = vld [vmem:[%s1712_s26 + $0x140] sm:$0xff]  ;;  %v261_v30 = vld [vmem:[%s1712_s26 + $0x138] sm:$0xff] }
  0x17   : > { %1461 = vmatprep.subr.mxu0 %v250_v14  ;;  %377 = vmatpush1.msra.mxu1 %v266_v15  ;;  %v231_v25 = vld [vmem:[%s1712_s26 + $0x48] sm:$0xff]  ;;  %v230_v28 = vld [vmem:[%s1712_s26 + $0x40] sm:$0xff]  ;;  %v229_v31 = vld [vmem:[%s1712_s26 + $0x38] sm:$0xff] }
  0x18   : > { %1462 = vmatpush3.msra.mxu0 %v234_v16  ;;  %378 = vmatprep.subr.mxu1 %v1654_v2  ;;  %v244_v32 = vld [vmem:[%s1712_s26 + $0xb0] sm:$0xff]  ;;  %v243_v35 = vld [vmem:[%s1712_s26 + $0xa8] sm:$0xff]  ;;  %v242_v38 = vld [vmem:[%s1712_s26 + $0xa0] sm:$0xff] }
  0x19   : > { %1463 = vmatprep.subr.mxu0 %v249_v17  ;;  %379 = vmatpush1.msra.mxu1 %v265_v18  ;;  %v260_v33 = vld [vmem:[%s1712_s26 + $0x130] sm:$0xff]  ;;  %v259_v36 = vld [vmem:[%s1712_s26 + $0x128] sm:$0xff]  ;;  %v258_v39 = vld [vmem:[%s1712_s26 + $0x120] sm:$0xff] }
  0x1a   : > { %1464 = vmatpush3.msra.mxu0 %v233_v19  ;;  %380 = vmatprep.subr.mxu1 %v1654_v2  ;;  %v228_v34 = vld [vmem:[%s1712_s26 + $0x30] sm:$0xff]  ;;  %v227_v37 = vld [vmem:[%s1712_s26 + $0x28] sm:$0xff]  ;;  %v226_v40 = vld [vmem:[%s1712_s26 + $0x20] sm:$0xff] }
  0x1b   : > { %1465 = vmatprep.subr.mxu0 %v248_v20  ;;  %381 = vmatpush1.msra.mxu1 %v264_v21  ;;  %v241_v41 = vld [vmem:[%s1712_s26 + $0x98] sm:$0xff]  ;;  %v240_v44 = vld [vmem:[%s1712_s26 + $0x90] sm:$0xff]  ;;  %v239_v47 = vld [vmem:[%s1712_s26 + $0x88] sm:$0xff] }
  0x1c   : > { %1466 = vmatpush3.msra.mxu0 %v232_v22  ;;  %382 = vmatprep.subr.mxu1 %v1654_v2  ;;  %v257_v42 = vld [vmem:[%s1712_s26 + $0x118] sm:$0xff]  ;;  %v256_v45 = vld [vmem:[%s1712_s26 + $0x110] sm:$0xff]  ;;  %v255_v48 = vld [vmem:[%s1712_s26 + $0x108] sm:$0xff] }
  0x1d   : > { %1467 = vmatprep.subr.mxu0 %v247_v23  ;;  %383 = vmatpush1.msra.mxu1 %v263_v24  ;;  %v225_v43 = vld [vmem:[%s1712_s26 + $0x18] sm:$0xff]  ;;  %v224_v46 = vld [vmem:[%s1712_s26 + $0x10] sm:$0xff]  ;;  %v223_v49 = vld [vmem:[%s1712_s26 + $0x8] sm:$0xff] }
  0x1e   : > { %1468 = vmatpush3.msra.mxu0 %v231_v25  ;;  %384 = vmatprep.subr.mxu1 %v1654_v2  ;;  %v238_v50 = vld [vmem:[%s1712_s26 + $0x80] sm:$0xff]  ;;  %v271_v54 = vld [vmem:[%s1712_s26 + $0x188] sm:$0xff]  ;;  %v1319_v63 = vld [vmem:[%s1712_s26 + $0x278] sm:$0xff] }
  0x1f   : > { %1469 = vmatprep.subr.mxu0 %v246_v26  ;;  %385 = vmatpush1.msra.mxu1 %v262_v27  ;;  %v254_v51 = vld [vmem:[%s1712_s26 + $0x100] sm:$0xff]  ;;  %v1321_v55 = vld [vmem:[%s1712_s26 + $0x288] sm:$0xff]  ;;  %v1303_v3 = vld [vmem:[%s1712_s26 + $0x1f8] sm:$0xff] }
  0x20   : > { %1470 = vmatpush3.msra.mxu0 %v230_v28  ;;  %386 = vmatprep.subr.mxu1 %v1654_v2  ;;  %v222_v52 = vld [vmem:[%s1712_s26] sm:$0xff]  ;;  %v1305_v57 = vld [vmem:[%s1712_s26 + $0x208] sm:$0xff]  ;;  %v1335_v4 = vld [vmem:[%s1712_s26 + $0x2f8] sm:$0xff] }
  0x21   : > { %1471 = vmatprep.subr.mxu0 %v245_v29  ;;  %387 = vmatpush1.msra.mxu1 %v261_v30  ;;  %v270_v56 = vld [vmem:[%s1712_s26 + $0x180] sm:$0xff]  ;;  %v1337_v59 = vld [vmem:[%s1712_s26 + $0x308] sm:$0xff]  ;;  %v1318_v5 = vld [vmem:[%s1712_s26 + $0x270] sm:$0xff] }
  0x22   : > { %1472 = vmatpush3.msra.mxu0 %v229_v31  ;;  %388 = vmatprep.subr.mxu1 %v1654_v2  ;;  %v1320_v60 = vld [vmem:[%s1712_s26 + $0x280] sm:$0xff]  ;;  %v1302_v6 = vld [vmem:[%s1712_s26 + $0x1f0] sm:$0xff]  ;;  %v1317_v8 = vld [vmem:[%s1712_s26 + $0x268] sm:$0xff] }
  0x23   : > { %1473 = vmatprep.subr.mxu0 %v244_v32  ;;  %389 = vmatpush1.msra.mxu1 %v260_v33  ;;  %v1304_v61 = vld [vmem:[%s1712_s26 + $0x200] sm:$0xff]  ;;  %v1334_v7 = vld [vmem:[%s1712_s26 + $0x2f0] sm:$0xff]  ;;  %v1301_v9 = vld [vmem:[%s1712_s26 + $0x1e8] sm:$0xff] }
  0x24   : > { %1474 = vmatpush3.msra.mxu0 %v228_v34  ;;  %390 = vmatprep.subr.mxu1 %v1654_v2  ;;  %v1336_v62 = vld [vmem:[%s1712_s26 + $0x300] sm:$0xff]  ;;  %v1333_v10 = vld [vmem:[%s1712_s26 + $0x2e8] sm:$0xff]  ;;  %v1315_v14 = vld [vmem:[%s1712_s26 + $0x258] sm:$0xff] }
  0x25   : > { %1475 = vmatprep.subr.mxu0 %v243_v35  ;;  %391 = vmatpush1.msra.mxu1 %v259_v36  ;;  %v1316_v11 = vld [vmem:[%s1712_s26 + $0x260] sm:$0xff]  ;;  %v1299_v15 = vld [vmem:[%s1712_s26 + $0x1d8] sm:$0xff]  ;;  %v1314_v17 = vld [vmem:[%s1712_s26 + $0x250] sm:$0xff] }
  0x26   : > { %1476 = vmatpush3.msra.mxu0 %v227_v37  ;;  %392 = vmatprep.subr.mxu1 %v1654_v2  ;;  %v1300_v12 = vld [vmem:[%s1712_s26 + $0x1e0] sm:$0xff]  ;;  %v1331_v16 = vld [vmem:[%s1712_s26 + $0x2d8] sm:$0xff]  ;;  %v1298_v18 = vld [vmem:[%s1712_s26 + $0x1d0] sm:$0xff] }
  0x27   : > { %1477 = vmatprep.subr.mxu0 %v242_v38  ;;  %393 = vmatpush1.msra.mxu1 %v258_v39  ;;  %v1332_v13 = vld [vmem:[%s1712_s26 + $0x2e0] sm:$0xff]  ;;  %v1330_v19 = vld [vmem:[%s1712_s26 + $0x2d0] sm:$0xff]  ;;  %v1313_v20 = vld [vmem:[%s1712_s26 + $0x248] sm:$0xff] }
  0x28   : > { %1478 = vmatpush3.msra.mxu0 %v226_v40  ;;  %394 = vmatprep.subr.mxu1 %v1654_v2  ;;  %v1297_v21 = vld [vmem:[%s1712_s26 + $0x1c8] sm:$0xff]  ;;  %v1312_v23 = vld [vmem:[%s1712_s26 + $0x240] sm:$0xff]  ;;  %v1311_v28 = vld [vmem:[%s1712_s26 + $0x238] sm:$0xff] }
  0x29   : > { %1479 = vmatprep.subr.mxu0 %v241_v41  ;;  %395 = vmatpush1.msra.mxu1 %v257_v42  ;;  %v1329_v22 = vld [vmem:[%s1712_s26 + $0x2c8] sm:$0xff]  ;;  %v1296_v25 = vld [vmem:[%s1712_s26 + $0x1c0] sm:$0xff]  ;;  %v1295_v29 = vld [vmem:[%s1712_s26 + $0x1b8] sm:$0xff] }
  0x2a   : > { %1480 = vmatpush3.msra.mxu0 %v225_v43  ;;  %396 = vmatprep.subr.mxu1 %v1654_v2  ;;  %v1832_v24 = vld [vmem:[%s2229_s1 + $0x28] sm:$0xff]  ;;  %v1328_v26 = vld [vmem:[%s1712_s26 + $0x2c0] sm:$0xff]  ;;  %v1327_v30 = vld [vmem:[%s1712_s26 + $0x2b8] sm:$0xff] }
  0x2b   : > { %1481 = vmatprep.subr.mxu0 %v240_v44  ;;  %397 = vmatpush1.msra.mxu1 %v256_v45  ;;  %v1840_v27 = vld [vmem:[%s2229_s1 + $0x20] sm:$0xff]  ;;  %v1850_v31 = vld [vmem:[%s2229_s1 + $0x38] sm:$0xff]  ;;  %v1310_v32 = vld [vmem:[%s1712_s26 + $0x230] sm:$0xff] }
  0x2c   : > { %1482 = vmatpush3.msra.mxu0 %v224_v46  ;;  %398 = vmatprep.subr.mxu1 %v1654_v2  ;;  %v1858_v33 = vld [vmem:[%s2229_s1 + $0x48] sm:$0xff]  ;;  %v1863_v34 = vld [vmem:[%s2229_s1 + $0x30] sm:$0xff]  ;;  %v1873_v37 = vld [vmem:[%s2229_s1 + $0x40] sm:$0xff] }
  0x2d   : > { %1483 = vmatprep.subr.mxu0 %v239_v47  ;;  %399 = vmatpush1.msra.mxu1 %v255_v48  ;;  %v1294_v35 = vld [vmem:[%s1712_s26 + $0x1b0] sm:$0xff]  ;;  %v1309_v38 = vld [vmem:[%s1712_s26 + $0x228] sm:$0xff]  ;;  %v1883_v41 = vld [vmem:[%s2229_s1 + $0x58] sm:$0xff] }
  0x2e   : > { %1484 = vmatpush3.msra.mxu0 %v223_v49  ;;  %400 = vmatprep.subr.mxu1 %v1654_v2  ;;  %v1326_v36 = vld [vmem:[%s1712_s26 + $0x2b0] sm:$0xff]  ;;  %v1293_v39 = vld [vmem:[%s1712_s26 + $0x1a8] sm:$0xff]  ;;  %v1308_v42 = vld [vmem:[%s1712_s26 + $0x220] sm:$0xff] }
  0x2f   : > { %1485 = vmatprep.subr.mxu0 %v238_v50  ;;  %401 = vmatpush1.msra.mxu1 %v254_v51  ;;  %v1325_v40 = vld [vmem:[%s1712_s26 + $0x2a8] sm:$0xff]  ;;  %v1896_v44 = vld [vmem:[%s2229_s1 + $0x50] sm:$0xff]  ;;  %v1292_v45 = vld [vmem:[%s1712_s26 + $0x1a0] sm:$0xff] }
  0x30   : > { %1486 = vmatpush3.msra.mxu0 %v222_v52  ;;  %430 = vmatprep.subr.mxu1 %v1654_v2  ;;  %v1891_v43 = vld [vmem:[%s2229_s1 + $0x68] sm:$0xff]  ;;  %v1324_v46 = vld [vmem:[%s1712_s26 + $0x2a0] sm:$0xff]  ;;  %v1307_v48 = vld [vmem:[%s1712_s26 + $0x218] sm:$0xff] }
  0x31   : > { %350 = vmatmul.mubr.f32.vlgmr.msra.gmra.mxu0 %v1780_v53  ;;  %431 = vmatpush2.msra.mxu1 %v271_v54  ;;  %v1906_v47 = vld [vmem:[%s2229_s1 + $0x60] sm:$0xff]  ;;  %v1291_v49 = vld [vmem:[%s1712_s26 + $0x198] sm:$0xff]  ;;  %v1306_v52 = vld [vmem:[%s1712_s26 + $0x210] sm:$0xff] }
  0x32   : > { %432 = vmatprep.subr.mxu1 %v1654_v2  ;;  %1499 = vmatprep.subr.mxu0 %v1321_v55  ;;  %v1323_v50 = vld [vmem:[%s1712_s26 + $0x298] sm:$0xff]  ;;  %v1924_v54 = vld [vmem:[%s2229_s1 + $0x70] sm:$0xff] }
  0x33   : > { %433 = vmatpush2.msra.mxu1 %v270_v56  ;;  %1500 = vmatpush3.msra.mxu0 %v1305_v57  ;;  %v1916_v51 = vld [vmem:[%s2229_s1 + $0x78] sm:$0xff]  ;;  %v1290_v55 = vld [vmem:[%s1712_s26 + $0x190] sm:$0xff] }
  0x34   : > { %435 = vmatmul.mubr.f32.vlgmr.msra.gmra.mxu1 %v1791_v58  ;;  %643 = vmatprep.subr.mxu1 %v1654_v2  ;;  %v1322_v56 = vld [vmem:[%s1712_s26 + $0x290] sm:$0xff]  ;;  %v1339_v57 = vld [vmem:[%s1712_s26 + $0x318] sm:$0xff] }
  0x35   : > { %644 = vmatpush1.msra.mxu1 %v1337_v59  ;;  %1501 = vmatprep.subr.mxu0 %v1320_v60  ;;  %v1338_v59 = vld [vmem:[%s1712_s26 + $0x310] sm:$0xff]  ;;  %v1375_v60 = vld [vmem:[%s1712_s26 + $0x418] sm:$0xff] }
  0x36   : > { %645 = vmatprep.subr.mxu1 %v1654_v2  ;;  %1502 = vmatpush3.msra.mxu0 %v1304_v61  ;;  %v1359_v61 = vld [vmem:[%s1712_s26 + $0x398] sm:$0xff] }
  0x37   : > { %646 = vmatpush1.msra.mxu1 %v1336_v62  ;;  %1503 = vmatprep.subr.mxu0 %v1319_v63  ;;  %v1391_v62 = vld [vmem:[%s1712_s26 + $0x498] sm:$0xff]  ;;  %v1374_v63 = vld [vmem:[%s1712_s26 + $0x410] sm:$0xff] }
  0x38   : > { %647 = vmatprep.subr.mxu1 %v1654_v2  ;;  %1504 = vmatpush3.msra.mxu0 %v1303_v3  ;;  %v1390_v3 = vld [vmem:[%s1712_s26 + $0x490] sm:$0xff] }
  0x39   : > { %648 = vmatpush1.msra.mxu1 %v1335_v4  ;;  %1505 = vmatprep.subr.mxu0 %v1318_v5  ;;  %v1358_v4 = vld [vmem:[%s1712_s26 + $0x390] sm:$0xff]  ;;  %v1373_v5 = vld [vmem:[%s1712_s26 + $0x408] sm:$0xff] }
  0x3a   : > { %649 = vmatprep.subr.mxu1 %v1654_v2  ;;  %1506 = vmatpush3.msra.mxu0 %v1302_v6  ;;  %v1389_v6 = vld [vmem:[%s1712_s26 + $0x488] sm:$0xff] }
  0x3b   : > { %650 = vmatpush1.msra.mxu1 %v1334_v7  ;;  %1507 = vmatprep.subr.mxu0 %v1317_v8  ;;  %v1357_v7 = vld [vmem:[%s1712_s26 + $0x388] sm:$0xff]  ;;  %v1372_v8 = vld [vmem:[%s1712_s26 + $0x400] sm:$0xff] }
  0x3c   : > { %651 = vmatprep.subr.mxu1 %v1654_v2  ;;  %1508 = vmatpush3.msra.mxu0 %v1301_v9  ;;  %v1388_v9 = vld [vmem:[%s1712_s26 + $0x480] sm:$0xff] }
  0x3d   : > { %652 = vmatpush1.msra.mxu1 %v1333_v10  ;;  %1509 = vmatprep.subr.mxu0 %v1316_v11  ;;  %v1356_v10 = vld [vmem:[%s1712_s26 + $0x380] sm:$0xff]  ;;  %v1371_v11 = vld [vmem:[%s1712_s26 + $0x3f8] sm:$0xff] }
  0x3e   : > { %653 = vmatprep.subr.mxu1 %v1654_v2  ;;  %1510 = vmatpush3.msra.mxu0 %v1300_v12  ;;  %v1387_v12 = vld [vmem:[%s1712_s26 + $0x478] sm:$0xff] }
  0x3f   : > { %654 = vmatpush1.msra.mxu1 %v1332_v13  ;;  %1511 = vmatprep.subr.mxu0 %v1315_v14  ;;  %v1355_v13 = vld [vmem:[%s1712_s26 + $0x378] sm:$0xff]  ;;  %v1370_v14 = vld [vmem:[%s1712_s26 + $0x3f0] sm:$0xff] }
  0x40   : > { %655 = vmatprep.subr.mxu1 %v1654_v2  ;;  %1512 = vmatpush3.msra.mxu0 %v1299_v15  ;;  %v1386_v15 = vld [vmem:[%s1712_s26 + $0x470] sm:$0xff] }
  0x41   : > { %656 = vmatpush1.msra.mxu1 %v1331_v16  ;;  %1513 = vmatprep.subr.mxu0 %v1314_v17  ;;  %v1354_v16 = vld [vmem:[%s1712_s26 + $0x370] sm:$0xff]  ;;  %v1369_v17 = vld [vmem:[%s1712_s26 + $0x3e8] sm:$0xff] }
  0x42   : > { %657 = vmatprep.subr.mxu1 %v1654_v2  ;;  %1514 = vmatpush3.msra.mxu0 %v1298_v18  ;;  %v1385_v18 = vld [vmem:[%s1712_s26 + $0x468] sm:$0xff] }
  0x43   : > { %658 = vmatpush1.msra.mxu1 %v1330_v19  ;;  %1515 = vmatprep.subr.mxu0 %v1313_v20  ;;  %v1353_v19 = vld [vmem:[%s1712_s26 + $0x368] sm:$0xff]  ;;  %v1368_v20 = vld [vmem:[%s1712_s26 + $0x3e0] sm:$0xff] }
  0x44   : > { %659 = vmatprep.subr.mxu1 %v1654_v2  ;;  %1516 = vmatpush3.msra.mxu0 %v1297_v21  ;;  %v1384_v21 = vld [vmem:[%s1712_s26 + $0x460] sm:$0xff] }
  0x45   : > { %660 = vmatpush1.msra.mxu1 %v1329_v22  ;;  %1517 = vmatprep.subr.mxu0 %v1312_v23  ;;  %v1352_v22 = vld [vmem:[%s1712_s26 + $0x360] sm:$0xff]  ;;  %v1367_v23 = vld [vmem:[%s1712_s26 + $0x3d8] sm:$0xff] }
  0x46   : > { %661 = vmatprep.subr.mxu1 %v1654_v2  ;;  %354 = vmatprep.mubr.f32.mxu0 %v1832_v24 }
  0x47   : > { %1518 = vmatpush3.msra.mxu0 %v1296_v25  ;;  %662 = vmatpush1.msra.mxu1 %v1328_v26  ;;  %v1383_v25 = vld [vmem:[%s1712_s26 + $0x458] sm:$0xff] }
  0x48   : > { %355 = vmatmul.mubr.f32.gmra.mxu0 %v1840_v27  ;;  %1519 = vmatprep.subr.mxu0 %v1311_v28  ;;  %v1351_v26 = vld [vmem:[%s1712_s26 + $0x358] sm:$0xff]  ;;  %v1366_v28 = vld [vmem:[%s1712_s26 + $0x3d0] sm:$0xff] }
  0x49   : > { %663 = vmatprep.subr.mxu1 %v1654_v2  ;;  %1520 = vmatpush3.msra.mxu0 %v1295_v29  ;;  %v1382_v29 = vld [vmem:[%s1712_s26 + $0x450] sm:$0xff] }
  0x4a   : > { %664 = vmatpush1.msra.mxu1 %v1327_v30  ;;  %1287 = vmatprep.mubr.msk.f32.mxu1 %vm272_vm0, %v1850_v31  ;;  %v1350_v30 = vld [vmem:[%s1712_s26 + $0x350] sm:$0xff] }
  0x4b   : > { %1521 = vmatprep.subr.mxu0 %v1310_v32  ;;  %665 = vmatprep.subr.mxu1 %v1654_v2  ;;  %v1365_v32 = vld [vmem:[%s1712_s26 + $0x3c8] sm:$0xff] }
  0x4c   : > { %359 = vmatprep.mubr.f32.mxu0 %v1858_v33  ;;  %440 = vmatmul.mubr.f32.gmra.mxu1 %v1863_v34 }
  0x4d   : > { %1522 = vmatpush3.msra.mxu0 %v1294_v35  ;;  %666 = vmatpush1.msra.mxu1 %v1326_v36  ;;  %v1381_v35 = vld [vmem:[%s1712_s26 + $0x448] sm:$0xff] }
  0x4e   : > { %360 = vmatmul.mubr.f32.gmra.mxu0 %v1873_v37  ;;  %1523 = vmatprep.subr.mxu0 %v1309_v38  ;;  %v1349_v36 = vld [vmem:[%s1712_s26 + $0x348] sm:$0xff]  ;;  %v1364_v38 = vld [vmem:[%s1712_s26 + $0x3c0] sm:$0xff] }
  0x4f   : > { %667 = vmatprep.subr.mxu1 %v1654_v2  ;;  %1524 = vmatpush3.msra.mxu0 %v1293_v39  ;;  %v1380_v39 = vld [vmem:[%s1712_s26 + $0x440] sm:$0xff] }
  0x50   : > { %668 = vmatpush1.msra.mxu1 %v1325_v40  ;;  %1288 = vmatprep.mubr.msk.f32.mxu1 %vm272_vm0, %v1883_v41  ;;  %v1348_v40 = vld [vmem:[%s1712_s26 + $0x340] sm:$0xff] }
  0x51   : > { %1525 = vmatprep.subr.mxu0 %v1308_v42  ;;  %669 = vmatprep.subr.mxu1 %v1654_v2  ;;  %v1363_v42 = vld [vmem:[%s1712_s26 + $0x3b8] sm:$0xff] }
  0x52   : > { %364 = vmatprep.mubr.f32.mxu0 %v1891_v43  ;;  %445 = vmatmul.mubr.f32.gmra.mxu1 %v1896_v44 }
  0x53   : > { %1526 = vmatpush3.msra.mxu0 %v1292_v45  ;;  %670 = vmatpush1.msra.mxu1 %v1324_v46  ;;  %v1379_v45 = vld [vmem:[%s1712_s26 + $0x438] sm:$0xff] }
  0x54   : > { %365 = vmatmul.mubr.f32.gmra.mxu0 %v1906_v47  ;;  %1527 = vmatprep.subr.mxu0 %v1307_v48  ;;  %v1347_v46 = vld [vmem:[%s1712_s26 + $0x338] sm:$0xff]  ;;  %v1362_v48 = vld [vmem:[%s1712_s26 + $0x3b0] sm:$0xff] }
  0x55   : > { %671 = vmatprep.subr.mxu1 %v1654_v2  ;;  %1528 = vmatpush3.msra.mxu0 %v1291_v49  ;;  %v1378_v49 = vld [vmem:[%s1712_s26 + $0x430] sm:$0xff] }
  0x56   : > { %672 = vmatpush1.msra.mxu1 %v1323_v50  ;;  %1289 = vmatprep.mubr.msk.f32.mxu1 %vm272_vm0, %v1916_v51  ;;  %v1346_v50 = vld [vmem:[%s1712_s26 + $0x330] sm:$0xff] }
  0x57   : > { %1529 = vmatprep.subr.mxu0 %v1306_v52  ;;  %673 = vmatprep.subr.mxu1 %v1654_v2  ;;  %v1361_v52 = vld [vmem:[%s1712_s26 + $0x3a8] sm:$0xff] }
  0x58   : > { %450 = vmatmul.mubr.f32.gmra.mxu1 %v1924_v54  ;;  %1530 = vmatpush3.msra.mxu0 %v1290_v55  ;;  %v1377_v55 = vld [vmem:[%s1712_s26 + $0x428] sm:$0xff] }
  0x59   : > { %622 = vmatprep.mubr.f32.mxu0 %v1692_v0  ;;  %674 = vmatpush1.msra.mxu1 %v1322_v56  ;;  %v1345_v56 = vld [vmem:[%s1712_s26 + $0x328] sm:$0xff] }
  0x5a   : > { %623 = vmatmul.mubr.f32.vlgmr.msra.gmra.mxu0 %v1780_v53  ;;  %703 = vmatprep.subr.mxu1 %v1654_v2 }
  0x5b   : > { %704 = vmatpush2.msra.mxu1 %v1339_v57  ;;  %627 = vmatprep.mubr.f32.mxu0 %v1832_v24  ;;  %v1360_v57 = vld [vmem:[%s1712_s26 + $0x3a0] sm:$0xff] }
  0x5c   : > { %705 = vmatprep.subr.mxu1 %v1654_v2  ;;  %1340 = vmatprep.mubr.msk.f32.mxu1 %vm272_vm0, %v1697_v1 }
  0x5d   : > { %706 = vmatpush2.msra.mxu1 %v1338_v59  ;;  %1543 = vmatprep.subr.mxu0 %v1375_v60  ;;  %v1376_v59 = vld [vmem:[%s1712_s26 + $0x420] sm:$0xff] }
  0x5e   : > { %628 = vmatmul.mubr.f32.gmra.mxu0 %v1840_v27  ;;  %708 = vmatmul.mubr.f32.vlgmr.msra.gmra.mxu1 %v1791_v58  ;;  %v1344_v60 = vld [vmem:[%s1712_s26 + $0x320] sm:$0xff] }
  0x5f   : > { %880 = vmatprep.subr.mxu1 %v1654_v2  ;;  %1544 = vmatpush3.msra.mxu0 %v1359_v61  ;;  %v1393_v61 = vld [vmem:[%s1712_s26 + $0x4a8] sm:$0xff] }
  0x60   : > { %881 = vmatpush1.msra.mxu1 %v1391_v62  ;;  %632 = vmatprep.mubr.f32.mxu0 %v1858_v33  ;;  %v215_v62 = vld [vmem:[%s2230_s2 + $0x8] sm:$0xff] }
  0x61   : > { %882 = vmatprep.subr.mxu1 %v1654_v2  ;;  %1341 = vmatprep.mubr.msk.f32.mxu1 %vm272_vm0, %v1850_v31 }
  0x62   : > { %1545 = vmatprep.subr.mxu0 %v1374_v63  ;;  %883 = vmatpush1.msra.mxu1 %v1390_v3  ;;  %v1429_v63 = vld [vmem:[%s1712_s26 + $0x5a8] sm:$0xff]  ;;  %v1392_v3 = vld [vmem:[%s1712_s26 + $0x4a0] sm:$0xff] }
  0x63   : > { %633 = vmatmul.mubr.f32.gmra.mxu0 %v1873_v37  ;;  %713 = vmatmul.mubr.f32.gmra.mxu1 %v1863_v34 }
  0x64   : > { %1546 = vmatpush3.msra.mxu0 %v1358_v4  ;;  %884 = vmatprep.subr.mxu1 %v1654_v2  ;;  %v1413_v4 = vld [vmem:[%s1712_s26 + $0x528] sm:$0xff] }
  0x65   : > { %1547 = vmatprep.subr.mxu0 %v1373_v5  ;;  %885 = vmatpush1.msra.mxu1 %v1389_v6  ;;  %v1428_v5 = vld [vmem:[%s1712_s26 + $0x5a0] sm:$0xff]  ;;  %v1445_v6 = vld [vmem:[%s1712_s26 + $0x628] sm:$0xff] }
  0x66   : > { %1548 = vmatpush3.msra.mxu0 %v1357_v7  ;;  %886 = vmatprep.subr.mxu1 %v1654_v2  ;;  %v218_v7 = vld [vmem:[%s2231_s3] sm:$0xff] }
  0x67   : > { %637 = vmatprep.mubr.f32.mxu0 %v1891_v43  ;;  %1342 = vmatprep.mubr.msk.f32.mxu1 %vm272_vm0, %v1883_v41 }
  0x68   : > { %1549 = vmatprep.subr.mxu0 %v1372_v8  ;;  %887 = vmatpush1.msra.mxu1 %v1388_v9  ;;  %v1427_v8 = vld [vmem:[%s1712_s26 + $0x598] sm:$0xff] }
  0x69   : > { %638 = vmatmul.mubr.f32.gmra.mxu0 %v1906_v47  ;;  %718 = vmatmul.mubr.f32.gmra.mxu1 %v1896_v44  ;;  %v1411_v9 = vld [vmem:[%s1712_s26 + $0x518] sm:$0xff] }
  0x6a   : > { %1550 = vmatpush3.msra.mxu0 %v1356_v10  ;;  %888 = vmatprep.subr.mxu1 %v1654_v2  ;;  %v1426_v10 = vld [vmem:[%s1712_s26 + $0x590] sm:$0xff] }
  0x6b   : > { %1551 = vmatprep.subr.mxu0 %v1371_v11  ;;  %889 = vmatpush1.msra.mxu1 %v1387_v12  ;;  %v1410_v11 = vld [vmem:[%s1712_s26 + $0x510] sm:$0xff]  ;;  %v1443_v12 = vld [vmem:[%s1712_s26 + $0x618] sm:$0xff] }
  0x6c   : > { %1552 = vmatpush3.msra.mxu0 %v1355_v13  ;;  %890 = vmatprep.subr.mxu1 %v1654_v2  ;;  %v1425_v13 = vld [vmem:[%s1712_s26 + $0x588] sm:$0xff] }
  0x6d   : > { %1343 = vmatprep.mubr.msk.f32.mxu1 %vm272_vm0, %v1916_v51  ;;  %1553 = vmatprep.subr.mxu0 %v1370_v14  ;;  %v1409_v14 = vld [vmem:[%s1712_s26 + $0x508] sm:$0xff] }
  0x6e   : > { %891 = vmatpush1.msra.mxu1 %v1386_v15  ;;  %1554 = vmatpush3.msra.mxu0 %v1354_v16  ;;  %v1442_v15 = vld [vmem:[%s1712_s26 + $0x610] sm:$0xff]  ;;  %v1424_v16 = vld [vmem:[%s1712_s26 + $0x580] sm:$0xff] }
  0x6f   : > { %723 = vmatmul.mubr.f32.gmra.mxu1 %v1924_v54  ;;  %892 = vmatprep.subr.mxu1 %v1654_v2 }
  0x70   : > { %1555 = vmatprep.subr.mxu0 %v1369_v17  ;;  %893 = vmatpush1.msra.mxu1 %v1385_v18  ;;  %v1408_v17 = vld [vmem:[%s1712_s26 + $0x500] sm:$0xff]  ;;  %v1441_v18 = vld [vmem:[%s1712_s26 + $0x608] sm:$0xff] }
  0x71   : > { %1556 = vmatpush3.msra.mxu0 %v1353_v19  ;;  %894 = vmatprep.subr.mxu1 %v1654_v2  ;;  %v1423_v19 = vld [vmem:[%s1712_s26 + $0x578] sm:$0xff] }
  0x72   : > { %1557 = vmatprep.subr.mxu0 %v1368_v20  ;;  %895 = vmatpush1.msra.mxu1 %v1384_v21  ;;  %v1407_v20 = vld [vmem:[%s1712_s26 + $0x4f8] sm:$0xff]  ;;  %v1440_v21 = vld [vmem:[%s1712_s26 + $0x600] sm:$0xff] }
  0x73   : > { %1558 = vmatpush3.msra.mxu0 %v1352_v22  ;;  %896 = vmatprep.subr.mxu1 %v1654_v2  ;;  %v1422_v22 = vld [vmem:[%s1712_s26 + $0x570] sm:$0xff] }
  0x74   : > { %1559 = vmatprep.subr.mxu0 %v1367_v23  ;;  %897 = vmatpush1.msra.mxu1 %v1383_v25  ;;  %v1406_v23 = vld [vmem:[%s1712_s26 + $0x4f0] sm:$0xff]  ;;  %v1439_v25 = vld [vmem:[%s1712_s26 + $0x5f8] sm:$0xff] }
  0x75   : > { %1560 = vmatpush3.msra.mxu0 %v1351_v26  ;;  %898 = vmatprep.subr.mxu1 %v1654_v2  ;;  %v1421_v26 = vld [vmem:[%s1712_s26 + $0x568] sm:$0xff] }
  0x76   : > { %1561 = vmatprep.subr.mxu0 %v1366_v28  ;;  %899 = vmatpush1.msra.mxu1 %v1382_v29  ;;  %v1405_v28 = vld [vmem:[%s1712_s26 + $0x4e8] sm:$0xff]  ;;  %v1438_v29 = vld [vmem:[%s1712_s26 + $0x5f0] sm:$0xff] }
  0x77   : > { %1562 = vmatpush3.msra.mxu0 %v1350_v30  ;;  %900 = vmatprep.subr.mxu1 %v1654_v2  ;;  %v1420_v30 = vld [vmem:[%s1712_s26 + $0x560] sm:$0xff] }
  0x78   : > { %1563 = vmatprep.subr.mxu0 %v1365_v32  ;;  %901 = vmatpush1.msra.mxu1 %v1381_v35  ;;  %v1404_v32 = vld [vmem:[%s1712_s26 + $0x4e0] sm:$0xff]  ;;  %v1437_v35 = vld [vmem:[%s1712_s26 + $0x5e8] sm:$0xff] }
  0x79   : > { %1564 = vmatpush3.msra.mxu0 %v1349_v36  ;;  %902 = vmatprep.subr.mxu1 %v1654_v2  ;;  %v216_v36 = vld [vmem:[%s2230_s2 + $0x10] sm:$0xff] }
  0x7a   : > { %1565 = vmatprep.subr.mxu0 %v1364_v38  ;;  %903 = vmatpush1.msra.mxu1 %v1380_v39  ;;  %v1419_v38 = vld [vmem:[%s1712_s26 + $0x558] sm:$0xff] }
  0x7b   : > { %1566 = vmatpush3.msra.mxu0 %v1348_v40  ;;  %904 = vmatprep.subr.mxu1 %v1654_v2  ;;  %v1403_v39 = vld [vmem:[%s1712_s26 + $0x4d8] sm:$0xff]  ;;  %v1436_v40 = vld [vmem:[%s1712_s26 + $0x5e0] sm:$0xff] }
  0x7c   : > { %1567 = vmatprep.subr.mxu0 %v1363_v42  ;;  %905 = vmatpush1.msra.mxu1 %v1379_v45  ;;  %v1418_v42 = vld [vmem:[%s1712_s26 + $0x550] sm:$0xff] }
  0x7d   : > { %1568 = vmatpush3.msra.mxu0 %v1347_v46  ;;  %906 = vmatprep.subr.mxu1 %v1654_v2  ;;  %v1402_v45 = vld [vmem:[%s1712_s26 + $0x4d0] sm:$0xff]  ;;  %v1435_v46 = vld [vmem:[%s1712_s26 + $0x5d8] sm:$0xff] }
  0x7e   : > { %1569 = vmatprep.subr.mxu0 %v1362_v48  ;;  %907 = vmatpush1.msra.mxu1 %v1378_v49  ;;  %v217_v48 = vld [vmem:[%s2230_s2 + $0x18] sm:$0xff]  ;;  %v1417_v49 = vld [vmem:[%s1712_s26 + $0x548] sm:$0xff] }
  0x7f   : > { %1570 = vmatpush3.msra.mxu0 %v1346_v50  ;;  %908 = vmatprep.subr.mxu1 %v1654_v2  ;;  %v1401_v50 = vld [vmem:[%s1712_s26 + $0x4c8] sm:$0xff] }
  0x80   : > { %1571 = vmatprep.subr.mxu0 %v1361_v52  ;;  %909 = vmatpush1.msra.mxu1 %v1377_v55  ;;  %v1434_v52 = vld [vmem:[%s1712_s26 + $0x5d0] sm:$0xff]  ;;  %v1416_v55 = vld [vmem:[%s1712_s26 + $0x540] sm:$0xff] }
  0x81   : > { %1572 = vmatpush3.msra.mxu0 %v1345_v56  ;;  %910 = vmatprep.subr.mxu1 %v1654_v2  ;;  %v1400_v56 = vld [vmem:[%s1712_s26 + $0x4c0] sm:$0xff] }
  0x82   : > { %1573 = vmatprep.subr.mxu0 %v1360_v57  ;;  %911 = vmatpush1.msra.mxu1 %v1376_v59  ;;  %v1433_v57 = vld [vmem:[%s1712_s26 + $0x5c8] sm:$0xff] }
  0x83   : > { %1574 = vmatpush3.msra.mxu0 %v1344_v60  ;;  %859 = vmatprep.mubr.f32.mxu0 %v1692_v0  ;;  %v1412_v0 = vld [vmem:[%s1712_s26 + $0x520] sm:$0xff]  ;;  %v219_v59 = vld [vmem:[%s2231_s3 + $0x8] sm:$0xff]  ;;  %v1415_v60 = vld [vmem:[%s1712_s26 + $0x538] sm:$0xff] }
  0x84   : > { %940 = vmatprep.subr.mxu1 %v1654_v2  ;;  %860 = vmatmul.mubr.f32.vlgmr.msra.gmra.mxu0 %v1780_v53 }
  0x85   : > { %941 = vmatpush2.msra.mxu1 %v1393_v61  ;;  %462 = vperm.xlu0 %1642, %v215_v62   ;;  %v1399_v61 = vld [vmem:[%s1712_s26 + $0x4b8] sm:$0xff]  ;;  %v1432_v62 = vld [vmem:[%s1712_s26 + $0x5c0] sm:$0xff] }
  0x86   : > { %942 = vmatprep.subr.mxu1 %v1654_v2  ;;  %1587 = vmatprep.subr.mxu0 %v1429_v63  ;;  %v1414_v63 = vld [vmem:[%s1712_s26 + $0x530] sm:$0xff] }
  0x87   : > { %943 = vmatpush2.msra.mxu1 %v1392_v3  ;;  %1394 = vmatprep.mubr.msk.f32.mxu1 %vm272_vm0, %v1697_v1  ;;  %v1444_v1 = vld [vmem:[%s1712_s26 + $0x620] sm:$0xff]  ;;  %v1398_v3 = vld [vmem:[%s1712_s26 + $0x4b0] sm:$0xff] }
  0x88   : > { %1588 = vmatpush3.msra.mxu0 %v1413_v4  ;;  %945 = vmatmul.mubr.f32.vlgmr.msra.gmra.mxu1 %v1791_v58  ;;  %v1431_v4 = vld [vmem:[%s1712_s26 + $0x5b8] sm:$0xff] }
  0x89   : > { %1589 = vmatprep.subr.mxu0 %v1428_v5  ;;  %1113 = vmatprep.subr.mxu1 %v1654_v2  ;;  %v220_v5 = vld [vmem:[%s2231_s3 + $0x10] sm:$0xff] }
  0x8a   : > { %1590 = vmatpush3.msra.mxu0 %v1412_v0  ;;  %1114 = vmatpush1.msra.mxu1 %v1445_v6  ;;  %v1644_v0 = vld [vmem:[%s2229_s1 + $0x8] sm:$0xff]  ;;  %v1430_v6 = vld [vmem:[%s1712_s26 + $0x5b0] sm:$0xff] }
  0x8b   : > { %481 = vperm.xlu0 %1642, %v218_v7   ;;  %1591 = vmatprep.subr.mxu0 %v1427_v8  ;;  %v221_v7 = vld [vmem:[%s2231_s3 + $0x18] sm:$0xff] }
  0x8c   : > { %1115 = vmatprep.subr.mxu1 %v1654_v2  ;;  %1592 = vmatpush3.msra.mxu0 %v1411_v9  ;;  %v1447_v8 = vld [vmem:[%s1712_s26 + $0x638] sm:$0xff]  ;;  %v1446_v9 = vld [vmem:[%s1712_s26 + $0x630] sm:$0xff]  ;;  %s1454_s26 = sshll.u32 %s2234_s16, 5 }
  0x8d   : > { %1116 = vmatpush1.msra.mxu1 %v1444_v1  ;;  %1593 = vmatprep.subr.mxu0 %v1426_v10  ;;  %v1645_v1 = vld [vmem:[%s2229_s1 + $0x18] sm:$0xff]  ;;  %s197_s29 = scalar_lea.vmem %s2232_s4, %s1454_s26 }
  0x8e   : > { %1117 = vmatprep.subr.mxu1 %v1654_v2  ;;  %1594 = vmatpush3.msra.mxu0 %v1410_v11 }
  0x8f   : > { %1118 = vmatpush1.msra.mxu1 %v1443_v12  ;;  %1595 = vmatprep.subr.mxu0 %v1425_v13 }
  0x90   : > { %1119 = vmatprep.subr.mxu1 %v1654_v2  ;;  %1596 = vmatpush3.msra.mxu0 %v1409_v14 }
  0x91   : > { %1120 = vmatpush1.msra.mxu1 %v1442_v15  ;;  %1597 = vmatprep.subr.mxu0 %v1424_v16 }
  0x92   : > { %1121 = vmatprep.subr.mxu1 %v1654_v2  ;;  %1598 = vmatpush3.msra.mxu0 %v1408_v17 }
  0x93   : > { %1122 = vmatpush1.msra.mxu1 %v1441_v18  ;;  %1599 = vmatprep.subr.mxu0 %v1423_v19 }
  0x94   : > { %1123 = vmatprep.subr.mxu1 %v1654_v2  ;;  %1600 = vmatpush3.msra.mxu0 %v1407_v20 }
  0x95   : > { %1124 = vmatpush1.msra.mxu1 %v1440_v21  ;;  %1601 = vmatprep.subr.mxu0 %v1422_v22 }
  0x96   : > { %1125 = vmatprep.subr.mxu1 %v1654_v2  ;;  %1602 = vmatpush3.msra.mxu0 %v1406_v23 }
  0x97   : > { %1126 = vmatpush1.msra.mxu1 %v1439_v25  ;;  %1603 = vmatprep.subr.mxu0 %v1421_v26 }
  0x98   : > { %1127 = vmatprep.subr.mxu1 %v1654_v2  ;;  %1604 = vmatpush3.msra.mxu0 %v1405_v28 }
  0x99   : > { %1128 = vmatpush1.msra.mxu1 %v1438_v29  ;;  %1605 = vmatprep.subr.mxu0 %v1420_v30 }
  0x9a   : > { %1129 = vmatprep.subr.mxu1 %v1654_v2  ;;  %864 = vmatprep.mubr.f32.mxu0 %v1832_v24 }
  0x9b   : > { %1606 = vmatpush3.msra.mxu0 %v1404_v32  ;;  %1130 = vmatpush1.msra.mxu1 %v1437_v35 }
  0x9c   : > { %467 = vperm.xlu1 %1643, %v216_v36   ;;  %865 = vmatmul.mubr.f32.gmra.mxu0 %v1840_v27 }
  0x9d   : > { %1607 = vmatprep.subr.mxu0 %v1419_v38  ;;  %1131 = vmatprep.subr.mxu1 %v1654_v2 }
  0x9e   : > { %1608 = vmatpush3.msra.mxu0 %v1403_v39  ;;  %1132 = vmatpush1.msra.mxu1 %v1436_v40 }
  0x9f   : > { %1609 = vmatprep.subr.mxu0 %v1418_v42  ;;  %1133 = vmatprep.subr.mxu1 %v1654_v2 }
  0xa0   : > { %869 = vmatprep.mubr.f32.mxu0 %v1858_v33  ;;  %1395 = vmatprep.mubr.msk.f32.mxu1 %vm272_vm0, %v1850_v31 }
  0xa1   : > { %1610 = vmatpush3.msra.mxu0 %v1402_v45  ;;  %1134 = vmatpush1.msra.mxu1 %v1435_v46 }
  0xa2   : > { %472 = vperm.xlu1 %1643, %v217_v48   ;;  %870 = vmatmul.mubr.f32.gmra.mxu0 %v1873_v37 }
  0xa3   : > { %950 = vmatmul.mubr.f32.gmra.mxu1 %v1863_v34  ;;  %1611 = vmatprep.subr.mxu0 %v1417_v49 }
  0xa4   : > { %1135 = vmatprep.subr.mxu1 %v1654_v2  ;;  %1612 = vmatpush3.msra.mxu0 %v1401_v50 }
  0xa5   : > { %1136 = vmatpush1.msra.mxu1 %v1434_v52  ;;  %1613 = vmatprep.subr.mxu0 %v1416_v55 }
  0xa6   : > { %1137 = vmatprep.subr.mxu1 %v1654_v2  ;;  %874 = vmatprep.mubr.f32.mxu0 %v1891_v43 }
  0xa7   : > { %1396 = vmatprep.mubr.msk.f32.mxu1 %vm272_vm0, %v1883_v41  ;;  %1614 = vmatpush3.msra.mxu0 %v1400_v56 }
  0xa8   : > { %1138 = vmatpush1.msra.mxu1 %v1433_v57  ;;  %486 = vperm.xlu1 %1643, %v219_v59  }
  0xa9   : > { %875 = vmatmul.mubr.f32.gmra.mxu0 %v1906_v47  ;;  %955 = vmatmul.mubr.f32.gmra.mxu1 %v1896_v44 }
  0xaa   : > { %1615 = vmatprep.subr.mxu0 %v1415_v60  ;;  %1139 = vmatprep.subr.mxu1 %v1654_v2 }
  0xab   : > { %1616 = vmatpush3.msra.mxu0 %v1399_v61  ;;  %1140 = vmatpush1.msra.mxu1 %v1432_v62 }
  0xac   : > { %1617 = vmatprep.subr.mxu0 %v1414_v63  ;;  %1141 = vmatprep.subr.mxu1 %v1654_v2 }
  0xad   : > { %1397 = vmatprep.mubr.msk.f32.mxu1 %vm272_vm0, %v1916_v51  ;;  %1618 = vmatpush3.msra.mxu0 %v1398_v3 }
  0xae   : > { %1092 = vmatprep.mubr.f32.mxu0 %v1644_v0  ;;  %1142 = vmatpush1.msra.mxu1 %v1431_v4 }
  0xaf   : > { %491 = vperm.xlu0 %1642, %v220_v5   ;;  %960 = vmatmul.mubr.f32.gmra.mxu1 %v1924_v54 }
  0xb0   : > { %1093 = vmatmul.mubr.f32.vlgmr.msra.gmra.mxu0 %v1780_v53  ;;  %1143 = vmatprep.subr.mxu1 %v1654_v2 }
  0xb1   : > { %1144 = vmatpush1.msra.mxu1 %v1430_v6  ;;  %1097 = vmatprep.mubr.f32.mxu0 %v1832_v24 }
  0xb2   : > { %1173 = vmatprep.subr.mxu1 %v1654_v2  ;;  %496 = vperm.xlu1 %1643, %v221_v7  }
  0xb3   : > { %1174 = vmatpush2.msra.mxu1 %v1447_v8  ;;  %1448 = vmatprep.mubr.msk.f32.mxu1 %vm272_vm0, %v1645_v1 }
  0xb4   : > { %1098 = vmatmul.mubr.f32.gmra.mxu0 %v1840_v27  ;;  %1175 = vmatprep.subr.mxu1 %v1654_v2 }
  0xb5   : > { %1176 = vmatpush2.msra.mxu1 %v1446_v9  ;;  %1102 = vmatprep.mubr.f32.mxu0 %v1858_v33 }
  0xb6   : > { %1178 = vmatmul.mubr.f32.vlgmr.msra.gmra.mxu1 %v1791_v58 }
  0xb7   : > { %1449 = vmatprep.mubr.msk.f32.mxu1 %vm272_vm0, %v1850_v31 }
  0xb8   : > { %1103 = vmatmul.mubr.f32.gmra.mxu0 %v1873_v37 }
  0xb9   : > { %1107 = vmatprep.mubr.f32.mxu0 %v1891_v43 }
  0xba   : > { %1183 = vmatmul.mubr.f32.gmra.mxu1 %v1863_v34 }
  0xbb   : > { %1450 = vmatprep.mubr.msk.f32.mxu1 %vm272_vm0, %v1883_v41  ;;  %v2157_v41 = vpop.permute.xlu0 %457 }
  0xbc   : > { %1108 = vmatmul.mubr.f32.gmra.mxu0 %v1906_v47 }
  0xbe   : > { %1188 = vmatmul.mubr.f32.gmra.mxu1 %v1896_v44 }
  0xbf   : > { %1451 = vmatprep.mubr.msk.f32.mxu1 %vm272_vm0, %v1916_v51 }
  0xc2   : > { %1193 = vmatmul.mubr.f32.gmra.mxu1 %v1924_v54 }
  0xf1   : > { %v1487_v58 = vpop.f32.mrf.mxu0 }
  0xf3   : > { %v1488_v24 = vpop.f32.mrf.mxu0 }
  0xf4   : > { %v436_v2 = vpop.f32.mrf.mxu1  ;;  %v1489_v11 = vadd.f32 %v1488_v24, %v1487_v58 }
  0xf6   : > { %v438_v53 = vpop.f32.mrf.mxu1  ;;  %v437_v14 = vadd.f32 %v1489_v11, %v436_v2 }
  0xf8   : > { %v475_v19 = vmul.f32 %v2157_v41, %v437_v14 }
 0x100   : > { %v2159_v51 = vpop.permute.xlu0 %462 }
 0x106   : > { %v2164_v20 = vpop.permute.xlu0 %481 }
 0x107   : > { %v499_v35 = vadd.f32 %v2164_v20, %v475_v19 }
 0x108   : > { %v1490_v27 = vpop.f32.mrf.mxu0 }
 0x109   : > { %v503_v49 = vmax.f32 %v499_v35, 0.0 }
 0x10a   : > { %v1491_v31 = vpop.f32.mrf.mxu0 }
 0x10b   : > { %v1492_v17 = vadd.f32 %v1491_v31, %v1490_v27 }
 0x10c   : > { %v441_v33 = vpop.f32.mrf.mxu1 }
 0x10d   : > { %v442_v26 = vadd.f32 %v1492_v17, %v441_v33 }
 0x10e   : > { %v1493_v34 = vpop.f32.mrf.mxu0  ;;  %v443_v37 = vpop.f32.mrf.mxu1 }
 0x10f   : > { %v476_v39 = vmul.f32 %v2159_v51, %v442_v26 }
 0x110   : > { %v1494_v43 = vpop.f32.mrf.mxu0 }
 0x111   : > { %v1495_v29 = vadd.f32 %v1494_v43, %v1493_v34 }
 0x112   : > { %v446_v47 = vpop.f32.mrf.mxu1 }
 0x113   : > { %v447_v45 = vadd.f32 %v1495_v29, %v446_v47 }
 0x114   : > { %v1496_v10 = vpop.f32.mrf.mxu0  ;;  %v448_v44 = vpop.f32.mrf.mxu1 }
 0x116   : > { %v1497_v12 = vpop.f32.mrf.mxu0 }
 0x117   : > { %v2161_v54 = vpop.permute.xlu1 %467  ;;  %v1498_v56 = vadd.f32 %v1497_v12, %v1496_v10 }
 0x118   : > { %v451_v13 = vpop.f32.mrf.mxu1  ;;  %v477_v63 = vmul.f32 %v2161_v54, %v447_v45 }
 0x119   : > { %v452_v0 = vadd.f32 %v1498_v56, %v451_v13 }
 0x11a   : > { %v1531_v15 = vpop.f32.mrf.mxu0  ;;  %v453_v16 = vpop.f32.mrf.mxu1 }
 0x11c   : > { %v1532_v18 = vpop.f32.mrf.mxu0 }
 0x11d   : > { %v2166_v21 = vpop.permute.xlu1 %472  ;;  %v1533_v22 = vadd.f32 %v1532_v18, %v1531_v15 }
 0x11e   : > { %v1534_v23 = vpop.f32.mrf.mxu0  ;;  %v709_v25 = vpop.f32.mrf.mxu1  ;;  %v478_v31 = vmul.f32 %v2166_v21, %v452_v0 }
 0x11f   : > { %v710_v28 = vadd.f32 %v1533_v22, %v709_v25 }
 0x120   : > { %v1535_v30 = vpop.f32.mrf.mxu0  ;;  %v711_v32 = vpop.f32.mrf.mxu1 }
 0x121   : > { %v728_v36 = vmul.f32 %v710_v28, %v2157_v41  ;;  %v1536_v38 = vadd.f32 %v1535_v30, %v1534_v23 }
 0x123   : > { %v732_v40 = vadd.f32 %v728_v36, %v2164_v20  ;;  %v1537_v42 = vpop.f32.mrf.mxu0  ;;  %v2172_v46 = vpop.permute.xlu1 %486 }
 0x124   : > { %v714_v48 = vpop.f32.mrf.mxu1  ;;  %v500_v60 = vadd.f32 %v2172_v46, %v476_v39 }
 0x125   : > { %v736_v50 = vmax.f32 %v732_v40, 0.0  ;;  %v715_v52 = vadd.f32 %v1536_v38, %v714_v48  ;;  %v1538_v55 = vpop.f32.mrf.mxu0 }
 0x126   : > { %v1539_v57 = vadd.f32 %v1538_v55, %v1537_v42  ;;  %v716_v59 = vpop.f32.mrf.mxu1  ;;  %v504_v8 = vmax.f32 %v500_v60, 0.0 }
 0x127   : > { %v2175_v61 = vmax.f32 %v503_v49, %v736_v50  ;;  %v729_v62 = vmul.f32 %v715_v52, %v2159_v51 }
 0x129   : > { %v733_v3 = vadd.f32 %v729_v62, %v2172_v46  ;;  %v1540_v4 = vpop.f32.mrf.mxu0  ;;  %v719_v5 = vpop.f32.mrf.mxu1 }
 0x12a   : > { %v2180_v6 = vpop.permute.xlu0 %491  ;;  %v720_v7 = vadd.f32 %v1539_v57, %v719_v5 }
 0x12b   : > { %v737_v9 = vmax.f32 %v733_v3, 0.0  ;;  %v1541_v1 = vpop.f32.mrf.mxu0  ;;  %v721_v2 = vpop.f32.mrf.mxu1  ;;  %v501_v53 = vadd.f32 %v2180_v6, %v477_v63 }
 0x12c   : > { %v730_v58 = vmul.f32 %v720_v7, %v2161_v54  ;;  %v1542_v24 = vadd.f32 %v1541_v1, %v1540_v4 }
 0x12d   : > { %v2184_v27 = vmax.f32 %v504_v8, %v737_v9  ;;  %v2188_v34 = vpop.permute.xlu1 %496  ;;  %v505_v43 = vmax.f32 %v501_v53, 0.0 }
 0x12e   : > { %v734_v33 = vadd.f32 %v730_v58, %v2180_v6  ;;  %v502_v11 = vadd.f32 %v2188_v34, %v478_v31 }
 0x12f   : > { %v724_v37 = vpop.f32.mrf.mxu1 }
 0x130   : > { %v738_v47 = vmax.f32 %v734_v33, 0.0  ;;  %v725_v10 = vadd.f32 %v1542_v24, %v724_v37  ;;  %v506_v15 = vmax.f32 %v502_v11, 0.0 }
 0x131   : > { %v726_v44 = vpop.f32.mrf.mxu1 }
 0x132   : > { %v2191_v12 = vmax.f32 %v505_v43, %v738_v47  ;;  %v731_v13 = vmul.f32 %v725_v10, %v2166_v21 }
 0x134   : > { %v735_v14 = vadd.f32 %v731_v13, %v2188_v34 }
 0x136   : > { %v739_v16 = vmax.f32 %v735_v14, 0.0 }
 0x138   : > { %v2195_v17 = vmax.f32 %v506_v15, %v739_v16 }
 0x144   : > { %v1575_v22 = vpop.f32.mrf.mxu0 }
 0x146   : > { %v1576_v23 = vpop.f32.mrf.mxu0 }
 0x147   : > { %v1577_v40 = vadd.f32 %v1576_v23, %v1575_v22 }
 0x148   : > { %v946_v18 = vpop.f32.mrf.mxu1 }
 0x149   : > { %v947_v49 = vadd.f32 %v1577_v40, %v946_v18 }
 0x14a   : > { %v948_v19 = vpop.f32.mrf.mxu1 }
 0x14b   : > { %v965_v59 = vmul.f32 %v947_v49, %v2157_v41 }
 0x14d   : > { %v969_v9 = vadd.f32 %v965_v59, %v2164_v20 }
 0x14f   : > { %v973_v44 = vmax.f32 %v969_v9, 0.0 }
 0x15c   : > { %v1578_v25 = vpop.f32.mrf.mxu0 }
 0x15e   : > { %v1579_v26 = vpop.f32.mrf.mxu0 }
 0x15f   : > { %v1580_v45 = vadd.f32 %v1579_v26, %v1578_v25 }
 0x162   : > { %v1581_v28 = vpop.f32.mrf.mxu0 }
 0x163   : > { %v951_v29 = vpop.f32.mrf.mxu1 }
 0x164   : > { %v1582_v30 = vpop.f32.mrf.mxu0  ;;  %v952_v55 = vadd.f32 %v1580_v45, %v951_v29 }
 0x165   : > { %v953_v32 = vpop.f32.mrf.mxu1  ;;  %v1583_v56 = vadd.f32 %v1582_v30, %v1581_v28 }
 0x166   : > { %v966_v4 = vmul.f32 %v952_v55, %v2159_v51 }
 0x168   : > { %v970_v33 = vadd.f32 %v966_v4, %v2172_v46 }
 0x169   : > { %v1584_v35 = vpop.f32.mrf.mxu0  ;;  %v956_v36 = vpop.f32.mrf.mxu1 }
 0x16a   : > { %v957_v5 = vadd.f32 %v1583_v56, %v956_v36  ;;  %v974_v19 = vmax.f32 %v970_v33, 0.0 }
 0x16b   : > { %v958_v38 = vpop.f32.mrf.mxu1  ;;  %v1585_v39 = vpop.f32.mrf.mxu0 }
 0x16c   : > { %v1586_v0 = vadd.f32 %v1585_v39, %v1584_v35  ;;  %v967_v37 = vmul.f32 %v957_v5, %v2161_v54 }
 0x16e   : > { %v971_v22 = vadd.f32 %v967_v37, %v2180_v6 }
 0x16f   : > { %v961_v42 = vpop.f32.mrf.mxu1 }
 0x170   : > { %v1619_v48 = vpop.f32.mrf.mxu0  ;;  %v962_v43 = vadd.f32 %v1586_v0, %v961_v42  ;;  %v975_v36 = vmax.f32 %v971_v22, 0.0 }
 0x171   : > { %v963_v50 = vpop.f32.mrf.mxu1 }
 0x172   : > { %v1620_v52 = vpop.f32.mrf.mxu0  ;;  %v968_v23 = vmul.f32 %v962_v43, %v2166_v21 }
 0x173   : > { %v1621_v60 = vadd.f32 %v1620_v52, %v1619_v48 }
 0x174   : > { %v1622_v57 = vpop.f32.mrf.mxu0  ;;  %v972_v39 = vadd.f32 %v968_v23, %v2188_v34 }
 0x176   : > { %v1623_v62 = vpop.f32.mrf.mxu0  ;;  %v1179_v63 = vpop.f32.mrf.mxu1  ;;  %v976_v48 = vmax.f32 %v972_v39, 0.0 }
 0x177   : > { %v1180_v3 = vadd.f32 %v1621_v60, %v1179_v63  ;;  %v1624_v1 = vadd.f32 %v1623_v62, %v1622_v57 }
 0x178   : > { %v1625_v7 = vpop.f32.mrf.mxu0  ;;  %v1181_v8 = vpop.f32.mrf.mxu1 }
 0x179   : > { %v1198_v2 = vmul.f32 %v1180_v3, %v2157_v41 }
 0x17a   : > { %v1626_v53 = vpop.f32.mrf.mxu0  ;;  %v1184_v58 = vpop.f32.mrf.mxu1 }
 0x17b   : > { %v1202_v24 = vadd.f32 %v1198_v2, %v2164_v20  ;;  %v1185_v31 = vadd.f32 %v1624_v1, %v1184_v58  ;;  %v1627_v13 = vadd.f32 %v1626_v53, %v1625_v7 }
 0x17c   : > { %v1628_v47 = vpop.f32.mrf.mxu0  ;;  %v1186_v10 = vpop.f32.mrf.mxu1 }
 0x17d   : > { %v1206_v11 = vmax.f32 %v1202_v24, 0.0  ;;  %v1199_v14 = vmul.f32 %v1185_v31, %v2159_v51 }
 0x17e   : > { %v1629_v15 = vpop.f32.mrf.mxu0  ;;  %v1189_v41 = vpop.f32.mrf.mxu1 }
 0x17f   : > { %v1210_v16 = vmax.f32 %v973_v44, %v1206_v11  ;;  %v1203_v18 = vadd.f32 %v1199_v14, %v2172_v46  ;;  %v1190_v20 = vadd.f32 %v1627_v13, %v1189_v41  ;;  %v1630_v28 = vadd.f32 %v1629_v15, %v1628_v47 }
 0x180   : > { %v1191_v25 = vpop.f32.mrf.mxu1 }
 0x181   : > { %v1214_v26 = vmax.f32 %v2175_v61, %v1210_v16  ;;  %v1207_v51 = vmax.f32 %v1203_v18, 0.0  ;;  %v1200_v29 = vmul.f32 %v1190_v20, %v2161_v54 }
 0x182   : > { %v1194_v30 = vpop.f32.mrf.mxu1 }
 0x183   : > { %1219 = vst.msk [vmem:[%s197_s29] sm:$0xff] %vm1218_vm1, %v1214_v26  ;;  %v1211_v46 = vmax.f32 %v974_v19, %v1207_v51  ;;  %v1204_v32 = vadd.f32 %v1200_v29, %v2180_v6  ;;  %v1195_v35 = vadd.f32 %v1630_v28, %v1194_v30 }
 0x184   : > { %v1196_v38 = vpop.f32.mrf.mxu1 }
 0x185   : > { %v1215_v40 = vmax.f32 %v2184_v27, %v1211_v46  ;;  %v1208_v42 = vmax.f32 %v1204_v32, 0.0  ;;  %v1201_v61 = vmul.f32 %v1195_v35, %v2166_v21 }
 0x187   : > { %1220 = vst.msk [vmem:[%s197_s29 + $0x8] sm:$0xff] %vm1218_vm1, %v1215_v40  ;;  %v1212_v45 = vmax.f32 %v975_v36, %v1208_v42  ;;  %v1205_v54 = vadd.f32 %v1201_v61, %v2188_v34 }
 0x189   : > { %v1216_v49 = vmax.f32 %v2191_v12, %v1212_v45  ;;  %v1209_v50 = vmax.f32 %v1205_v54, 0.0 }
 0x18b   : > { %1221 = vst.msk [vmem:[%s197_s29 + $0x10] sm:$0xff] %vm1218_vm1, %v1216_v49  ;;  %v1213_v6 = vmax.f32 %v976_v48, %v1209_v50 }
 0x18d   : > { %v1217_v52 = vmax.f32 %v2195_v17, %v1213_v6 }
 0x18f   : > { %1222 = vst.msk [vmem:[%s197_s29 + $0x18] sm:$0xff] %vm1218_vm1, %v1217_v52 }
 0x190 PF: > { %s14_s15 = sadd.s32 1, %s1652_s15  }
 0x191   : > { %p11_p4 = scmp.ge.s32.totalorder %s14_s15, 4  }
 0x193   :  { %13 = sbr.rel (!%p11_p4) target bundleno = 1 (0x1), region = 69 }

// kernel: cnn_mfcc_forward.7
= control target key start
LH: loop header
LB: loop body
LE: loop exit
PB: predicated region body
PF: predicated region fallthrough
CT: control target
= control target key end

     0   :  { %11 = vsyncpa [#allocation3], 0  ;;  %s1980_s0 = inlined_call_operand.vmem [shape: f32[2,4,1,288], index: 0, kind: input, shape index: {}]   ;;  %s1981_s1 = inlined_call_operand.vmem [shape: f32[288,32], index: 1, kind: input, shape index: {}]   ;;  %s1982_s2 = inlined_call_operand.vmem [shape: f32[1,32], index: 2, kind: input, shape index: {}]   ;;  %s1983_s3 = inlined_call_operand.vmem [shape: f32[1,32], index: 3, kind: input, shape index: {}]   ;;  %s1984_s4 = inlined_call_operand.vmem [shape: f32[32,10], index: 4, kind: input, shape index: {}]   ;;  %s1985_s5 = inlined_call_operand.vmem [shape: f32[1,10], index: 5, kind: input, shape index: {}]   ;;  %s1986_s6 = inlined_call_operand.hbm [shape: f32[2,1,10], index: 6, kind: output, shape index: {}]  }
   0x1   :  { %13 = vsyncpa [#allocation3 + $0x1], 0  ;;  %s1460_s21 = smov 0   ;;  %s1462_s22 = smov 0  }
   0x2   :  { %s1464_s23 = smov 0   ;;  %s1466_s24 = smov 0  }
   0x3 LB: > { %s1481_s25 = sadd.s32 4294967295, %s1420_s24   ;;  %s1083_s26 = sadd.s32 4294967294, %s1420_s24   ;;  %s1420_s24 = sphi %s1466_s24, %s1992_s24   ;;  %s1416_s23 = sphi %s1464_s23, %s1991_s23   ;;  %s1412_s22 = sphi %s1462_s22, %s1990_s22   ;;  %s1408_s21 = sphi %s1460_s21, %s1989_s21  }
   0x4   : > { %s1485_s27 = sadd.s32 1, %s1420_s24   ;;  %s157_s28 = sadd.s32 1, %s1416_s23 }
   0x5   : > { %s154_s29 = ssub.s32 %s1420_s24, %s1485_s27  ;;  %p167_p0 = scmp.ne.s32.totalorder %s1416_s23, %s1412_s22 }
   0x6   : > { %p155_p1 = scmp.eq.s32.totalorder %s154_s29, 0  ;;  %p168_p2 = scmp.eq.s32.totalorder %s1481_s25, 1 }
   0x7   : > { %p173_p3 = scmp.ne.s32.totalorder %s1412_s22, %s1408_s21  ;;  %p174_p4 = scmp.eq.s32.totalorder %s1083_s26, 1 }
   0x8   : > { %s1496_s30 = scalar_select %p155_p1, %s1416_s23, %s157_s28  }
   0x9   : > { %p1498_p5 = por %p168_p2, %p167_p0  ;;  %p1502_p6 = por %p174_p4, %p173_p3 }
   0xa   : > { %p1086_p7 = scmp.ge.s32.totalorder %s1420_s24, 1  ;;  %p214_p8 = scmp.lt.s32.totalorder %s1420_s24, 3 }
   0xc   : > { %p215_p9 = pnand %p1086_p7, %p214_p8 }
   0xd   : > { %p242_p10 = scmp.lt.s32.totalorder (!%p215_p9), %s1481_s25, 1  ;;  %s240_s11 = sand.u32 (!%p215_p9), 1, %s1412_s22  }
   0xe   : > { %218 = sbr.rel (%p215_p9) target bundleno = 523 (0x20b), region = 44  ;;  %s241_s14 = scalar_lea.vmem (!%p215_p9), [#allocation2], %s240_s11 }
   0xf   : > { %s1016_s19 = scalar_lea.sflag (!%p215_p9), [#allocation3], %s240_s11 }
  0x13   : > { %v1511_v0 = vld [vmem:[%s1981_s1 + $0xf8] sm:$0xff]  ;;  %v286_v3 = vlaneseq  ;;  %v1422_v4 = vmov 0.0   ;;  %v1529_v5 = vld [vmem:[%s1981_s1 + $0xf0] sm:$0xff]  ;;  %v1546_v8 = vld [vmem:[%s1981_s1 + $0xe8] sm:$0xff]  ;;  %s243_s29 = scalar_select %p242_p10, %s1481_s25, 1  ;;  %vm300_vm0 = vcmask 261120  }
  0x14   : > { %v1516_v1 = vld [vmem:[%s1981_s1 + $0x78] sm:$0xff]  ;;  %1098 = vmatprep.subr.mxu0 %v1511_v0  ;;  %1263 = vmatprep.subr.mxu1 %v1422_v4  ;;  %v1534_v6 = vld [vmem:[%s1981_s1 + $0x70] sm:$0xff]  ;;  %v1556_v10 = vld [vmem:[%s1981_s1 + $0x68] sm:$0xff]  ;;  %vm1423_vm1 = vmmov 0   ;;  %vm1013_vm2 = vcmask 73728  }
  0x15   : > { %v1521_v2 = vld [vmem:[%s1981_s1 + $0x118] sm:$0xff]  ;;  %v1539_v7 = vld [vmem:[%s1981_s1 + $0x110] sm:$0xff]  ;;  %1099 = vmatpush3.msra.mxu0 %v1516_v1  ;;  %v1549_v9 = vshrl.u32 %v286_v3, 7  ;;  %v1561_v11 = vld [vmem:[%s1981_s1 + $0x108] sm:$0xff]  ;;  %s1318_s15 = smul.u32 12, %s243_s29  ;;  %1271 = vmatprep.mubr.msk.f32.mxu1 %vm1423_vm1, %v1422_v4 }
  0x16   : > { %1264 = vmatpush3.msra.mxu1 %v1521_v2  ;;  %1100 = vmatprep.subr.mxu0 %v1529_v5  ;;  %v1568_v12 = vld [vmem:[%s1981_s1 + $0xe0] sm:$0xff]  ;;  %v1590_v16 = vld [vmem:[%s1981_s1 + $0xd8] sm:$0xff]  ;;  %v1614_v20 = vld [vmem:[%s1981_s1 + $0xd0] sm:$0xff] }
  0x17   : > { %1265 = vmatprep.subr.mxu1 %v1422_v4  ;;  %1101 = vmatpush3.msra.mxu0 %v1534_v6  ;;  %v1571_v13 = vsub.s32 2, %v1549_v9  ;;  %v1578_v14 = vld [vmem:[%s1981_s1 + $0x60] sm:$0xff]  ;;  %s1595_s9 = scalar_lea.vmem %s1980_s0, %s1318_s15  ;;  %v1602_v17 = vld [vmem:[%s1981_s1 + $0x58] sm:$0xff]  ;;  %v1622_v21 = vld [vmem:[%s1981_s1 + $0x50] sm:$0xff]  ;;  %v1742_v40 = vsub.s32 1, %v1549_v9  ;;  %v1752_v42 = vsub.s32 0, %v1549_v9 }
  0x18   : > { %1266 = vmatpush3.msra.mxu1 %v1539_v7  ;;  %1102 = vmatprep.subr.mxu0 %v1546_v8  ;;  %v1583_v15 = vld [vmem:[%s1981_s1 + $0x100] sm:$0xff]  ;;  %v1629_v22 = vld [vmem:[%s1981_s1 + $0xc8] sm:$0xff]  ;;  %v1657_v26 = vld [vmem:[%s1981_s1 + $0xb8] sm:$0xff]  ;;  %s1028_s15 = sshll.u32 %s241_s14, 4  ;;  %s1029_s15 = int_to_ptr.vmem [resolvable:$true] %s1028_s15 }
  0x19   : > { %1267 = vmatprep.subr.mxu1 %v1422_v4  ;;  %1103 = vmatpush3.msra.mxu0 %v1556_v10  ;;  %v1605_v18 = vld [vmem:[%s1595_s9] sm:$0x7]  ;;  %v1636_v23 = vld [vmem:[%s1981_s1 + $0x48] sm:$0xff]  ;;  %v1667_v28 = vld [vmem:[%s1981_s1 + $0x38] sm:$0xff]  ;;  %s1360_s20 = scalar_lea.vmem %s1029_s15, 16 }
  0x1a   : > { %1268 = vmatpush3.msra.mxu1 %v1561_v11  ;;  %1104 = vmatprep.subr.mxu0 %v1568_v12  ;;  %v297_v19 = vrot.slane %v1605_v18, %v1571_v13  ;;  %v1643_v24 = vld [vmem:[%s1981_s1 + $0xc0] sm:$0xff]  ;;  %v1660_v27 = vld [vmem:[%s1595_s9 + $0x9] sm:$0x7]  ;;  %v1676_v30 = vld [vmem:[%s1981_s1 + $0xb0] sm:$0xff]  ;;  %v293_v46 = vrot.slane %v1605_v18, %v1742_v40  ;;  %v289_v47 = vrot.slane %v1605_v18, %v1752_v42  ;;  %p1361_p11 = scmp.ne.s32.totalorder %s1029_s15, %s1360_s20 }
  0x1b   : > { %1269 = vmatprep.subr.mxu1 %v1422_v4  ;;  %1105 = vmatpush3.msra.mxu0 %v1578_v14  ;;  %v1650_v25 = vld [vmem:[%s1981_s1 + $0x40] sm:$0xff]  ;;  %v785_v29 = vrot.slane %v1660_v27, %v1571_v13  ;;  %v1683_v31 = vld [vmem:[%s1981_s1 + $0x30] sm:$0xff]  ;;  %v1690_v32 = vld [vmem:[%s1981_s1 + $0xa8] sm:$0xff]  ;;  %v781_v56 = vrot.slane %v1660_v27, %v1742_v40  ;;  %v777_v57 = vrot.slane %v1660_v27, %v1752_v42 }
  0x1c   : > { %1270 = vmatpush3.msra.mxu1 %v1583_v15  ;;  %1106 = vmatprep.subr.mxu0 %v1590_v16  ;;  %v1697_v33 = vld [vmem:[%s1981_s1 + $0x28] sm:$0xff]  ;;  %v1704_v34 = vld [vmem:[%s1981_s1 + $0xa0] sm:$0xff]  ;;  %v1718_v36 = vld [vmem:[%s1981_s1 + $0x98] sm:$0xff]  ;;  %p1362_p12 = pnand %p1361_p11, %p1498_p5 }
  0x1d   : > { %1138 = vmatprep.subr.mxu1 %v1511_v0  ;;  %1107 = vmatpush3.msra.mxu0 %v1602_v17  ;;  %v1711_v35 = vld [vmem:[%s1981_s1 + $0x20] sm:$0xff]  ;;  %v1725_v37 = vld [vmem:[%s1981_s1 + $0x18] sm:$0xff]  ;;  %v1732_v38 = vld [vmem:[%s1981_s1 + $0x90] sm:$0xff] }
  0x1e   : > { %1272 = vmatmul.mubr.msk.f32.vlgmr.msra.gmra.mxu1 %vm300_vm0, %v297_v19  ;;  %1108 = vmatprep.subr.mxu0 %v1614_v20  ;;  %v1739_v39 = vld [vmem:[%s1981_s1 + $0x10] sm:$0xff]  ;;  %v1749_v41 = vld [vmem:[%s1981_s1 + $0x88] sm:$0xff]  ;;  %v1766_v44 = vld [vmem:[%s1981_s1 + $0x80] sm:$0xff]  ;;  %p1363_p13 = pneg %p1362_p12 }
  0x1f   : > { %1139 = vmatpush3.msra.mxu1 %v1516_v1  ;;  %1109 = vmatpush3.msra.mxu0 %v1622_v21  ;;  %v1759_v43 = vld [vmem:[%s1981_s1 + $0x8] sm:$0xff]  ;;  %v1773_v45 = vld [vmem:[%s1981_s1] sm:$0xff]  ;;  %v938_v58 = vld [vmem:[%s1984_s4 + $0x18] sm:$0xff] }
  0x20   : > { %1140 = vmatprep.subr.mxu1 %v1529_v5  ;;  %1110 = vmatprep.subr.mxu0 %v1629_v22  ;;  %v1088_v48 = vld [vmem:[%s1595_s9 + $0x3] sm:$0x7]  ;;  %v1817_v52 = vld [vmem:[%s1595_s9 + $0x6] sm:$0x7]  ;;  %v937_v59 = vld [vmem:[%s1984_s4 + $0x10] sm:$0xff]  ;;  %s1095_s9 = sshll.u32 %s1481_s25, 4 }
  0x21   : > { %1141 = vmatpush3.msra.mxu1 %v1534_v6  ;;  %1111 = vmatpush3.msra.mxu0 %v1636_v23  ;;  %v456_v49 = vrot.slane %v1088_v48, %v1742_v40  ;;  %v452_v50 = vrot.slane %v1088_v48, %v1752_v42  ;;  %v460_v51 = vrot.slane %v1088_v48, %v1571_v13  ;;  %v936_v60 = vld [vmem:[%s1984_s4 + $0x8] sm:$0xff]  ;;  %v935_v61 = vld [vmem:[%s1984_s4] sm:$0xff]  ;;  %s1945_s18 = scalar_lea.hbm %s1986_s6, %s1095_s9  ;;  %s1424_s25 = smov [#allocation2]  }
  0x22   : > { %1142 = vmatprep.subr.mxu1 %v1546_v8  ;;  %1112 = vmatprep.subr.mxu0 %v1643_v24  ;;  %v623_v53 = vrot.slane %v1817_v52, %v1571_v13  ;;  %v619_v54 = vrot.slane %v1817_v52, %v1742_v40  ;;  %v615_v55 = vrot.slane %v1817_v52, %v1752_v42  ;;  %s1364_s26 = sshll.u32 %s1424_s25, 4  ;;  %s1365_s26 = int_to_ptr.vmem [resolvable:$false] %s1364_s26 }
  0x23   : > { %1143 = vmatpush3.msra.mxu1 %v1556_v10  ;;  %1113 = vmatpush3.msra.mxu0 %v1650_v25  ;;  %s1366_s28 = scalar_lea.vmem %s1365_s26, 32  ;;  %p1367_p0 = scmp.lt.s32.totalorder %s1029_s15, %s1365_s26 }
  0x24   : > { %1144 = vmatprep.subr.mxu1 %v1568_v12  ;;  %1114 = vmatprep.subr.mxu0 %v1657_v26  ;;  %p1368_p1 = scmp.lt.s32.totalorder %s1366_s28, %s1360_s20 }
  0x25   : > { %1145 = vmatpush3.msra.mxu1 %v1578_v14  ;;  %1115 = vmatpush3.msra.mxu0 %v1667_v28 }
  0x26   : > { %1146 = vmatprep.subr.mxu1 %v1590_v16  ;;  %1116 = vmatprep.subr.mxu0 %v1676_v30  ;;  %p1369_p2 = por %p1368_p1, %p1367_p0 }
  0x27   : > { %1147 = vmatpush3.msra.mxu1 %v1602_v17  ;;  %1117 = vmatpush3.msra.mxu0 %v1683_v31 }
  0x28   : > { %1148 = vmatprep.subr.mxu1 %v1614_v20  ;;  %1118 = vmatprep.subr.mxu0 %v1690_v32  ;;  %p1370_p3 = pnand %p1369_p2, %p1363_p13 }
  0x29   : > { %1149 = vmatpush3.msra.mxu1 %v1622_v21  ;;  %1119 = vmatpush3.msra.mxu0 %v1697_v33 }
  0x2a   : > { %1150 = vmatprep.subr.mxu1 %v1629_v22  ;;  %1120 = vmatprep.subr.mxu0 %v1704_v34 }
  0x2b   : > { %1151 = vmatpush3.msra.mxu1 %v1636_v23  ;;  %1121 = vmatpush3.msra.mxu0 %v1711_v35 }
  0x2c   : > { %1152 = vmatprep.subr.mxu1 %v1643_v24  ;;  %1122 = vmatprep.subr.mxu0 %v1718_v36 }
  0x2d   : > { %1153 = vmatpush3.msra.mxu1 %v1650_v25  ;;  %1123 = vmatpush3.msra.mxu0 %v1725_v37 }
  0x2e   : > { %1154 = vmatprep.subr.mxu1 %v1657_v26  ;;  %1124 = vmatprep.subr.mxu0 %v1732_v38 }
  0x2f   : > { %1155 = vmatpush3.msra.mxu1 %v1667_v28  ;;  %1125 = vmatpush3.msra.mxu0 %v1739_v39 }
  0x30   : > { %1156 = vmatprep.subr.mxu1 %v1676_v30  ;;  %1126 = vmatprep.subr.mxu0 %v1749_v41 }
  0x31   : > { %1157 = vmatpush3.msra.mxu1 %v1683_v31  ;;  %1127 = vmatpush3.msra.mxu0 %v1759_v43 }
  0x32   : > { %1158 = vmatprep.subr.mxu1 %v1690_v32  ;;  %1128 = vmatprep.subr.mxu0 %v1766_v44 }
  0x33   : > { %1159 = vmatpush3.msra.mxu1 %v1697_v33  ;;  %1129 = vmatpush3.msra.mxu0 %v1773_v45 }
  0x34   : > { %1160 = vmatprep.subr.mxu1 %v1704_v34  ;;  %367 = vmatprep.mubr.f32.mxu0 %v293_v46 }
  0x35   : > { %1161 = vmatpush3.msra.mxu1 %v1711_v35  ;;  %368 = vmatmul.mubr.f32.vlgmr.msra.gmra.mxu0 %v289_v47 }
  0x36   : > { %1162 = vmatprep.subr.mxu1 %v1718_v36  ;;  %1274 = vmatprep.subr.mxu0 %v1422_v4 }
  0x37   : > { %1163 = vmatpush3.msra.mxu1 %v1725_v37  ;;  %1275 = vmatpush3.msra.mxu0 %v1521_v2 }
  0x38   : > { %1164 = vmatprep.subr.mxu1 %v1732_v38  ;;  %1276 = vmatprep.subr.mxu0 %v1422_v4 }
  0x39   : > { %1165 = vmatpush3.msra.mxu1 %v1739_v39  ;;  %1277 = vmatpush3.msra.mxu0 %v1539_v7 }
  0x3a   : > { %1166 = vmatprep.subr.mxu1 %v1749_v41  ;;  %1278 = vmatprep.subr.mxu0 %v1422_v4 }
  0x3b   : > { %1167 = vmatpush3.msra.mxu1 %v1759_v43  ;;  %1279 = vmatpush3.msra.mxu0 %v1561_v11 }
  0x3c   : > { %1168 = vmatprep.subr.mxu1 %v1766_v44  ;;  %1280 = vmatprep.subr.mxu0 %v1422_v4 }
  0x3d   : > { %1169 = vmatpush3.msra.mxu1 %v1773_v45  ;;  %529 = vmatprep.mubr.f32.mxu1 %v456_v49 }
  0x3e   : > { %1281 = vmatpush3.msra.mxu0 %v1583_v15  ;;  %530 = vmatmul.mubr.f32.vlgmr.msra.gmra.mxu1 %v452_v50 }
  0x3f   : > { %1282 = vmatprep.mubr.msk.f32.mxu0 %vm1423_vm1, %v1422_v4  ;;  %1178 = vmatprep.subr.mxu0 %v1511_v0 }
  0x40   : > { %1285 = vmatprep.subr.mxu1 %v1422_v4  ;;  %1283 = vmatmul.mubr.msk.f32.vlgmr.msra.gmra.mxu0 %vm300_vm0, %v460_v51 }
  0x41   : > { %1179 = vmatpush3.msra.mxu0 %v1516_v1  ;;  %1286 = vmatpush3.msra.mxu1 %v1521_v2 }
  0x42   : > { %1180 = vmatprep.subr.mxu0 %v1529_v5  ;;  %1287 = vmatprep.subr.mxu1 %v1422_v4 }
  0x43   : > { %1181 = vmatpush3.msra.mxu0 %v1534_v6  ;;  %1288 = vmatpush3.msra.mxu1 %v1539_v7 }
  0x44   : > { %1182 = vmatprep.subr.mxu0 %v1546_v8  ;;  %1289 = vmatprep.subr.mxu1 %v1422_v4 }
  0x45   : > { %1183 = vmatpush3.msra.mxu0 %v1556_v10  ;;  %1290 = vmatpush3.msra.mxu1 %v1561_v11 }
  0x46   : > { %1184 = vmatprep.subr.mxu0 %v1568_v12  ;;  %1291 = vmatprep.subr.mxu1 %v1422_v4 }
  0x47   : > { %1185 = vmatpush3.msra.mxu0 %v1578_v14  ;;  %1292 = vmatpush3.msra.mxu1 %v1583_v15 }
  0x48   : > { %1293 = vmatprep.mubr.msk.f32.mxu1 %vm1423_vm1, %v1422_v4  ;;  %1186 = vmatprep.subr.mxu0 %v1590_v16 }
  0x49   : > { %1294 = vmatmul.mubr.msk.f32.vlgmr.msra.gmra.mxu1 %vm300_vm0, %v623_v53  ;;  %1218 = vmatprep.subr.mxu1 %v1511_v0 }
  0x4a   : > { %1187 = vmatpush3.msra.mxu0 %v1602_v17  ;;  %1219 = vmatpush3.msra.mxu1 %v1516_v1 }
  0x4b   : > { %1188 = vmatprep.subr.mxu0 %v1614_v20  ;;  %1220 = vmatprep.subr.mxu1 %v1529_v5 }
  0x4c   : > { %1189 = vmatpush3.msra.mxu0 %v1622_v21  ;;  %1221 = vmatpush3.msra.mxu1 %v1534_v6 }
  0x4d   : > { %1190 = vmatprep.subr.mxu0 %v1629_v22  ;;  %1222 = vmatprep.subr.mxu1 %v1546_v8 }
  0x4e   : > { %1191 = vmatpush3.msra.mxu0 %v1636_v23  ;;  %1223 = vmatpush3.msra.mxu1 %v1556_v10 }
  0x4f   : > { %1192 = vmatprep.subr.mxu0 %v1643_v24  ;;  %1224 = vmatprep.subr.mxu1 %v1568_v12 }
  0x50   : > { %1193 = vmatpush3.msra.mxu0 %v1650_v25  ;;  %1225 = vmatpush3.msra.mxu1 %v1578_v14 }
  0x51   : > { %1194 = vmatprep.subr.mxu0 %v1657_v26  ;;  %1226 = vmatprep.subr.mxu1 %v1590_v16  ;;  %v282_v16 = vld [vmem:[%s1982_s2] sm:$0x1] }
  0x52   : > { %1195 = vmatpush3.msra.mxu0 %v1667_v28  ;;  %1227 = vmatpush3.msra.mxu1 %v1602_v17 }
  0x53   : > { %1196 = vmatprep.subr.mxu0 %v1676_v30  ;;  %1228 = vmatprep.subr.mxu1 %v1614_v20 }
  0x54   : > { %1197 = vmatpush3.msra.mxu0 %v1683_v31  ;;  %1229 = vmatpush3.msra.mxu1 %v1622_v21 }
  0x55   : > { %1198 = vmatprep.subr.mxu0 %v1690_v32  ;;  %1230 = vmatprep.subr.mxu1 %v1629_v22 }
  0x56   : > { %1199 = vmatpush3.msra.mxu0 %v1697_v33  ;;  %1231 = vmatpush3.msra.mxu1 %v1636_v23 }
  0x57   : > { %1200 = vmatprep.subr.mxu0 %v1704_v34  ;;  %1232 = vmatprep.subr.mxu1 %v1643_v24  ;;  %v283_v24 = vld [vmem:[%s1983_s3] sm:$0x1] }
  0x58   : > { %1201 = vmatpush3.msra.mxu0 %v1711_v35  ;;  %1233 = vmatpush3.msra.mxu1 %v1650_v25 }
  0x59   : > { %1202 = vmatprep.subr.mxu0 %v1718_v36  ;;  %1234 = vmatprep.subr.mxu1 %v1657_v26 }
  0x5a   : > { %1203 = vmatpush3.msra.mxu0 %v1725_v37  ;;  %1235 = vmatpush3.msra.mxu1 %v1667_v28 }
  0x5b   : > { %1204 = vmatprep.subr.mxu0 %v1732_v38  ;;  %1236 = vmatprep.subr.mxu1 %v1676_v30 }
  0x5c   : > { %1205 = vmatpush3.msra.mxu0 %v1739_v39  ;;  %1237 = vmatpush3.msra.mxu1 %v1683_v31 }
  0x5d   : > { %1206 = vmatprep.subr.mxu0 %v1749_v41  ;;  %1238 = vmatprep.subr.mxu1 %v1690_v32 }
  0x5e   : > { %1207 = vmatpush3.msra.mxu0 %v1759_v43  ;;  %1239 = vmatpush3.msra.mxu1 %v1697_v33 }
  0x5f   : > { %1208 = vmatprep.subr.mxu0 %v1766_v44  ;;  %1240 = vmatprep.subr.mxu1 %v1704_v34 }
  0x60   : > { %1209 = vmatpush3.msra.mxu0 %v1773_v45  ;;  %692 = vmatprep.mubr.f32.mxu0 %v619_v54 }
  0x61   : > { %1241 = vmatpush3.msra.mxu1 %v1711_v35  ;;  %693 = vmatmul.mubr.f32.vlgmr.msra.gmra.mxu0 %v615_v55 }
  0x62   : > { %1242 = vmatprep.subr.mxu1 %v1718_v36  ;;  %1296 = vmatprep.subr.mxu0 %v1422_v4 }
  0x63   : > { %1243 = vmatpush3.msra.mxu1 %v1725_v37  ;;  %1297 = vmatpush3.msra.mxu0 %v1521_v2 }
  0x64   : > { %1244 = vmatprep.subr.mxu1 %v1732_v38  ;;  %1298 = vmatprep.subr.mxu0 %v1422_v4 }
  0x65   : > { %1245 = vmatpush3.msra.mxu1 %v1739_v39  ;;  %1299 = vmatpush3.msra.mxu0 %v1539_v7  ;;  %v939_v39 = vld [vmem:[%s1985_s5] sm:$0x1] }
  0x66   : > { %1246 = vmatprep.subr.mxu1 %v1749_v41  ;;  %1300 = vmatprep.subr.mxu0 %v1422_v4 }
  0x67   : > { %1247 = vmatpush3.msra.mxu1 %v1759_v43  ;;  %854 = vmatprep.mubr.f32.mxu1 %v781_v56 }
  0x68   : > { %1248 = vmatprep.subr.mxu1 %v1766_v44  ;;  %1301 = vmatpush3.msra.mxu0 %v1561_v11 }
  0x69   : > { %1249 = vmatpush3.msra.mxu1 %v1773_v45  ;;  %1302 = vmatprep.subr.mxu0 %v1422_v4 }
  0x6a   : > { %855 = vmatmul.mubr.f32.vlgmr.msra.gmra.mxu1 %v777_v57  ;;  %1303 = vmatpush3.msra.mxu0 %v1583_v15 }
  0x6b   : > { %1304 = vmatprep.mubr.msk.f32.mxu0 %vm1423_vm1, %v1422_v4  ;;  %1307 = vmatprep.subr.mxu0 %v1422_v4 }
  0x6c   : > { %1305 = vmatmul.mubr.msk.f32.vlgmr.msra.gmra.mxu0 %vm300_vm0, %v785_v29 }
  0x6d   : > { %1315 = vmatprep.mubr.msk.f32.mxu0 %vm1423_vm1, %v1422_v4  ;;  %1308 = vmatpush3.msra.mxu0 %v938_v58 }
  0x6e   : > { %1309 = vmatprep.subr.mxu0 %v1422_v4 }
  0x6f   : > { %1310 = vmatpush3.msra.mxu0 %v937_v59 }
  0x70   : > { %1311 = vmatprep.subr.mxu0 %v1422_v4 }
  0x71   : > { %1312 = vmatpush3.msra.mxu0 %v936_v60 }
  0x72   : > { %1313 = vmatprep.subr.mxu0 %v1422_v4 }
  0x73   : > { %1314 = vmatpush3.msra.mxu0 %v935_v61 }
  0xde   : > { %v439_v62 = vpop.f32.mrf.mxu1 }
  0xe0   : > { %v1273_v63 = vpop.f32.mrf.mxu1 }
  0xf5   : > { %v1130_v0 = vpop.f32.mrf.mxu0 }
  0xf7   : > { %v1131_v1 = vpop.f32.mrf.mxu0 }
  0xf8   : > { %v1132_v12 = vadd.f32 %v1131_v1, %v1130_v0 }
  0xfa   : > { %v440_v14 = vadd.f32 %v1132_v12, %v439_v62 }
  0xfc   : > { %v443_v21 = vmul.f32 %v440_v14, %v282_v16 }
  0xfe   : > { %v1170_v5 = vpop.f32.mrf.mxu1  ;;  %v444_v28 = vadd.f32 %v443_v21, %v283_v24 }
 0x100   : > { %v601_v2 = vpop.f32.mrf.mxu0  ;;  %v1171_v6 = vpop.f32.mrf.mxu1  ;;  %v445_v33 = vmax.f32 %v444_v28, 0.0 }
 0x101   : > { %v1172_v10 = vadd.f32 %v1171_v6, %v1170_v5 }
 0x102   : > { %v1284_v3 = vpop.f32.mrf.mxu0 }
 0x103   : > { %v602_v13 = vadd.f32 %v1172_v10, %v601_v2 }
 0x105   : > { %v605_v18 = vmul.f32 %v602_v13, %v282_v16 }
 0x107   : > { %v606_v26 = vadd.f32 %v605_v18, %v283_v24 }
 0x109   : > { %v764_v7 = vpop.f32.mrf.mxu1  ;;  %v607_v31 = vmax.f32 %v606_v26, 0.0 }
 0x10b   : > { %v1295_v8 = vpop.f32.mrf.mxu1  ;;  %v608_v36 = vmax.f32 %v445_v33, %v607_v31 }
 0x121   : > { %v1210_v9 = vpop.f32.mrf.mxu0 }
 0x123   : > { %v1211_v11 = vpop.f32.mrf.mxu0 }
 0x124   : > { %v1212_v4 = vadd.f32 %v1211_v11, %v1210_v9 }
 0x126   : > { %v765_v15 = vadd.f32 %v1212_v4, %v764_v7 }
 0x128   : > { %v768_v22 = vmul.f32 %v765_v15, %v282_v16 }
 0x12a   : > { %v1250_v17 = vpop.f32.mrf.mxu1  ;;  %v769_v29 = vadd.f32 %v768_v22, %v283_v24 }
 0x12c   : > { %v1251_v19 = vpop.f32.mrf.mxu1  ;;  %v926_v20 = vpop.f32.mrf.mxu0  ;;  %v770_v34 = vmax.f32 %v769_v29, 0.0 }
 0x12d   : > { %v1252_v23 = vadd.f32 %v1251_v19, %v1250_v17 }
 0x12e   : > { %v1306_v25 = vpop.f32.mrf.mxu0 }
 0x12f   : > { %v927_v27 = vadd.f32 %v1252_v23, %v926_v20 }
 0x131   : > { %v930_v30 = vmul.f32 %v927_v27, %v282_v16 }
 0x133   : > { %v931_v32 = vadd.f32 %v930_v30, %v283_v24 }
 0x135   : > { %v932_v35 = vmax.f32 %v931_v32, 0.0 }
 0x137   : > { %v933_v37 = vmax.f32 %v770_v34, %v932_v35 }
 0x139   : > { %v934_v38 = vmax.f32 %v608_v36, %v933_v37 }
 0x13b   : > { %1316 = vmatmul.mubr.msk.f32.vlgmr.msra.gmra.mxu0 %vm300_vm0, %v934_v38 }
 0x1fb   : > { %v1009_v40 = vpop.f32.mrf.mxu0 }
 0x1fc   : > { %v1010_v41 = vadd.f32 %v1009_v40, %v939_v39 }
 0x1fd   : > { %v1317_v42 = vpop.f32.mrf.mxu0 }
 0x1fe   : > { %1014 = vst.msk [vmem:[%s241_s14] sm:$0x1] %vm1013_vm2, %v1010_v41 }
 0x1ff   : > { %1373 = shalt.err (!%p1370_p3)
}
 0x200   : > { %s1374_s29 = scalar_lea.hbm %s1945_s18, 16  ;;  %s1378_s12 = scalar_lea.hbm %s1986_s6, 32 }
 0x201   : > { %p1375_p4 = scmp.ne.s32.totalorder %s1945_s18, %s1374_s29  ;;  %p1379_p9 = scmp.lt.s32.totalorder %s1945_s18, %s1986_s6 }
 0x202   : > { %p1380_p10 = scmp.lt.s32.totalorder %s1378_s12, %s1374_s29 }
 0x203   : > { %p1376_p7 = pnand %p1375_p4, %p1498_p5 }
 0x204   : > { %p1381_p11 = por %p1380_p10, %p1379_p9 }
 0x205   : > { %p1377_p8 = pneg %p1376_p7 }
 0x207   : > { %p1382_p12 = pnand %p1381_p11, %p1377_p8 }
 0x209   : > { %1385 = shalt.err (!%p1382_p12)
}
 0x20a   : > { %1319 = dma.vmem_to_hbm [thread:$0]  (%p1498_p5), %s1029_s15, 16, %s1945_s18, %s1016_s19  }
 0x20b PF: > { %p1325_p13 = scmp.ge.s32.totalorder %s1420_s24, 2  ;;  %s1040_s14 = sand.u32 1, %s1408_s21  }
 0x20c   : > { %s1041_s16 = scalar_lea.sflag [#allocation3], %s1040_s14 }
 0x20d   : > { %p1322_p0 = pnand %p1325_p13, %p1502_p6 }
 0x20f   : > { %p1323_p1 = pneg %p1322_p0 }
 0x211   : > { %1403 = dma.done.wait (%p1323_p1), %s1041_s16, 16  }
 0x212   : > { %1405 = vsyncadd (%p1323_p1), %s1041_s16, 4294967280  ;;  %p16_p2 = scmp.ge.s32.totalorder %s1485_s27, 4   ;;  %s1989_s21 = smov %s1412_s22 }
 0x213   : > { %s1990_s22 = smov %s1416_s23  ;;  %s1991_s23 = smov %s1496_s30 }
 0x214   : > { %s1992_s24 = smov %s1485_s27  ;;  %18 = sbr.rel (!%p16_p2) target bundleno = 3 (0x3), region = 82 }
 0x219   :  { %1045 = vsyncpa [#allocation3], 1 }
 0x21a   :  { %1047 = vsyncpa [#allocation3 + $0x1], 1 }

</bundles_post_ra>
